<compile_context>
chip_gen: v7x
topology: tpu7x:2x2x1
jax: 0.10.0
libtpu: 0.0.40
codegen_flags: <defaults>
</compile_context>

<pallas_src>
import numpy as np

import jax
import jax.numpy as jnp
from jax.experimental import pallas as pl
from jax.experimental.pallas import tpu as pltpu


C_FEAT = 512          # backbone output channels
C_EMB = 128           # embedding width (vfc/afc outputs)
IMG_HW = 14 * 14      # vpool4 window == full 14x14 map  -> global max pool
AUD_HW = 16 * 12      # apool4 window == full 16x12 map  -> global max pool


# ---------------------------------------------------------------------------
# In-kernel helpers
# ---------------------------------------------------------------------------

def _batchnorm1d(h, gamma, beta):
    # BatchNorm1d, training mode (batch statistics, biased variance), eps=1e-5.
    mean = jnp.mean(h, axis=0, keepdims=True)
    var = jnp.mean((h - mean) ** 2, axis=0, keepdims=True)
    return (h - mean) * jax.lax.rsqrt(var + 1e-5) * gamma + beta


# ---------------------------------------------------------------------------
# Fused forward kernel
# ---------------------------------------------------------------------------

def _avenet1_fused_kernel(
    # inputs
    img_ref, aud_ref,
    img_w_ref, img_b_ref, aud_w_ref, aud_b_ref,
    w1_hbm_ref, b1_ref, w2_hbm_ref, b2_ref,
    vbn_g_ref, vbn_b_ref, abn_g_ref, abn_b_ref,
    fc3_w_ref, fc3_b_ref,
    # outputs
    out_ref, img_emb_ref, aud_emb_ref,
    # scratch
    w1_vmem, w2_vmem, dma_sem,
):
    n = img_emb_ref.shape[0]

    # --- kick off the big fc-weight fetches; they overlap the conv below ----
    w1_cp = pltpu.make_async_copy(w1_hbm_ref, w1_vmem, dma_sem.at[0])
    w2_cp = pltpu.make_async_copy(w2_hbm_ref, w2_vmem, dma_sem.at[1])
    w1_cp.start()
    w2_cp.start()

    # --- visual backbone: 1x1 conv (MXU) + ReLU + global max pool -----------
    # Bias + ReLU hoisted past the spatial max (exact: bias uniform over HW,
    # ReLU monotone), so only the pooled (N, 512) rows see them.
    # TODO(synk): real ImageConvNet architecture unavailable; 1x1-conv stand-in.
    v_rows = []
    for i in range(n):                                   # static unroll, N tiny
        feat = jnp.dot(img_ref[i], img_w_ref[...],
                       preferred_element_type=jnp.float32)      # (IMG_HW, 512)
        v_rows.append(jnp.max(feat, axis=0, keepdims=True))     # (1, 512)
    v_pooled = jnp.maximum(jnp.concatenate(v_rows, axis=0) + img_b_ref[...],
                           0.0)                                  # (N, 512)

    # --- audio backbone: Cin == 1 sign trick, no (N, HW, 512) slab ----------
    # max_hw(x*w) per channel == where(w>=0, w*max(x), w*min(x))  (exact).
    # TODO(synk): real AudioConvNet architecture unavailable; 1x1-conv stand-in.
    aud = aud_ref[...]                                           # (N, AUD_HW)
    a_max = jnp.max(aud, axis=1, keepdims=True)                  # (N, 1)
    a_min = jnp.min(aud, axis=1, keepdims=True)                  # (N, 1)
    aw = aud_w_ref[...]                                          # (1, 512)
    a_pooled = jnp.maximum(
        jnp.where(aw >= 0.0, a_max * aw, a_min * aw) + aud_b_ref[...], 0.0)

    pooled = jnp.concatenate([v_pooled, a_pooled], axis=0)       # (2N, 512)

    # --- fc1 for both branches in ONE matmul: w1 = [vfc1_w | afc1_w] --------
    w1_cp.wait()
    h1 = jnp.dot(pooled, w1_vmem[...].astype(jnp.float32),
                 preferred_element_type=jnp.float32) + b1_ref[...]   # (2N, 256)
    h1 = jnp.maximum(h1, 0.0)

    # --- fc2, block-diagonal [vfc2 0; 0 afc2]: consumes relu(h1) directly ---
    w2_cp.wait()
    h2 = jnp.dot(h1, w2_vmem[...].astype(jnp.float32),
                 preferred_element_type=jnp.float32) + b2_ref[...]   # (2N, 256)

    # --- BatchNorm1d per branch (batch stats over N, like PyTorch train()) --
    img_emb = _batchnorm1d(h2[0:n, 0:C_EMB], vbn_g_ref[...], vbn_b_ref[...])
    aud_emb = _batchnorm1d(h2[n:2 * n, C_EMB:], abn_g_ref[...], abn_b_ref[...])

    # --- fusion + fc3 --------------------------------------------------------
    # TODO(synk): MSFRF definition not provided; elementwise-product stand-in.
    fused = img_emb * aud_emb                                        # (N, 128)
    # fc3 weight zero-padded 3 -> 128 output lanes: lane-dense store.
    out_ref[...] = (jnp.dot(fused, fc3_w_ref[...].astype(jnp.float32),
                            preferred_element_type=jnp.float32) + fc3_b_ref[...])
    img_emb_ref[...] = img_emb
    aud_emb_ref[...] = aud_emb


# ---------------------------------------------------------------------------
# pallas_call wrapper
# ---------------------------------------------------------------------------

def _full_spec(shape):
    nd = len(shape)
    return pl.BlockSpec(shape, lambda i, _nd=nd: (0,) * _nd)


def _cost_estimate(n):
    flops = (
        2 * n * IMG_HW * 3 * C_FEAT                    # image 1x1 conv (MXU)
        + 6 * n * C_FEAT + 2 * n * AUD_HW              # audio min/max sign trick
        + 2 * (2 * n) * C_FEAT * (2 * C_EMB)           # merged fc1
        + 2 * (2 * n) * (2 * C_EMB) * (2 * C_EMB)      # block-diag fc2
        + 2 * n * C_EMB * C_EMB                        # fc3 (lane-padded)
    )
    weight_bytes = 2 * (C_FEAT * 2 * C_EMB + (2 * C_EMB) ** 2 + C_EMB * C_EMB)
    small_f32 = 8 * C_FEAT + 4 * (2 * C_EMB) + 4 * C_EMB + C_EMB
    io_elems = n * IMG_HW * 3 + n * AUD_HW + 3 * n * C_EMB
    return pl.CostEstimate(flops=flops, transcendentals=2 * C_EMB,
                           bytes_accessed=weight_bytes + 4 * (small_f32 + io_elems))


@jax.jit
def avenet1_forward(image, audio, params):
    """image: (N, 3, 14, 14) NCHW, audio: (N, 1, 16, 12) NCHW."""
    n = image.shape[0]

    # channels-last, spatially-flattened image; audio flattened to (N, HW)
    img_x = jnp.transpose(image, (0, 2, 3, 1)).reshape(n, IMG_HW, 3)
    aud_x = audio.reshape(n, AUD_HW)

    args = (
        img_x, aud_x,
        params["img_w"], params["img_b"], params["aud_w"], params["aud_b"],
        params["w1_cat"], params["b1_cat"], params["w2_blk"], params["b2_cat"],
        params["vbn_g"], params["vbn_b"], params["abn_g"], params["abn_b"],
        params["fc3_w_pad"], params["fc3_b_pad"],
    )
    in_specs = [
        _full_spec(img_x.shape), _full_spec(aud_x.shape),
        _full_spec(params["img_w"].shape), _full_spec(params["img_b"].shape),
        _full_spec(params["aud_w"].shape), _full_spec(params["aud_b"].shape),
        pl.BlockSpec(memory_space=pl.ANY),          # w1_cat: manual overlapped DMA
        _full_spec(params["b1_cat"].shape),
        pl.BlockSpec(memory_space=pl.ANY),          # w2_blk: manual overlapped DMA
        _full_spec(params["b2_cat"].shape),
        _full_spec(params["vbn_g"].shape), _full_spec(params["vbn_b"].shape),
        _full_spec(params["abn_g"].shape), _full_spec(params["abn_b"].shape),
        _full_spec(params["fc3_w_pad"].shape), _full_spec(params["fc3_b_pad"].shape),
    ]
    out_shapes = (
        jax.ShapeDtypeStruct((n, C_EMB), jnp.float32),   # fc3 logits, lane-padded
        jax.ShapeDtypeStruct((n, C_EMB), jnp.float32),   # visual embedding
        jax.ShapeDtypeStruct((n, C_EMB), jnp.float32),   # audio embedding
    )

    out_pad, img_emb, aud_emb = pl.pallas_call(
        _avenet1_fused_kernel,
        out_shape=out_shapes,
        grid=(1,),
        in_specs=in_specs,
        out_specs=tuple(_full_spec(s.shape) for s in out_shapes),
        scratch_shapes=[
            pltpu.VMEM((C_FEAT, 2 * C_EMB), jnp.bfloat16),        # w1_cat landing
            pltpu.VMEM((2 * C_EMB, 2 * C_EMB), jnp.bfloat16),     # w2_blk landing
            pltpu.SemaphoreType.DMA((2,)),
        ],
        compiler_params=pltpu.CompilerParams(dimension_semantics=("arbitrary",)),
        cost_estimate=_cost_estimate(n),
    )(*args)

    out = out_pad[:, :3]
    # match PyTorch return: (out, img.view(n,c,1,1), aud.view(n,c,1,1))
    return out, img_emb.reshape(n, C_EMB, 1, 1), aud_emb.reshape(n, C_EMB, 1, 1)


# ---------------------------------------------------------------------------
# Parameter construction (deterministic, synthetic)
# ---------------------------------------------------------------------------

def init_params(key):
    ks = jax.random.split(key, 12)
    s = 0.05

    def nrm(k, shape):
        return (s * jax.random.normal(k, shape)).astype(jnp.float32)

    # imgnet / audnet stand-ins: 1x1 conv 3->512 and 1->512 (+ ReLU)
    img_w = nrm(ks[0], (3, C_FEAT))
    img_b = nrm(ks[1], (1, C_FEAT))
    aud_w = nrm(ks[2], (1, C_FEAT))
    aud_b = nrm(ks[3], (1, C_FEAT))
    # vfc1 / vfc2 and afc1 / afc2  (Linear(512,128), Linear(128,128))
    vfc1_w = nrm(ks[4], (C_FEAT, C_EMB)); vfc1_b = nrm(ks[5], (1, C_EMB))
    vfc2_w = nrm(ks[6], (C_EMB, C_EMB));  vfc2_b = nrm(ks[7], (1, C_EMB))
    afc1_w = nrm(ks[8], (C_FEAT, C_EMB)); afc1_b = nrm(ks[9], (1, C_EMB))
    afc2_w = nrm(ks[10], (C_EMB, C_EMB)); afc2_b = nrm(ks[11], (1, C_EMB))
    # fc3: Linear(128, 3)
    fc3_w = nrm(jax.random.fold_in(key, 102), (C_EMB, 3))
    fc3_b = nrm(jax.random.fold_in(key, 103), (1, 3))

    # fc2 block-diagonal: consumes the merged relu(h1) (2N, 256) directly
    w2_blk = jnp.zeros((2 * C_EMB, 2 * C_EMB), jnp.float32)
    w2_blk = w2_blk.at[:C_EMB, :C_EMB].set(vfc2_w)
    w2_blk = w2_blk.at[C_EMB:, C_EMB:].set(afc2_w)

    return dict(
        img_w=img_w, img_b=img_b, aud_w=aud_w, aud_b=aud_b,
        # both-branch fc1 weights column-concatenated; stored bf16 (half HBM bytes),
        # upcast to f32 in-kernel before the dot.
        w1_cat=jnp.concatenate([vfc1_w, afc1_w], axis=1).astype(jnp.bfloat16),
        b1_cat=jnp.concatenate([vfc1_b, afc1_b], axis=1),     # (1, 256) f32
        w2_blk=w2_blk.astype(jnp.bfloat16),                   # (256, 256) bf16
        b2_cat=jnp.concatenate([vfc2_b, afc2_b], axis=1),     # (1, 256) f32
        # BatchNorm1d(128) affine params (PyTorch default init: weight=1, bias=0)
        vbn_g=jnp.ones((1, C_EMB), jnp.float32), vbn_b=jnp.zeros((1, C_EMB), jnp.float32),
        abn_g=jnp.ones((1, C_EMB), jnp.float32), abn_b=jnp.zeros((1, C_EMB), jnp.float32),
        # fc3 zero-padded from 3 -> 128 output lanes (lane-dense store in kernel)
        fc3_w_pad=jnp.pad(fc3_w, ((0, 0), (0, C_EMB - 3))).astype(jnp.bfloat16),
        fc3_b_pad=jnp.pad(fc3_b, ((0, 0), (0, C_EMB - 3))),
    )


# ---------------------------------------------------------------------------
# Pure-JAX reference of the stand-in forward (for tolerance checks)
# ---------------------------------------------------------------------------

def avenet1_reference(image, audio, params):
    n = image.shape[0]
    hp = jax.lax.Precision.HIGHEST
    img_x = jnp.transpose(image, (0, 2, 3, 1)).reshape(n, IMG_HW, 3)
    aud_x = audio.reshape(n, AUD_HW)

    # visual backbone stand-in (conv -> relu) + global max pool
    img_feat = jnp.maximum(
        jnp.einsum("npc,co->npo", img_x, params["img_w"], precision=hp)
        + params["img_b"], 0.0)
    img_p = jnp.max(img_feat, axis=1)
    # audio backbone stand-in (Cin=1 conv -> relu) + global max pool, materialized
    aud_feat = jnp.maximum(
        aud_x[:, :, None] * params["aud_w"] + params["aud_b"], 0.0)
    aud_p = jnp.max(aud_feat, axis=1)

    w1 = params["w1_cat"].astype(jnp.float32)
    b1 = params["b1_cat"]
    w2 = params["w2_blk"].astype(jnp.float32)
    b2 = params["b2_cat"]

    def branch(pooled, w1_, b1_, w2_, b2_, g, be):
        h = jnp.maximum(jnp.dot(pooled, w1_, precision=hp) + b1_, 0.0)
        h = jnp.dot(h, w2_, precision=hp) + b2_
        mean = jnp.mean(h, axis=0, keepdims=True)
        var = jnp.mean((h - mean) ** 2, axis=0, keepdims=True)
        return (h - mean) * jax.lax.rsqrt(var + 1e-5) * g + be

    img_e = branch(img_p, w1[:, :C_EMB], b1[:, :C_EMB],
                   w2[:C_EMB, :C_EMB], b2[:, :C_EMB],
                   params["vbn_g"], params["vbn_b"])
    aud_e = branch(aud_p, w1[:, C_EMB:], b1[:, C_EMB:],
                   w2[C_EMB:, C_EMB:], b2[:, C_EMB:],
                   params["abn_g"], params["abn_b"])
    fused = img_e * aud_e
    fc3_w = params["fc3_w_pad"].astype(jnp.float32)[:, :3]
    out = jnp.dot(fused, fc3_w, precision=hp) + params["fc3_b_pad"][:, :3]
    return out, img_e, aud_e


# ---------------------------------------------------------------------------
# Main
# ---------------------------------------------------------------------------

if __name__ == "__main__":
    key = jax.random.PRNGKey(0)
    k_img, k_aud, k_par = jax.random.split(key, 3)

    # Spatial sizes match the module's pooling windows: vpool4 expects 14x14
    # feature maps, apool4 expects 16x12.
    image = jax.random.normal(k_img, (2, 3, 14, 14), dtype=jnp.float32)
    audio = jax.random.normal(k_aud, (2, 1, 16, 12), dtype=jnp.float32)
    params = init_params(k_par)

    out, img_emb, aud_emb = avenet1_forward(image, audio, params)
    jax.block_until_ready((out, img_emb, aud_emb))

    assert out.shape == (2, 3)
    assert img_emb.shape == (2, 128, 1, 1)
    assert aud_emb.shape == (2, 128, 1, 1)

    # tolerance check against the pure-JAX reference of the stand-in forward.
    # (BatchNorm over N=2 can amplify tiny matmul-rounding deltas on features
    # with near-zero batch variance, hence the slightly looser atol.)
    ref_out, ref_img, ref_aud = avenet1_reference(image, audio, params)
    np.testing.assert_allclose(np.asarray(out), np.asarray(ref_out),
                               rtol=1e-3, atol=2e-3)
    np.testing.assert_allclose(np.asarray(img_emb[:, :, 0, 0]), np.asarray(ref_img),
                               rtol=1e-3, atol=2e-3)
    np.testing.assert_allclose(np.asarray(aud_emb[:, :, 0, 0]), np.asarray(ref_aud),
                               rtol=1e-3, atol=2e-3)

    print("KERNEL_OK")
</pallas_src>

<mosaic_0001>
module attributes {stable_mosaic.version = 11 : i64} {
  func.func @_avenet1_fused_kernel(%arg0: i32, %arg1: memref<2x196x3xf32, #tpu.memory_space<vmem>>, %arg2: memref<2x192xf32, #tpu.memory_space<vmem>>, %arg3: memref<3x512xf32, #tpu.memory_space<vmem>>, %arg4: memref<1x512xf32, #tpu.memory_space<vmem>>, %arg5: memref<1x512xf32, #tpu.memory_space<vmem>>, %arg6: memref<1x512xf32, #tpu.memory_space<vmem>>, %arg7: memref<512x256xbf16, #tpu.memory_space<any>>, %arg8: memref<1x256xf32, #tpu.memory_space<vmem>>, %arg9: memref<256x256xbf16, #tpu.memory_space<any>>, %arg10: memref<1x256xf32, #tpu.memory_space<vmem>>, %arg11: memref<1x128xf32, #tpu.memory_space<vmem>>, %arg12: memref<1x128xf32, #tpu.memory_space<vmem>>, %arg13: memref<1x128xf32, #tpu.memory_space<vmem>>, %arg14: memref<1x128xf32, #tpu.memory_space<vmem>>, %arg15: memref<128x128xbf16, #tpu.memory_space<vmem>>, %arg16: memref<1x128xf32, #tpu.memory_space<vmem>>, %arg17: memref<2x128xf32, #tpu.memory_space<vmem>>, %arg18: memref<2x128xf32, #tpu.memory_space<vmem>>, %arg19: memref<2x128xf32, #tpu.memory_space<vmem>>, %arg20: memref<512x256xbf16, #tpu.memory_space<vmem>>, %arg21: memref<256x256xbf16, #tpu.memory_space<vmem>>, %arg22: memref<2x!tpu.dma_semaphore, #tpu.memory_space<semaphore_mem>>) attributes {dimension_semantics = [#tpu.dimension_semantics<arbitrary>], iteration_bounds = array<i64: 1>, scalar_prefetch = 0 : i64, scratch_operands = 3 : i64, tpu.core_type = #tpu.core_type<tc>, window_params = [{pipeline_mode = #tpu.pipeline_mode<synchronous>, transform_indices = @transform_0, window_bounds = array<i64: 2, 196, 3>}, {pipeline_mode = #tpu.pipeline_mode<synchronous>, transform_indices = @transform_1, window_bounds = array<i64: 2, 192>}, {pipeline_mode = #tpu.pipeline_mode<synchronous>, transform_indices = @transform_2, window_bounds = array<i64: 3, 512>}, {pipeline_mode = #tpu.pipeline_mode<synchronous>, transform_indices = @transform_3, window_bounds = array<i64: 1, 512>}, {pipeline_mode = #tpu.pipeline_mode<synchronous>, transform_indices = @transform_4, window_bounds = array<i64: 1, 512>}, {pipeline_mode = #tpu.pipeline_mode<synchronous>, transform_indices = @transform_5, window_bounds = array<i64: 1, 512>}, {}, {pipeline_mode = #tpu.pipeline_mode<synchronous>, transform_indices = @transform_7, window_bounds = array<i64: 1, 256>}, {}, {pipeline_mode = #tpu.pipeline_mode<synchronous>, transform_indices = @transform_9, window_bounds = array<i64: 1, 256>}, {pipeline_mode = #tpu.pipeline_mode<synchronous>, transform_indices = @transform_10, window_bounds = array<i64: 1, 128>}, {pipeline_mode = #tpu.pipeline_mode<synchronous>, transform_indices = @transform_11, window_bounds = array<i64: 1, 128>}, {pipeline_mode = #tpu.pipeline_mode<synchronous>, transform_indices = @transform_12, window_bounds = array<i64: 1, 128>}, {pipeline_mode = #tpu.pipeline_mode<synchronous>, transform_indices = @transform_13, window_bounds = array<i64: 1, 128>}, {pipeline_mode = #tpu.pipeline_mode<synchronous>, transform_indices = @transform_14, window_bounds = array<i64: 128, 128>}, {pipeline_mode = #tpu.pipeline_mode<synchronous>, transform_indices = @transform_15, window_bounds = array<i64: 1, 128>}, {pipeline_mode = #tpu.pipeline_mode<synchronous>, transform_indices = @transform_16, window_bounds = array<i64: 2, 128>}, {pipeline_mode = #tpu.pipeline_mode<synchronous>, transform_indices = @transform_17, window_bounds = array<i64: 2, 128>}, {pipeline_mode = #tpu.pipeline_mode<synchronous>, transform_indices = @transform_18, window_bounds = array<i64: 2, 128>}]} {
    %c0_i32 = arith.constant 0 : i32
    %0 = tpu.memref_slice %arg22[%c0_i32] : memref<2x!tpu.dma_semaphore, #tpu.memory_space<semaphore_mem>> -> memref<1x!tpu.dma_semaphore, #tpu.memory_space<semaphore_mem>>
    %1 = tpu.memref_squeeze %0 : memref<1x!tpu.dma_semaphore, #tpu.memory_space<semaphore_mem>> -> memref<!tpu.dma_semaphore, #tpu.memory_space<semaphore_mem>>
    tpu.enqueue_dma source(%arg7 : memref<512x256xbf16, #tpu.memory_space<any>>) target(%arg20 : memref<512x256xbf16, #tpu.memory_space<vmem>>) target_semaphore(%1 : memref<!tpu.dma_semaphore, #tpu.memory_space<semaphore_mem>>)
    %c1_i32 = arith.constant 1 : i32
    %2 = tpu.memref_slice %arg22[%c1_i32] : memref<2x!tpu.dma_semaphore, #tpu.memory_space<semaphore_mem>> -> memref<1x!tpu.dma_semaphore, #tpu.memory_space<semaphore_mem>>
    %3 = tpu.memref_squeeze %2 : memref<1x!tpu.dma_semaphore, #tpu.memory_space<semaphore_mem>> -> memref<!tpu.dma_semaphore, #tpu.memory_space<semaphore_mem>>
    tpu.enqueue_dma source(%arg9 : memref<256x256xbf16, #tpu.memory_space<any>>) target(%arg21 : memref<256x256xbf16, #tpu.memory_space<vmem>>) target_semaphore(%3 : memref<!tpu.dma_semaphore, #tpu.memory_space<semaphore_mem>>)
    %c0 = arith.constant 0 : index
    %c0_0 = arith.constant 0 : index
    %c0_1 = arith.constant 0 : index
    %4 = vector.load %arg1[%c0, %c0_0, %c0_1] : memref<2x196x3xf32, #tpu.memory_space<vmem>>, vector<1x196x3xf32>
    %5 = vector.shape_cast %4 : vector<1x196x3xf32> to vector<196x3xf32>
    %c0_2 = arith.constant 0 : index
    %c0_3 = arith.constant 0 : index
    %6 = vector.load %arg3[%c0_2, %c0_3] : memref<3x512xf32, #tpu.memory_space<vmem>>, vector<3x512xf32>
    %cst = arith.constant dense<0.000000e+00> : vector<196x512xf32>
    %7 = tpu.matmul %5, %6, %cst {dimension_numbers = #tpu.dot_dimension_numbers<[1], [0], [0], [1], [0, 0, 1, 1], [], []>} : vector<196x3xf32>, vector<3x512xf32>, vector<196x512xf32> -> vector<196x512xf32>
    %cst_4 = arith.constant dense<0xFF800000> : vector<512xf32>
    %8 = vector.multi_reduction <maximumf>, %7, %cst_4 [0] : vector<196x512xf32> to vector<512xf32>
    %9 = vector.shape_cast %8 : vector<512xf32> to vector<1x512xf32>
    %c1 = arith.constant 1 : index
    %c0_5 = arith.constant 0 : index
    %c0_6 = arith.constant 0 : index
    %10 = vector.load %arg1[%c1, %c0_5, %c0_6] : memref<2x196x3xf32, #tpu.memory_space<vmem>>, vector<1x196x3xf32>
    %11 = vector.shape_cast %10 : vector<1x196x3xf32> to vector<196x3xf32>
    %c0_7 = arith.constant 0 : index
    %c0_8 = arith.constant 0 : index
    %12 = vector.load %arg3[%c0_7, %c0_8] : memref<3x512xf32, #tpu.memory_space<vmem>>, vector<3x512xf32>
    %cst_9 = arith.constant dense<0.000000e+00> : vector<196x512xf32>
    %13 = tpu.matmul %11, %12, %cst_9 {dimension_numbers = #tpu.dot_dimension_numbers<[1], [0], [0], [1], [0, 0, 1, 1], [], []>} : vector<196x3xf32>, vector<3x512xf32>, vector<196x512xf32> -> vector<196x512xf32>
    %cst_10 = arith.constant dense<0xFF800000> : vector<512xf32>
    %14 = vector.multi_reduction <maximumf>, %13, %cst_10 [0] : vector<196x512xf32> to vector<512xf32>
    %15 = vector.shape_cast %14 : vector<512xf32> to vector<1x512xf32>
    %16 = tpu.concatenate %9, %15 in 0 : vector<1x512xf32>, vector<1x512xf32> -> vector<2x512xf32>
    %c0_11 = arith.constant 0 : index
    %c0_12 = arith.constant 0 : index
    %17 = vector.load %arg4[%c0_11, %c0_12] : memref<1x512xf32, #tpu.memory_space<vmem>>, vector<1x512xf32>
    %18 = vector.broadcast %17 : vector<1x512xf32> to vector<2x512xf32>
    %19 = arith.addf %16, %18 : vector<2x512xf32>
    %cst_13 = arith.constant 0.000000e+00 : f32
    %20 = vector.broadcast %cst_13 : f32 to vector<2x512xf32>
    %21 = arith.maximumf %19, %20 : vector<2x512xf32>
    %c0_14 = arith.constant 0 : index
    %c0_15 = arith.constant 0 : index
    %22 = vector.load %arg2[%c0_14, %c0_15] : memref<2x192xf32, #tpu.memory_space<vmem>>, vector<2x192xf32>
    %cst_16 = arith.constant dense<0xFF800000> : vector<2xf32>
    %23 = vector.multi_reduction <maximumf>, %22, %cst_16 [1] : vector<2x192xf32> to vector<2xf32>
    %24 = vector.shape_cast %23 : vector<2xf32> to vector<2x1xf32>
    %cst_17 = arith.constant dense<0x7F800000> : vector<2xf32>
    %25 = vector.multi_reduction <minimumf>, %22, %cst_17 [1] : vector<2x192xf32> to vector<2xf32>
    %26 = vector.shape_cast %25 : vector<2xf32> to vector<2x1xf32>
    %c0_18 = arith.constant 0 : index
    %c0_19 = arith.constant 0 : index
    %27 = vector.load %arg5[%c0_18, %c0_19] : memref<1x512xf32, #tpu.memory_space<vmem>>, vector<1x512xf32>
    %cst_20 = arith.constant 0.000000e+00 : f32
    %28 = vector.broadcast %cst_20 : f32 to vector<1x512xf32>
    %29 = arith.cmpf oge, %27, %28 : vector<1x512xf32>
    %30 = vector.broadcast %24 : vector<2x1xf32> to vector<2x512xf32>
    %31 = vector.broadcast %27 : vector<1x512xf32> to vector<2x512xf32>
    %32 = arith.mulf %30, %31 : vector<2x512xf32>
    %33 = vector.broadcast %26 : vector<2x1xf32> to vector<2x512xf32>
    %34 = vector.broadcast %27 : vector<1x512xf32> to vector<2x512xf32>
    %35 = arith.mulf %33, %34 : vector<2x512xf32>
    %36 = vector.shape_cast %29 : vector<1x512xi1> to vector<1x512xi1>
    %37 = vector.broadcast %36 : vector<1x512xi1> to vector<2x512xi1>
    %38 = arith.select %37, %32, %35 : vector<2x512xi1>, vector<2x512xf32>
    %c0_21 = arith.constant 0 : index
    %c0_22 = arith.constant 0 : index
    %39 = vector.load %arg6[%c0_21, %c0_22] : memref<1x512xf32, #tpu.memory_space<vmem>>, vector<1x512xf32>
    %40 = vector.broadcast %39 : vector<1x512xf32> to vector<2x512xf32>
    %41 = arith.addf %38, %40 : vector<2x512xf32>
    %cst_23 = arith.constant 0.000000e+00 : f32
    %42 = vector.broadcast %cst_23 : f32 to vector<2x512xf32>
    %43 = arith.maximumf %41, %42 : vector<2x512xf32>
    %44 = tpu.concatenate %21, %43 in 0 : vector<2x512xf32>, vector<2x512xf32> -> vector<4x512xf32>
    %c0_i32_24 = arith.constant 0 : i32
    %45 = tpu.memref_slice %arg22[%c0_i32_24] : memref<2x!tpu.dma_semaphore, #tpu.memory_space<semaphore_mem>> -> memref<1x!tpu.dma_semaphore, #tpu.memory_space<semaphore_mem>>
    %46 = tpu.memref_squeeze %45 : memref<1x!tpu.dma_semaphore, #tpu.memory_space<semaphore_mem>> -> memref<!tpu.dma_semaphore, #tpu.memory_space<semaphore_mem>>
    tpu.wait_dma2 semaphore(%46 : memref<!tpu.dma_semaphore, #tpu.memory_space<semaphore_mem>>) src(%arg7 : memref<512x256xbf16, #tpu.memory_space<any>>) dst(%arg20 : memref<512x256xbf16, #tpu.memory_space<vmem>>)
    %c0_25 = arith.constant 0 : index
    %c0_26 = arith.constant 0 : index
    %47 = vector.load %arg20[%c0_25, %c0_26] : memref<512x256xbf16, #tpu.memory_space<vmem>>, vector<512x256xbf16>
    %48 = arith.extf %47 : vector<512x256xbf16> to vector<512x256xf32>
    %cst_27 = arith.constant dense<0.000000e+00> : vector<4x256xf32>
    %49 = tpu.matmul %44, %48, %cst_27 {dimension_numbers = #tpu.dot_dimension_numbers<[1], [0], [0], [1], [0, 0, 1, 1], [], []>} : vector<4x512xf32>, vector<512x256xf32>, vector<4x256xf32> -> vector<4x256xf32>
    %c0_28 = arith.constant 0 : index
    %c0_29 = arith.constant 0 : index
    %50 = vector.load %arg8[%c0_28, %c0_29] : memref<1x256xf32, #tpu.memory_space<vmem>>, vector<1x256xf32>
    %51 = vector.broadcast %50 : vector<1x256xf32> to vector<4x256xf32>
    %52 = arith.addf %49, %51 : vector<4x256xf32>
    %cst_30 = arith.constant 0.000000e+00 : f32
    %53 = vector.broadcast %cst_30 : f32 to vector<4x256xf32>
    %54 = arith.maximumf %52, %53 : vector<4x256xf32>
    %c1_i32_31 = arith.constant 1 : i32
    %55 = tpu.memref_slice %arg22[%c1_i32_31] : memref<2x!tpu.dma_semaphore, #tpu.memory_space<semaphore_mem>> -> memref<1x!tpu.dma_semaphore, #tpu.memory_space<semaphore_mem>>
    %56 = tpu.memref_squeeze %55 : memref<1x!tpu.dma_semaphore, #tpu.memory_space<semaphore_mem>> -> memref<!tpu.dma_semaphore, #tpu.memory_space<semaphore_mem>>
    tpu.wait_dma2 semaphore(%56 : memref<!tpu.dma_semaphore, #tpu.memory_space<semaphore_mem>>) src(%arg9 : memref<256x256xbf16, #tpu.memory_space<any>>) dst(%arg21 : memref<256x256xbf16, #tpu.memory_space<vmem>>)
    %c0_32 = arith.constant 0 : index
    %c0_33 = arith.constant 0 : index
    %57 = vector.load %arg21[%c0_32, %c0_33] : memref<256x256xbf16, #tpu.memory_space<vmem>>, vector<256x256xbf16>
    %58 = arith.extf %57 : vector<256x256xbf16> to vector<256x256xf32>
    %cst_34 = arith.constant dense<0.000000e+00> : vector<4x256xf32>
    %59 = tpu.matmul %54, %58, %cst_34 {dimension_numbers = #tpu.dot_dimension_numbers<[1], [0], [0], [1], [0, 0, 1, 1], [], []>} : vector<4x256xf32>, vector<256x256xf32>, vector<4x256xf32> -> vector<4x256xf32>
    %c0_35 = arith.constant 0 : index
    %c0_36 = arith.constant 0 : index
    %60 = vector.load %arg10[%c0_35, %c0_36] : memref<1x256xf32, #tpu.memory_space<vmem>>, vector<1x256xf32>
    %61 = vector.broadcast %60 : vector<1x256xf32> to vector<4x256xf32>
    %62 = arith.addf %59, %61 : vector<4x256xf32>
    %63 = vector.extract_strided_slice %62 {offsets = [0, 0], sizes = [2, 128], strides = [1, 1]} : vector<4x256xf32> to vector<2x128xf32>
    %c0_37 = arith.constant 0 : index
    %c0_38 = arith.constant 0 : index
    %64 = vector.load %arg11[%c0_37, %c0_38] : memref<1x128xf32, #tpu.memory_space<vmem>>, vector<1x128xf32>
    %c0_39 = arith.constant 0 : index
    %c0_40 = arith.constant 0 : index
    %65 = vector.load %arg12[%c0_39, %c0_40] : memref<1x128xf32, #tpu.memory_space<vmem>>, vector<1x128xf32>
    %cst_41 = arith.constant dense<0.000000e+00> : vector<128xf32>
    %66 = vector.multi_reduction <add>, %63, %cst_41 [0] : vector<2x128xf32> to vector<128xf32>
    %67 = vector.shape_cast %66 : vector<128xf32> to vector<1x128xf32>
    %cst_42 = arith.constant 2.000000e+00 : f32
    %68 = vector.broadcast %cst_42 : f32 to vector<1x128xf32>
    %69 = arith.divf %67, %68 : vector<1x128xf32>
    %70 = vector.broadcast %69 : vector<1x128xf32> to vector<2x128xf32>
    %71 = arith.subf %63, %70 : vector<2x128xf32>
    %72 = arith.mulf %71, %71 : vector<2x128xf32>
    %cst_43 = arith.constant dense<0.000000e+00> : vector<128xf32>
    %73 = vector.multi_reduction <add>, %72, %cst_43 [0] : vector<2x128xf32> to vector<128xf32>
    %74 = vector.shape_cast %73 : vector<128xf32> to vector<1x128xf32>
    %cst_44 = arith.constant 2.000000e+00 : f32
    %75 = vector.broadcast %cst_44 : f32 to vector<1x128xf32>
    %76 = arith.divf %74, %75 : vector<1x128xf32>
    %77 = vector.broadcast %69 : vector<1x128xf32> to vector<2x128xf32>
    %78 = arith.subf %63, %77 : vector<2x128xf32>
    %cst_45 = arith.constant 9.99999974E-6 : f32
    %79 = vector.broadcast %cst_45 : f32 to vector<1x128xf32>
    %80 = arith.addf %76, %79 : vector<1x128xf32>
    %81 = math.rsqrt %80 : vector<1x128xf32>
    %82 = vector.broadcast %81 : vector<1x128xf32> to vector<2x128xf32>
    %83 = arith.mulf %78, %82 : vector<2x128xf32>
    %84 = vector.broadcast %64 : vector<1x128xf32> to vector<2x128xf32>
    %85 = arith.mulf %83, %84 : vector<2x128xf32>
    %86 = vector.broadcast %65 : vector<1x128xf32> to vector<2x128xf32>
    %87 = arith.addf %85, %86 : vector<2x128xf32>
    %88 = vector.extract_strided_slice %62 {offsets = [2, 128], sizes = [2, 128], strides = [1, 1]} : vector<4x256xf32> to vector<2x128xf32>
    %c0_46 = arith.constant 0 : index
    %c0_47 = arith.constant 0 : index
    %89 = vector.load %arg13[%c0_46, %c0_47] : memref<1x128xf32, #tpu.memory_space<vmem>>, vector<1x128xf32>
    %c0_48 = arith.constant 0 : index
    %c0_49 = arith.constant 0 : index
    %90 = vector.load %arg14[%c0_48, %c0_49] : memref<1x128xf32, #tpu.memory_space<vmem>>, vector<1x128xf32>
    %cst_50 = arith.constant dense<0.000000e+00> : vector<128xf32>
    %91 = vector.multi_reduction <add>, %88, %cst_50 [0] : vector<2x128xf32> to vector<128xf32>
    %92 = vector.shape_cast %91 : vector<128xf32> to vector<1x128xf32>
    %cst_51 = arith.constant 2.000000e+00 : f32
    %93 = vector.broadcast %cst_51 : f32 to vector<1x128xf32>
    %94 = arith.divf %92, %93 : vector<1x128xf32>
    %95 = vector.broadcast %94 : vector<1x128xf32> to vector<2x128xf32>
    %96 = arith.subf %88, %95 : vector<2x128xf32>
    %97 = arith.mulf %96, %96 : vector<2x128xf32>
    %cst_52 = arith.constant dense<0.000000e+00> : vector<128xf32>
    %98 = vector.multi_reduction <add>, %97, %cst_52 [0] : vector<2x128xf32> to vector<128xf32>
    %99 = vector.shape_cast %98 : vector<128xf32> to vector<1x128xf32>
    %cst_53 = arith.constant 2.000000e+00 : f32
    %100 = vector.broadcast %cst_53 : f32 to vector<1x128xf32>
    %101 = arith.divf %99, %100 : vector<1x128xf32>
    %102 = vector.broadcast %94 : vector<1x128xf32> to vector<2x128xf32>
    %103 = arith.subf %88, %102 : vector<2x128xf32>
    %cst_54 = arith.constant 9.99999974E-6 : f32
    %104 = vector.broadcast %cst_54 : f32 to vector<1x128xf32>
    %105 = arith.addf %101, %104 : vector<1x128xf32>
    %106 = math.rsqrt %105 : vector<1x128xf32>
    %107 = vector.broadcast %106 : vector<1x128xf32> to vector<2x128xf32>
    %108 = arith.mulf %103, %107 : vector<2x128xf32>
    %109 = vector.broadcast %89 : vector<1x128xf32> to vector<2x128xf32>
    %110 = arith.mulf %108, %109 : vector<2x128xf32>
    %111 = vector.broadcast %90 : vector<1x128xf32> to vector<2x128xf32>
    %112 = arith.addf %110, %111 : vector<2x128xf32>
    %113 = arith.mulf %87, %112 : vector<2x128xf32>
    %c0_55 = arith.constant 0 : index
    %c0_56 = arith.constant 0 : index
    %114 = vector.load %arg15[%c0_55, %c0_56] : memref<128x128xbf16, #tpu.memory_space<vmem>>, vector<128x128xbf16>
    %115 = arith.extf %114 : vector<128x128xbf16> to vector<128x128xf32>
    %cst_57 = arith.constant dense<0.000000e+00> : vector<2x128xf32>
    %116 = tpu.matmul %113, %115, %cst_57 {dimension_numbers = #tpu.dot_dimension_numbers<[1], [0], [0], [1], [0, 0, 1, 1], [], []>} : vector<2x128xf32>, vector<128x128xf32>, vector<2x128xf32> -> vector<2x128xf32>
    %c0_58 = arith.constant 0 : index
    %c0_59 = arith.constant 0 : index
    %117 = vector.load %arg16[%c0_58, %c0_59] : memref<1x128xf32, #tpu.memory_space<vmem>>, vector<1x128xf32>
    %118 = vector.broadcast %117 : vector<1x128xf32> to vector<2x128xf32>
    %119 = arith.addf %116, %118 : vector<2x128xf32>
    %c0_60 = arith.constant 0 : index
    %c0_61 = arith.constant 0 : index
    %120 = vector.load %arg17[%c0_60, %c0_61] : memref<2x128xf32, #tpu.memory_space<vmem>>, vector<2x128xf32>
    tpu.vector_store %arg17[%c0_60, %c0_61], %119 {strides = array<i32>} : memref<2x128xf32, #tpu.memory_space<vmem>>, vector<2x128xf32>,
    %c0_62 = arith.constant 0 : index
    %c0_63 = arith.constant 0 : index
    %121 = vector.load %arg18[%c0_62, %c0_63] : memref<2x128xf32, #tpu.memory_space<vmem>>, vector<2x128xf32>
    tpu.vector_store %arg18[%c0_62, %c0_63], %87 {strides = array<i32>} : memref<2x128xf32, #tpu.memory_space<vmem>>, vector<2x128xf32>,
    %c0_64 = arith.constant 0 : index
    %c0_65 = arith.constant 0 : index
    %122 = vector.load %arg19[%c0_64, %c0_65] : memref<2x128xf32, #tpu.memory_space<vmem>>, vector<2x128xf32>
    tpu.vector_store %arg19[%c0_64, %c0_65], %112 {strides = array<i32>} : memref<2x128xf32, #tpu.memory_space<vmem>>, vector<2x128xf32>,
    return
  }
  func.func @transform_0(%arg0: i32) -> (i32, i32, i32) {
    %c0_i32 = arith.constant 0 : i32
    %c0_i32_0 = arith.constant 0 : i32
    %c0_i32_1 = arith.constant 0 : i32
    %c0_i32_2 = arith.constant 0 : i32
    return %c0_i32, %c0_i32_0, %c0_i32_1 : i32, i32, i32
  }
  func.func @transform_1(%arg0: i32) -> (i32, i32) {
    %c0_i32 = arith.constant 0 : i32
    %c0_i32_0 = arith.constant 0 : i32
    %c0_i32_1 = arith.constant 0 : i32
    return %c0_i32, %c0_i32_0 : i32, i32
  }
  func.func @transform_2(%arg0: i32) -> (i32, i32) {
    %c0_i32 = arith.constant 0 : i32
    %c0_i32_0 = arith.constant 0 : i32
    %c0_i32_1 = arith.constant 0 : i32
    return %c0_i32, %c0_i32_0 : i32, i32
  }
  func.func @transform_3(%arg0: i32) -> (i32, i32) {
    %c0_i32 = arith.constant 0 : i32
    %c0_i32_0 = arith.constant 0 : i32
    %c0_i32_1 = arith.constant 0 : i32
    return %c0_i32, %c0_i32_0 : i32, i32
  }
  func.func @transform_4(%arg0: i32) -> (i32, i32) {
    %c0_i32 = arith.constant 0 : i32
    %c0_i32_0 = arith.constant 0 : i32
    %c0_i32_1 = arith.constant 0 : i32
    return %c0_i32, %c0_i32_0 : i32, i32
  }
  func.func @transform_5(%arg0: i32) -> (i32, i32) {
    %c0_i32 = arith.constant 0 : i32
    %c0_i32_0 = arith.constant 0 : i32
    %c0_i32_1 = arith.constant 0 : i32
    return %c0_i32, %c0_i32_0 : i32, i32
  }
  func.func @transform_7(%arg0: i32) -> (i32, i32) {
    %c0_i32 = arith.constant 0 : i32
    %c0_i32_0 = arith.constant 0 : i32
    %c0_i32_1 = arith.constant 0 : i32
    return %c0_i32, %c0_i32_0 : i32, i32
  }
  func.func @transform_9(%arg0: i32) -> (i32, i32) {
    %c0_i32 = arith.constant 0 : i32
    %c0_i32_0 = arith.constant 0 : i32
    %c0_i32_1 = arith.constant 0 : i32
    return %c0_i32, %c0_i32_0 : i32, i32
  }
  func.func @transform_10(%arg0: i32) -> (i32, i32) {
    %c0_i32 = arith.constant 0 : i32
    %c0_i32_0 = arith.constant 0 : i32
    %c0_i32_1 = arith.constant 0 : i32
    return %c0_i32, %c0_i32_0 : i32, i32
  }
  func.func @transform_11(%arg0: i32) -> (i32, i32) {
    %c0_i32 = arith.constant 0 : i32
    %c0_i32_0 = arith.constant 0 : i32
    %c0_i32_1 = arith.constant 0 : i32
    return %c0_i32, %c0_i32_0 : i32, i32
  }
  func.func @transform_12(%arg0: i32) -> (i32, i32) {
    %c0_i32 = arith.constant 0 : i32
    %c0_i32_0 = arith.constant 0 : i32
    %c0_i32_1 = arith.constant 0 : i32
    return %c0_i32, %c0_i32_0 : i32, i32
  }
  func.func @transform_13(%arg0: i32) -> (i32, i32) {
    %c0_i32 = arith.constant 0 : i32
    %c0_i32_0 = arith.constant 0 : i32
    %c0_i32_1 = arith.constant 0 : i32
    return %c0_i32, %c0_i32_0 : i32, i32
  }
  func.func @transform_14(%arg0: i32) -> (i32, i32) {
    %c0_i32 = arith.constant 0 : i32
    %c0_i32_0 = arith.constant 0 : i32
    %c0_i32_1 = arith.constant 0 : i32
    return %c0_i32, %c0_i32_0 : i32, i32
  }
  func.func @transform_15(%arg0: i32) -> (i32, i32) {
    %c0_i32 = arith.constant 0 : i32
    %c0_i32_0 = arith.constant 0 : i32
    %c0_i32_1 = arith.constant 0 : i32
    return %c0_i32, %c0_i32_0 : i32, i32
  }
  func.func @transform_16(%arg0: i32) -> (i32, i32) {
    %c0_i32 = arith.constant 0 : i32
    %c0_i32_0 = arith.constant 0 : i32
    %c0_i32_1 = arith.constant 0 : i32
    return %c0_i32, %c0_i32_0 : i32, i32
  }
  func.func @transform_17(%arg0: i32) -> (i32, i32) {
    %c0_i32 = arith.constant 0 : i32
    %c0_i32_0 = arith.constant 0 : i32
    %c0_i32_1 = arith.constant 0 : i32
    return %c0_i32, %c0_i32_0 : i32, i32
  }
  func.func @transform_18(%arg0: i32) -> (i32, i32) {
    %c0_i32 = arith.constant 0 : i32
    %c0_i32_0 = arith.constant 0 : i32
    %c0_i32_1 = arith.constant 0 : i32
    return %c0_i32, %c0_i32_0 : i32, i32
  }
}

</mosaic_0001>

<bundles_post_ra>
// kernel: avenet1_forward.1
= control target key start
LH: loop header
LB: loop body
LE: loop exit
PB: predicated region body
PF: predicated region fallthrough
CT: control target
= control target key end

     0   :  { %s5397_s0 = inlined_call_operand.vmem [shape: f32[2,196,3], index: 0, kind: input, shape index: {}]   ;;  %s5398_s1 = inlined_call_operand.vmem [shape: f32[2,192], index: 1, kind: input, shape index: {}]   ;;  %s5399_s2 = inlined_call_operand.vmem [shape: f32[3,512], index: 2, kind: input, shape index: {}]   ;;  %s5400_s3 = inlined_call_operand.hbm [shape: f32[1,512], index: 3, kind: input, shape index: {}]   ;;  %s5401_s4 = inlined_call_operand.hbm [shape: f32[1,512], index: 4, kind: input, shape index: {}]   ;;  %s5402_s5 = inlined_call_operand.hbm [shape: f32[1,512], index: 5, kind: input, shape index: {}]   ;;  %s5403_s6 = inlined_call_operand.vmem [shape: bf16[512,256], index: 6, kind: input, shape index: {}]   ;;  %s5404_s7 = inlined_call_operand.hbm [shape: f32[1,256], index: 7, kind: input, shape index: {}]   ;;  %s5405_s8 = inlined_call_operand.vmem [shape: bf16[256,256], index: 8, kind: input, shape index: {}]   ;;  %s5406_s9 = inlined_call_operand.hbm [shape: f32[1,256], index: 9, kind: input, shape index: {}]   ;;  %s5407_s10 = inlined_call_operand.hbm [shape: f32[1,128], index: 10, kind: input, shape index: {}]   ;;  %s5408_s11 = inlined_call_operand.hbm [shape: f32[1,128], index: 11, kind: input, shape index: {}]   ;;  %s5409_s12 = inlined_call_operand.hbm [shape: f32[1,128], index: 12, kind: input, shape index: {}]   ;;  %s5410_s13 = inlined_call_operand.hbm [shape: f32[1,128], index: 13, kind: input, shape index: {}]   ;;  %s5411_s14 = inlined_call_operand.vmem [shape: bf16[128,128], index: 14, kind: input, shape index: {}]   ;;  %s5412_s15 = inlined_call_operand.hbm [shape: f32[1,128], index: 15, kind: input, shape index: {}]   ;;  %s5413_s16 = inlined_call_operand.hbm [shape: f32[2,128], index: 16, kind: output, shape index: {0}]   ;;  %s5414_s17 = inlined_call_operand.hbm [shape: f32[2,128], index: 17, kind: output, shape index: {1}]   ;;  %s5415_s18 = inlined_call_operand.hbm [shape: f32[2,128], index: 18, kind: output, shape index: {2}]  }
   0x1   :  { %5418 = sst [smem:[#allocation38_spill]] %s5397_s0 }
   0x2   :  { %5419 = sst [smem:[#allocation39_spill]] %s5398_s1 }
   0x3   :  { %5420 = sst [smem:[#allocation40_spill]] %s5399_s2 }
   0x4   :  { %24 = vsyncpa [#allocation6], 0 }
   0x5   :  { %25 = vsyncpa [#allocation9], 0 }
   0x6   :  { %26 = vsyncpa [#allocation12], 0 }
   0x7   :  { %27 = vsyncpa [#allocation15], 0 }
   0x8   :  { %28 = vsyncpa [#allocation18], 0 }
   0x9   :  { %29 = vsyncpa [#allocation21], 0 }
   0xa   :  { %30 = vsyncpa [#allocation7], 0 }
   0xb   :  { %31 = vsyncpa [#allocation24], 0  ;;  %s4125_s27 = smov [#allocation8]   ;;  %s4126_s29 = smov [#allocation11]  }
   0xc   :  { %s54_s28 = sshll.u32 %s4125_s27, 4  ;;  %s74_s30 = sshll.u32 %s4126_s29, 4  ;;  %s55_s28 = int_to_ptr.vmem [resolvable:$true] %s54_s28  ;;  %s75_s30 = int_to_ptr.vmem [resolvable:$true] %s74_s30 }
   0xd   :  { %s3819_s1 = scalar_lea.hbm %s5401_s4, 64 }
   0xe   :  { %p3820_p0 = scmp.ne.s32.totalorder %s5401_s4, %s3819_s1  ;;  %p3823_p1 = scmp.lt.u32.totalorder %s3819_s1, %s5401_s4 }
  0x10   :  { %p3825_p2 = pnand %p3823_p1, %p3820_p0 }
  0x12   :  { %3828 = shalt.err (!%p3825_p2)
}
  0x13   :  { %s3829_s23 = scalar_lea.vmem %s55_s28, 64  ;;  %p3834_p4 = scmp.lt.s32.totalorder %s55_s28, %s55_s28 }
  0x14   :  { %p3830_p3 = scmp.ne.s32.totalorder %s55_s28, %s3829_s23  ;;  %p3835_p5 = scmp.lt.s32.totalorder %s3829_s23, %s3829_s23 }
  0x16   :  { %p3836_p6 = por %p3835_p5, %p3834_p4 }
  0x18   :  { %p3837_p7 = pnand %p3836_p6, %p3830_p3 }
  0x1a   :  { %3840 = shalt.err (!%p3837_p7)
}
  0x1b   :  { %57 = dma.hbm_to_vmem [thread:$0]  %s5401_s4, 64, %s55_s28, [#allocation9]  }
  0x1c   :  { %s3841_s29 = scalar_lea.hbm %s5404_s7, 32 }
  0x1d   :  { %p3842_p8 = scmp.ne.s32.totalorder %s5404_s7, %s3841_s29  ;;  %p3845_p9 = scmp.lt.u32.totalorder %s3841_s29, %s5404_s7 }
  0x1f   :  { %p3847_p10 = pnand %p3845_p9, %p3842_p8 }
  0x21   :  { %3850 = shalt.err (!%p3847_p10)
}
  0x22   :  { %s3851_s21 = scalar_lea.vmem %s75_s30, 32  ;;  %p3856_p12 = scmp.lt.s32.totalorder %s75_s30, %s75_s30 }
  0x23   :  { %p3852_p11 = scmp.ne.s32.totalorder %s75_s30, %s3851_s21  ;;  %p3857_p13 = scmp.lt.s32.totalorder %s3851_s21, %s3851_s21 }
  0x25   :  { %p3858_p0 = por %p3857_p13, %p3856_p12 }
  0x27   :  { %p3859_p1 = pnand %p3858_p0, %p3852_p11 }
  0x29   :  { %3862 = shalt.err (!%p3859_p1)
}
  0x2a   :  { %77 = dma.hbm_to_vmem [thread:$0]  %s5404_s7, 32, %s75_s30, [#allocation12]  }
  0x2b   :  { %s4127_s22 = smov [#allocation14]   ;;  %s4128_s23 = smov [#allocation17]  }
  0x2c   :  { %s94_s2 = sshll.u32 %s4127_s22, 4  ;;  %s114_s24 = sshll.u32 %s4128_s23, 4  ;;  %s95_s2 = int_to_ptr.vmem [resolvable:$true] %s94_s2  ;;  %s115_s24 = int_to_ptr.vmem [resolvable:$true] %s114_s24 }
  0x2d   :  { %s3863_s27 = scalar_lea.hbm %s5407_s10, 16 }
  0x2e   :  { %p3864_p2 = scmp.ne.s32.totalorder %s5407_s10, %s3863_s27  ;;  %p3867_p3 = scmp.lt.u32.totalorder %s3863_s27, %s5407_s10 }
  0x30   :  { %p3869_p4 = pnand %p3867_p3, %p3864_p2 }
  0x32   :  { %3872 = shalt.err (!%p3869_p4)
}
  0x33   :  { %s3873_s7 = scalar_lea.vmem %s95_s2, 16  ;;  %s3877_s30 = scalar_lea.vmem %s95_s2, 32 }
  0x34   :  { %p3874_p5 = scmp.ne.s32.totalorder %s95_s2, %s3873_s7  ;;  %p3878_p6 = scmp.lt.s32.totalorder %s95_s2, %s95_s2 }
  0x35   :  { %p3879_p7 = scmp.lt.s32.totalorder %s3877_s30, %s3873_s7 }
  0x37   :  { %p3880_p8 = por %p3879_p7, %p3878_p6 }
  0x39   :  { %p3881_p9 = pnand %p3880_p8, %p3874_p5 }
  0x3b   :  { %3884 = shalt.err (!%p3881_p9)
}
  0x3c   :  { %97 = dma.hbm_to_vmem [thread:$0]  %s5407_s10, 16, %s95_s2, [#allocation15]  }
  0x3d   :  { %s3885_s22 = scalar_lea.hbm %s5409_s12, 16 }
  0x3e   :  { %p3886_p10 = scmp.ne.s32.totalorder %s5409_s12, %s3885_s22  ;;  %p3889_p11 = scmp.lt.u32.totalorder %s3885_s22, %s5409_s12 }
  0x40   :  { %p3891_p12 = pnand %p3889_p11, %p3886_p10 }
  0x42   :  { %3894 = shalt.err (!%p3891_p12)
}
  0x43   :  { %s3895_s29 = scalar_lea.vmem %s115_s24, 16  ;;  %s3899_s0 = scalar_lea.vmem %s115_s24, 32 }
  0x44   :  { %p3896_p13 = scmp.ne.s32.totalorder %s115_s24, %s3895_s29  ;;  %p3900_p0 = scmp.lt.s32.totalorder %s115_s24, %s115_s24 }
  0x45   :  { %p3901_p1 = scmp.lt.s32.totalorder %s3899_s0, %s3895_s29 }
  0x47   :  { %p3902_p2 = por %p3901_p1, %p3900_p0 }
  0x49   :  { %p3903_p3 = pnand %p3902_p2, %p3896_p13 }
  0x4b   :  { %3906 = shalt.err (!%p3903_p3)
}
  0x4c   :  { %117 = dma.hbm_to_vmem [thread:$0]  %s5409_s12, 16, %s115_s24, [#allocation18]  }
  0x4d   :  { %s4129_s19 = smov [#allocation5]   ;;  %s4130_s7 = smov [#allocation10]  }
  0x4e   :  { %s44_s1 = sshll.u32 %s4129_s19, 4  ;;  %s64_s30 = sshll.u32 %s4130_s7, 4  ;;  %s45_s1 = int_to_ptr.vmem [resolvable:$true] %s44_s1  ;;  %s65_s30 = int_to_ptr.vmem [resolvable:$true] %s64_s30 }
  0x4f   :  { %s3907_s4 = scalar_lea.hbm %s5400_s3, 64 }
  0x50   :  { %p3908_p4 = scmp.ne.s32.totalorder %s5400_s3, %s3907_s4  ;;  %p3911_p5 = scmp.lt.u32.totalorder %s3907_s4, %s5400_s3 }
  0x52   :  { %p3913_p6 = pnand %p3911_p5, %p3908_p4 }
  0x54   :  { %3916 = shalt.err (!%p3913_p6)
}
  0x55   :  { %s3917_s12 = scalar_lea.vmem %s45_s1, 64  ;;  %p3922_p8 = scmp.lt.s32.totalorder %s45_s1, %s45_s1 }
  0x56   :  { %p3918_p7 = scmp.ne.s32.totalorder %s45_s1, %s3917_s12  ;;  %p3923_p9 = scmp.lt.s32.totalorder %s3917_s12, %s3917_s12 }
  0x58   :  { %p3924_p10 = por %p3923_p9, %p3922_p8 }
  0x5a   :  { %p3925_p11 = pnand %p3924_p10, %p3918_p7 }
  0x5c   :  { %3928 = shalt.err (!%p3925_p11)
}
  0x5d   :  { %47 = dma.hbm_to_vmem [thread:$0]  %s5400_s3, 64, %s45_s1, [#allocation6]  }
  0x5e   :  { %s3929_s0 = scalar_lea.hbm %s5402_s5, 64 }
  0x5f   :  { %p3930_p12 = scmp.ne.s32.totalorder %s5402_s5, %s3929_s0  ;;  %p3933_p13 = scmp.lt.u32.totalorder %s3929_s0, %s5402_s5 }
  0x61   :  { %p3935_p0 = pnand %p3933_p13, %p3930_p12 }
  0x63   :  { %3938 = shalt.err (!%p3935_p0)
}
  0x64   :  { %s3939_s20 = scalar_lea.vmem %s65_s30, 64  ;;  %p3944_p2 = scmp.lt.s32.totalorder %s65_s30, %s65_s30 }
  0x65   :  { %p3940_p1 = scmp.ne.s32.totalorder %s65_s30, %s3939_s20  ;;  %p3945_p3 = scmp.lt.s32.totalorder %s3939_s20, %s3939_s20 }
  0x67   :  { %p3946_p4 = por %p3945_p3, %p3944_p2 }
  0x69   :  { %p3947_p5 = pnand %p3946_p4, %p3940_p1 }
  0x6b   :  { %3950 = shalt.err (!%p3947_p5)
}
  0x6c   :  { %67 = dma.hbm_to_vmem [thread:$0]  %s5402_s5, 64, %s65_s30, [#allocation9]  }
  0x6d   :  { %s4131_s21 = smov [#allocation13]   ;;  %s4132_s28 = smov [#allocation16]  }
  0x6e   :  { %s84_s4 = sshll.u32 %s4131_s21, 4  ;;  %s104_s22 = sshll.u32 %s4132_s28, 4  ;;  %s85_s4 = int_to_ptr.vmem [resolvable:$true] %s84_s4  ;;  %s105_s22 = int_to_ptr.vmem [resolvable:$true] %s104_s22 }
  0x6f   :  { %s3951_s12 = scalar_lea.hbm %s5406_s9, 32 }
  0x70   :  { %p3952_p6 = scmp.ne.s32.totalorder %s5406_s9, %s3951_s12  ;;  %p3955_p7 = scmp.lt.u32.totalorder %s3951_s12, %s5406_s9 }
  0x72   :  { %p3957_p8 = pnand %p3955_p7, %p3952_p6 }
  0x74   :  { %3960 = shalt.err (!%p3957_p8)
}
  0x75   :  { %s3961_s5 = scalar_lea.vmem %s85_s4, 32  ;;  %p3966_p10 = scmp.lt.s32.totalorder %s85_s4, %s85_s4 }
  0x76   :  { %p3962_p9 = scmp.ne.s32.totalorder %s85_s4, %s3961_s5  ;;  %p3967_p11 = scmp.lt.s32.totalorder %s3961_s5, %s3961_s5 }
  0x78   :  { %p3968_p12 = por %p3967_p11, %p3966_p10 }
  0x7a   :  { %p3969_p13 = pnand %p3968_p12, %p3962_p9 }
  0x7c   :  { %3972 = shalt.err (!%p3969_p13)
}
  0x7d   :  { %87 = dma.hbm_to_vmem [thread:$0]  %s5406_s9, 32, %s85_s4, [#allocation12]  }
  0x7e   :  { %s3973_s19 = scalar_lea.hbm %s5408_s11, 16 }
  0x7f   :  { %p3974_p0 = scmp.ne.s32.totalorder %s5408_s11, %s3973_s19  ;;  %p3977_p1 = scmp.lt.u32.totalorder %s3973_s19, %s5408_s11 }
  0x81   :  { %p3979_p2 = pnand %p3977_p1, %p3974_p0 }
  0x83   :  { %3982 = shalt.err (!%p3979_p2)
}
  0x84   :  { %s3983_s21 = scalar_lea.vmem %s105_s22, 16  ;;  %s3987_s28 = scalar_lea.vmem %s105_s22, 32 }
  0x85   :  { %p3984_p3 = scmp.ne.s32.totalorder %s105_s22, %s3983_s21  ;;  %p3988_p4 = scmp.lt.s32.totalorder %s105_s22, %s105_s22 }
  0x86   :  { %p3989_p5 = scmp.lt.s32.totalorder %s3987_s28, %s3983_s21 }
  0x88   :  { %p3990_p6 = por %p3989_p5, %p3988_p4 }
  0x8a   :  { %p3991_p7 = pnand %p3990_p6, %p3984_p3 }
  0x8c   :  { %3994 = shalt.err (!%p3991_p7)
}
  0x8d   :  { %107 = dma.hbm_to_vmem [thread:$0]  %s5408_s11, 16, %s105_s22, [#allocation15]  }
  0x8e   :  { %s4133_s23 = smov [#allocation19]   ;;  %s4134_s12 = smov [#allocation20]  }
  0x8f   :  { %s124_s25 = sshll.u32 %s4133_s23, 4  ;;  %s136_s24 = sshll.u32 %s4134_s12, 4  ;;  %s125_s25 = int_to_ptr.vmem [resolvable:$true] %s124_s25  ;;  %s137_s24 = int_to_ptr.vmem [resolvable:$true] %s136_s24 }
  0x90   :  { %s3995_s29 = scalar_lea.hbm %s5410_s13, 16 }
  0x91   :  { %p3996_p8 = scmp.ne.s32.totalorder %s5410_s13, %s3995_s29  ;;  %p3999_p9 = scmp.lt.u32.totalorder %s3995_s29, %s5410_s13 }
  0x93   :  { %p4001_p10 = pnand %p3999_p9, %p3996_p8 }
  0x95   :  { %4004 = shalt.err (!%p4001_p10)
}
  0x96   :  { %s4005_s11 = scalar_lea.vmem %s125_s25, 16  ;;  %s4009_s22 = scalar_lea.vmem %s125_s25, 32 }
  0x97   :  { %p4006_p11 = scmp.ne.s32.totalorder %s125_s25, %s4005_s11  ;;  %p4010_p12 = scmp.lt.s32.totalorder %s125_s25, %s125_s25 }
  0x98   :  { %p4011_p13 = scmp.lt.s32.totalorder %s4009_s22, %s4005_s11 }
  0x9a   :  { %p4012_p0 = por %p4011_p13, %p4010_p12 }
  0x9c   :  { %p4013_p1 = pnand %p4012_p0, %p4006_p11 }
  0x9e   :  { %4016 = shalt.err (!%p4013_p1)
}
  0x9f   :  { %127 = dma.hbm_to_vmem [thread:$0]  %s5410_s13, 16, %s125_s25, [#allocation18]  }
  0xa0   :  { %s4017_s3 = scalar_lea.hbm %s5412_s15, 16 }
  0xa1   :  { %p4018_p2 = scmp.ne.s32.totalorder %s5412_s15, %s4017_s3  ;;  %p4021_p3 = scmp.lt.u32.totalorder %s4017_s3, %s5412_s15 }
  0xa3   :  { %p4023_p4 = pnand %p4021_p3, %p4018_p2 }
  0xa5   :  { %4026 = shalt.err (!%p4023_p4)
}
  0xa6   :  { %s4027_s4 = scalar_lea.vmem %s137_s24, 16  ;;  %s4031_s23 = scalar_lea.vmem %s137_s24, 32 }
  0xa7   :  { %p4028_p5 = scmp.ne.s32.totalorder %s137_s24, %s4027_s4  ;;  %p4032_p6 = scmp.lt.s32.totalorder %s137_s24, %s137_s24 }
  0xa8   :  { %p4033_p7 = scmp.lt.s32.totalorder %s4031_s23, %s4027_s4 }
  0xaa   :  { %p4034_p8 = por %p4033_p7, %p4032_p6 }
  0xac   :  { %p4035_p9 = pnand %p4034_p8, %p4028_p5 }
  0xae   :  { %4038 = shalt.err (!%p4035_p9)
}
  0xaf   :  { %139 = dma.hbm_to_vmem [thread:$0]  %s5412_s15, 16, %s137_s24, [#allocation21]  }
  0xb0   :  { %4105 = dma.done.wait [#allocation6], 64  }
  0xb1   :  { %4106 = vsyncadd [#allocation6], 4294967232 }
  0xb2   :  { %4107 = dma.done.wait [#allocation9], 128  }
  0xb3   :  { %4108 = vsyncadd [#allocation9], 4294967168 }
  0xb4   :  { %4109 = dma.done.wait [#allocation12], 64  }
  0xb5   :  { %4110 = vsyncadd [#allocation12], 4294967232 }
  0xb6   :  { %4111 = dma.done.wait [#allocation15], 32  }
  0xb7   :  { %4112 = vsyncadd [#allocation15], 4294967264 }
  0xb8   :  { %4113 = dma.done.wait [#allocation18], 32  }
  0xb9   :  { %4114 = vsyncadd [#allocation18], 4294967264 }
  0xba   :  { %4115 = dma.done.wait [#allocation21], 16  }
  0xbb   :  { %4116 = vsyncadd [#allocation21], 4294967280  ;;  %v187_v0 = vld [vmem:[%s5403_s6] sm:$0xf]  ;;  %v189_v1 = vld [vmem:[%s5403_s6 + $0x8] sm:$0xf] }
  0xbc   :  { %v191_v2 = vld [vmem:[%s5403_s6 + $0x4] sm:$0xf]  ;;  %188 = vst [vmem:[#allocation2] sm:$0xf] %v187_v0  ;;  %190 = vst [vmem:[#allocation2 + $0x4] sm:$0xf] %v189_v1 }
  0xbd   :  { %192 = vst [vmem:[#allocation2 + $0x8] sm:$0xf] %v191_v2  ;;  %v193_v3 = vld [vmem:[%s5403_s6 + $0xc] sm:$0xff]   ;;  %v197_v4 = vld [vmem:[%s5403_s6 + $0x18] sm:$0xf]  ;;  %v201_v6 = vld [vmem:[%s5403_s6 + $0x1c] sm:$0xff]  }
  0xbe   :  { %v199_v5 = vld [vmem:[%s5403_s6 + $0x14] sm:$0xf]  ;;  %194 = vst [vmem:[#allocation2 + $0xc] sm:$0xff] %v193_v3   ;;  %198 = vst [vmem:[#allocation2 + $0x14] sm:$0xf] %v197_v4  ;;  %v209_v9 = vld [vmem:[%s5403_s6 + $0x2c] sm:$0xff]  }
  0xbf   :  { %200 = vst [vmem:[#allocation2 + $0x18] sm:$0xf] %v199_v5  ;;  %v205_v7 = vld [vmem:[%s5403_s6 + $0x28] sm:$0xf]  ;;  %v207_v8 = vld [vmem:[%s5403_s6 + $0x24] sm:$0xf] }
  0xc0   :  { %202 = vst [vmem:[#allocation2 + $0x1c] sm:$0xff] %v201_v6   ;;  %206 = vst [vmem:[#allocation2 + $0x24] sm:$0xf] %v205_v7  ;;  %v213_v10 = vld [vmem:[%s5403_s6 + $0x38] sm:$0xf]  ;;  %v217_v12 = vld [vmem:[%s5403_s6 + $0x3c] sm:$0xff]  }
  0xc1   :  { %208 = vst [vmem:[#allocation2 + $0x28] sm:$0xf] %v207_v8  ;;  %v215_v11 = vld [vmem:[%s5403_s6 + $0x34] sm:$0xf]  ;;  %210 = vst [vmem:[#allocation2 + $0x2c] sm:$0xff] %v209_v9   ;;  %v225_v15 = vld [vmem:[%s5403_s6 + $0x4c] sm:$0xff]  }
  0xc2   :  { %214 = vst [vmem:[#allocation2 + $0x34] sm:$0xf] %v213_v10  ;;  %216 = vst [vmem:[#allocation2 + $0x38] sm:$0xf] %v215_v11  ;;  %v221_v13 = vld [vmem:[%s5403_s6 + $0x48] sm:$0xf] }
  0xc3   :  { %v223_v14 = vld [vmem:[%s5403_s6 + $0x44] sm:$0xf]  ;;  %218 = vst [vmem:[#allocation2 + $0x3c] sm:$0xff] %v217_v12   ;;  %222 = vst [vmem:[#allocation2 + $0x44] sm:$0xf] %v221_v13  ;;  %v233_v18 = vld [vmem:[%s5403_s6 + $0x5c] sm:$0xff]  }
  0xc4   :  { %224 = vst [vmem:[#allocation2 + $0x48] sm:$0xf] %v223_v14  ;;  %v229_v16 = vld [vmem:[%s5403_s6 + $0x58] sm:$0xf]  ;;  %v231_v17 = vld [vmem:[%s5403_s6 + $0x54] sm:$0xf] }
  0xc5   :  { %226 = vst [vmem:[#allocation2 + $0x4c] sm:$0xff] %v225_v15   ;;  %230 = vst [vmem:[#allocation2 + $0x54] sm:$0xf] %v229_v16  ;;  %v237_v19 = vld [vmem:[%s5403_s6 + $0x68] sm:$0xf]  ;;  %v241_v21 = vld [vmem:[%s5403_s6 + $0x6c] sm:$0xff]  }
  0xc6   :  { %232 = vst [vmem:[#allocation2 + $0x58] sm:$0xf] %v231_v17  ;;  %v239_v20 = vld [vmem:[%s5403_s6 + $0x64] sm:$0xf]  ;;  %234 = vst [vmem:[#allocation2 + $0x5c] sm:$0xff] %v233_v18   ;;  %v249_v24 = vld [vmem:[%s5403_s6 + $0x7c] sm:$0xff]  }
  0xc7   :  { %238 = vst [vmem:[#allocation2 + $0x64] sm:$0xf] %v237_v19  ;;  %240 = vst [vmem:[#allocation2 + $0x68] sm:$0xf] %v239_v20  ;;  %v245_v22 = vld [vmem:[%s5403_s6 + $0x78] sm:$0xf] }
  0xc8   :  { %v247_v23 = vld [vmem:[%s5403_s6 + $0x74] sm:$0xf]  ;;  %242 = vst [vmem:[#allocation2 + $0x6c] sm:$0xff] %v241_v21   ;;  %246 = vst [vmem:[#allocation2 + $0x74] sm:$0xf] %v245_v22  ;;  %v257_v27 = vld [vmem:[%s5403_s6 + $0x8c] sm:$0xff]  }
  0xc9   :  { %248 = vst [vmem:[#allocation2 + $0x78] sm:$0xf] %v247_v23  ;;  %v253_v25 = vld [vmem:[%s5403_s6 + $0x88] sm:$0xf]  ;;  %v255_v26 = vld [vmem:[%s5403_s6 + $0x84] sm:$0xf] }
  0xca   :  { %250 = vst [vmem:[#allocation2 + $0x7c] sm:$0xff] %v249_v24   ;;  %254 = vst [vmem:[#allocation2 + $0x84] sm:$0xf] %v253_v25  ;;  %v261_v28 = vld [vmem:[%s5403_s6 + $0x98] sm:$0xf]  ;;  %v265_v30 = vld [vmem:[%s5403_s6 + $0x9c] sm:$0xff]  }
  0xcb   :  { %256 = vst [vmem:[#allocation2 + $0x88] sm:$0xf] %v255_v26  ;;  %v263_v29 = vld [vmem:[%s5403_s6 + $0x94] sm:$0xf]  ;;  %258 = vst [vmem:[#allocation2 + $0x8c] sm:$0xff] %v257_v27   ;;  %v273_v33 = vld [vmem:[%s5403_s6 + $0xac] sm:$0xff]  }
  0xcc   :  { %262 = vst [vmem:[#allocation2 + $0x94] sm:$0xf] %v261_v28  ;;  %264 = vst [vmem:[#allocation2 + $0x98] sm:$0xf] %v263_v29  ;;  %v269_v31 = vld [vmem:[%s5403_s6 + $0xa8] sm:$0xf] }
  0xcd   :  { %v271_v32 = vld [vmem:[%s5403_s6 + $0xa4] sm:$0xf]  ;;  %266 = vst [vmem:[#allocation2 + $0x9c] sm:$0xff] %v265_v30   ;;  %270 = vst [vmem:[#allocation2 + $0xa4] sm:$0xf] %v269_v31  ;;  %v281_v36 = vld [vmem:[%s5403_s6 + $0xbc] sm:$0xff]  }
  0xce   :  { %272 = vst [vmem:[#allocation2 + $0xa8] sm:$0xf] %v271_v32  ;;  %v277_v34 = vld [vmem:[%s5403_s6 + $0xb8] sm:$0xf]  ;;  %v279_v35 = vld [vmem:[%s5403_s6 + $0xb4] sm:$0xf] }
  0xcf   :  { %274 = vst [vmem:[#allocation2 + $0xac] sm:$0xff] %v273_v33   ;;  %278 = vst [vmem:[#allocation2 + $0xb4] sm:$0xf] %v277_v34  ;;  %v285_v37 = vld [vmem:[%s5403_s6 + $0xc8] sm:$0xf]  ;;  %v289_v39 = vld [vmem:[%s5403_s6 + $0xcc] sm:$0xff]  }
  0xd0   :  { %280 = vst [vmem:[#allocation2 + $0xb8] sm:$0xf] %v279_v35  ;;  %v287_v38 = vld [vmem:[%s5403_s6 + $0xc4] sm:$0xf]  ;;  %282 = vst [vmem:[#allocation2 + $0xbc] sm:$0xff] %v281_v36   ;;  %v297_v42 = vld [vmem:[%s5403_s6 + $0xdc] sm:$0xff]  }
  0xd1   :  { %286 = vst [vmem:[#allocation2 + $0xc4] sm:$0xf] %v285_v37  ;;  %288 = vst [vmem:[#allocation2 + $0xc8] sm:$0xf] %v287_v38  ;;  %v293_v40 = vld [vmem:[%s5403_s6 + $0xd8] sm:$0xf] }
  0xd2   :  { %v295_v41 = vld [vmem:[%s5403_s6 + $0xd4] sm:$0xf]  ;;  %290 = vst [vmem:[#allocation2 + $0xcc] sm:$0xff] %v289_v39   ;;  %294 = vst [vmem:[#allocation2 + $0xd4] sm:$0xf] %v293_v40  ;;  %v305_v45 = vld [vmem:[%s5403_s6 + $0xec] sm:$0xff]  }
  0xd3   :  { %296 = vst [vmem:[#allocation2 + $0xd8] sm:$0xf] %v295_v41  ;;  %v301_v43 = vld [vmem:[%s5403_s6 + $0xe8] sm:$0xf]  ;;  %v303_v44 = vld [vmem:[%s5403_s6 + $0xe4] sm:$0xf] }
  0xd4   :  { %298 = vst [vmem:[#allocation2 + $0xdc] sm:$0xff] %v297_v42   ;;  %302 = vst [vmem:[#allocation2 + $0xe4] sm:$0xf] %v301_v43  ;;  %v309_v46 = vld [vmem:[%s5403_s6 + $0xf8] sm:$0xf]  ;;  %v313_v48 = vld [vmem:[%s5403_s6 + $0xfc] sm:$0xff]  }
  0xd5   :  { %304 = vst [vmem:[#allocation2 + $0xe8] sm:$0xf] %v303_v44  ;;  %v311_v47 = vld [vmem:[%s5403_s6 + $0xf4] sm:$0xf]  ;;  %306 = vst [vmem:[#allocation2 + $0xec] sm:$0xff] %v305_v45   ;;  %v321_v51 = vld [vmem:[%s5403_s6 + $0x10c] sm:$0xff]  }
  0xd6   :  { %310 = vst [vmem:[#allocation2 + $0xf4] sm:$0xf] %v309_v46  ;;  %312 = vst [vmem:[#allocation2 + $0xf8] sm:$0xf] %v311_v47  ;;  %v317_v49 = vld [vmem:[%s5403_s6 + $0x108] sm:$0xf] }
  0xd7   :  { %v319_v50 = vld [vmem:[%s5403_s6 + $0x104] sm:$0xf]  ;;  %314 = vst [vmem:[#allocation2 + $0xfc] sm:$0xff] %v313_v48   ;;  %318 = vst [vmem:[#allocation2 + $0x104] sm:$0xf] %v317_v49  ;;  %v329_v54 = vld [vmem:[%s5403_s6 + $0x11c] sm:$0xff]  }
  0xd8   :  { %320 = vst [vmem:[#allocation2 + $0x108] sm:$0xf] %v319_v50  ;;  %v325_v52 = vld [vmem:[%s5403_s6 + $0x118] sm:$0xf]  ;;  %v327_v53 = vld [vmem:[%s5403_s6 + $0x114] sm:$0xf] }
  0xd9   :  { %322 = vst [vmem:[#allocation2 + $0x10c] sm:$0xff] %v321_v51   ;;  %326 = vst [vmem:[#allocation2 + $0x114] sm:$0xf] %v325_v52  ;;  %v333_v55 = vld [vmem:[%s5403_s6 + $0x128] sm:$0xf]  ;;  %v337_v57 = vld [vmem:[%s5403_s6 + $0x12c] sm:$0xff]  }
  0xda   :  { %328 = vst [vmem:[#allocation2 + $0x118] sm:$0xf] %v327_v53  ;;  %v335_v56 = vld [vmem:[%s5403_s6 + $0x124] sm:$0xf]  ;;  %330 = vst [vmem:[#allocation2 + $0x11c] sm:$0xff] %v329_v54   ;;  %v345_v60 = vld [vmem:[%s5403_s6 + $0x13c] sm:$0xff]  }
  0xdb   :  { %334 = vst [vmem:[#allocation2 + $0x124] sm:$0xf] %v333_v55  ;;  %336 = vst [vmem:[#allocation2 + $0x128] sm:$0xf] %v335_v56  ;;  %v341_v58 = vld [vmem:[%s5403_s6 + $0x138] sm:$0xf] }
  0xdc   :  { %v343_v59 = vld [vmem:[%s5403_s6 + $0x134] sm:$0xf]  ;;  %338 = vst [vmem:[#allocation2 + $0x12c] sm:$0xff] %v337_v57   ;;  %342 = vst [vmem:[#allocation2 + $0x134] sm:$0xf] %v341_v58  ;;  %v353_v63 = vld [vmem:[%s5403_s6 + $0x14c] sm:$0xff]  }
  0xdd   :  { %344 = vst [vmem:[#allocation2 + $0x138] sm:$0xf] %v343_v59  ;;  %v349_v61 = vld [vmem:[%s5403_s6 + $0x148] sm:$0xf]  ;;  %v351_v62 = vld [vmem:[%s5403_s6 + $0x144] sm:$0xf] }
  0xde   :  { %346 = vst [vmem:[#allocation2 + $0x13c] sm:$0xff] %v345_v60   ;;  %350 = vst [vmem:[#allocation2 + $0x144] sm:$0xf] %v349_v61  ;;  %v357_v0 = vld [vmem:[%s5403_s6 + $0x158] sm:$0xf]  ;;  %v361_v2 = vld [vmem:[%s5403_s6 + $0x15c] sm:$0xff]  }
  0xdf   :  { %352 = vst [vmem:[#allocation2 + $0x148] sm:$0xf] %v351_v62  ;;  %v359_v1 = vld [vmem:[%s5403_s6 + $0x154] sm:$0xf]  ;;  %354 = vst [vmem:[#allocation2 + $0x14c] sm:$0xff] %v353_v63   ;;  %v369_v5 = vld [vmem:[%s5403_s6 + $0x16c] sm:$0xff]  }
  0xe0   :  { %358 = vst [vmem:[#allocation2 + $0x154] sm:$0xf] %v357_v0  ;;  %360 = vst [vmem:[#allocation2 + $0x158] sm:$0xf] %v359_v1  ;;  %v365_v3 = vld [vmem:[%s5403_s6 + $0x168] sm:$0xf] }
  0xe1   :  { %v367_v4 = vld [vmem:[%s5403_s6 + $0x164] sm:$0xf]  ;;  %362 = vst [vmem:[#allocation2 + $0x15c] sm:$0xff] %v361_v2   ;;  %366 = vst [vmem:[#allocation2 + $0x164] sm:$0xf] %v365_v3  ;;  %v377_v8 = vld [vmem:[%s5403_s6 + $0x17c] sm:$0xff]  }
  0xe2   :  { %368 = vst [vmem:[#allocation2 + $0x168] sm:$0xf] %v367_v4  ;;  %v373_v6 = vld [vmem:[%s5403_s6 + $0x178] sm:$0xf]  ;;  %v375_v7 = vld [vmem:[%s5403_s6 + $0x174] sm:$0xf] }
  0xe3   :  { %370 = vst [vmem:[#allocation2 + $0x16c] sm:$0xff] %v369_v5   ;;  %374 = vst [vmem:[#allocation2 + $0x174] sm:$0xf] %v373_v6  ;;  %v381_v9 = vld [vmem:[%s5403_s6 + $0x188] sm:$0xf]  ;;  %v385_v11 = vld [vmem:[%s5403_s6 + $0x18c] sm:$0xff]  }
  0xe4   :  { %376 = vst [vmem:[#allocation2 + $0x178] sm:$0xf] %v375_v7  ;;  %v383_v10 = vld [vmem:[%s5403_s6 + $0x184] sm:$0xf]  ;;  %378 = vst [vmem:[#allocation2 + $0x17c] sm:$0xff] %v377_v8   ;;  %v393_v14 = vld [vmem:[%s5403_s6 + $0x19c] sm:$0xff]  }
  0xe5   :  { %382 = vst [vmem:[#allocation2 + $0x184] sm:$0xf] %v381_v9  ;;  %384 = vst [vmem:[#allocation2 + $0x188] sm:$0xf] %v383_v10  ;;  %v389_v12 = vld [vmem:[%s5403_s6 + $0x198] sm:$0xf] }
  0xe6   :  { %v391_v13 = vld [vmem:[%s5403_s6 + $0x194] sm:$0xf]  ;;  %386 = vst [vmem:[#allocation2 + $0x18c] sm:$0xff] %v385_v11   ;;  %390 = vst [vmem:[#allocation2 + $0x194] sm:$0xf] %v389_v12  ;;  %v401_v17 = vld [vmem:[%s5403_s6 + $0x1ac] sm:$0xff]  }
  0xe7   :  { %392 = vst [vmem:[#allocation2 + $0x198] sm:$0xf] %v391_v13  ;;  %v397_v15 = vld [vmem:[%s5403_s6 + $0x1a8] sm:$0xf]  ;;  %v399_v16 = vld [vmem:[%s5403_s6 + $0x1a4] sm:$0xf] }
  0xe8   :  { %394 = vst [vmem:[#allocation2 + $0x19c] sm:$0xff] %v393_v14   ;;  %398 = vst [vmem:[#allocation2 + $0x1a4] sm:$0xf] %v397_v15  ;;  %v405_v18 = vld [vmem:[%s5403_s6 + $0x1b8] sm:$0xf]  ;;  %v409_v20 = vld [vmem:[%s5403_s6 + $0x1bc] sm:$0xff]  }
  0xe9   :  { %400 = vst [vmem:[#allocation2 + $0x1a8] sm:$0xf] %v399_v16  ;;  %v407_v19 = vld [vmem:[%s5403_s6 + $0x1b4] sm:$0xf]  ;;  %402 = vst [vmem:[#allocation2 + $0x1ac] sm:$0xff] %v401_v17   ;;  %v417_v23 = vld [vmem:[%s5403_s6 + $0x1cc] sm:$0xff]  }
  0xea   :  { %406 = vst [vmem:[#allocation2 + $0x1b4] sm:$0xf] %v405_v18  ;;  %408 = vst [vmem:[#allocation2 + $0x1b8] sm:$0xf] %v407_v19  ;;  %v413_v21 = vld [vmem:[%s5403_s6 + $0x1c8] sm:$0xf] }
  0xeb   :  { %v415_v22 = vld [vmem:[%s5403_s6 + $0x1c4] sm:$0xf]  ;;  %410 = vst [vmem:[#allocation2 + $0x1bc] sm:$0xff] %v409_v20   ;;  %414 = vst [vmem:[#allocation2 + $0x1c4] sm:$0xf] %v413_v21  ;;  %v425_v26 = vld [vmem:[%s5403_s6 + $0x1dc] sm:$0xff]  }
  0xec   :  { %416 = vst [vmem:[#allocation2 + $0x1c8] sm:$0xf] %v415_v22  ;;  %v421_v24 = vld [vmem:[%s5403_s6 + $0x1d8] sm:$0xf]  ;;  %v423_v25 = vld [vmem:[%s5403_s6 + $0x1d4] sm:$0xf] }
  0xed   :  { %418 = vst [vmem:[#allocation2 + $0x1cc] sm:$0xff] %v417_v23   ;;  %422 = vst [vmem:[#allocation2 + $0x1d4] sm:$0xf] %v421_v24  ;;  %v429_v27 = vld [vmem:[%s5403_s6 + $0x1e8] sm:$0xf]  ;;  %v433_v29 = vld [vmem:[%s5403_s6 + $0x1ec] sm:$0xff]  }
  0xee   :  { %424 = vst [vmem:[#allocation2 + $0x1d8] sm:$0xf] %v423_v25  ;;  %v431_v28 = vld [vmem:[%s5403_s6 + $0x1e4] sm:$0xf]  ;;  %426 = vst [vmem:[#allocation2 + $0x1dc] sm:$0xff] %v425_v26  }
  0xef   :  { %430 = vst [vmem:[#allocation2 + $0x1e4] sm:$0xf] %v429_v27  ;;  %432 = vst [vmem:[#allocation2 + $0x1e8] sm:$0xf] %v431_v28  ;;  %v437_v30 = vld [vmem:[%s5403_s6 + $0x1f8] sm:$0xf] }
  0xf0   :  { %v439_v31 = vld [vmem:[%s5403_s6 + $0x1f4] sm:$0xf]  ;;  %434 = vst [vmem:[#allocation2 + $0x1ec] sm:$0xff] %v433_v29   ;;  %438 = vst [vmem:[#allocation2 + $0x1f4] sm:$0xf] %v437_v30 }
  0xf1   :  { %440 = vst [vmem:[#allocation2 + $0x1f8] sm:$0xf] %v439_v31  ;;  %v441_v32 = vld [vmem:[%s5403_s6 + $0x1fc] sm:$0xf] }
  0xf2   :  { %442 = vst [vmem:[#allocation2 + $0x1fc] sm:$0xf] %v441_v32 }
  0xf3   :  { %729 = vsyncadd [#allocation4], 8192  ;;  %v748_v33 = vld [vmem:[%s5405_s8] sm:$0xf]  ;;  %v750_v34 = vld [vmem:[%s5405_s8 + $0x8] sm:$0xf] }
  0xf4   :  { %749 = vst [vmem:[#allocation3] sm:$0xf] %v748_v33  ;;  %751 = vst [vmem:[#allocation3 + $0x4] sm:$0xf] %v750_v34  ;;  %v752_v35 = vld [vmem:[%s5405_s8 + $0x4] sm:$0xf] }
  0xf5   :  { %v754_v36 = vld [vmem:[%s5405_s8 + $0xc] sm:$0xff]   ;;  %v758_v37 = vld [vmem:[%s5405_s8 + $0x18] sm:$0xf]  ;;  %753 = vst [vmem:[#allocation3 + $0x8] sm:$0xf] %v752_v35  ;;  %v762_v39 = vld [vmem:[%s5405_s8 + $0x1c] sm:$0xff]  }
  0xf6   :  { %755 = vst [vmem:[#allocation3 + $0xc] sm:$0xff] %v754_v36   ;;  %759 = vst [vmem:[#allocation3 + $0x14] sm:$0xf] %v758_v37  ;;  %v760_v38 = vld [vmem:[%s5405_s8 + $0x14] sm:$0xf]  ;;  %v770_v42 = vld [vmem:[%s5405_s8 + $0x2c] sm:$0xff]  }
  0xf7   :  { %v766_v40 = vld [vmem:[%s5405_s8 + $0x28] sm:$0xf]  ;;  %761 = vst [vmem:[#allocation3 + $0x18] sm:$0xf] %v760_v38  ;;  %763 = vst [vmem:[#allocation3 + $0x1c] sm:$0xff] %v762_v39   ;;  %v778_v45 = vld [vmem:[%s5405_s8 + $0x3c] sm:$0xff]  }
  0xf8   :  { %767 = vst [vmem:[#allocation3 + $0x24] sm:$0xf] %v766_v40  ;;  %v768_v41 = vld [vmem:[%s5405_s8 + $0x24] sm:$0xf]  ;;  %v774_v43 = vld [vmem:[%s5405_s8 + $0x38] sm:$0xf] }
  0xf9   :  { %769 = vst [vmem:[#allocation3 + $0x28] sm:$0xf] %v768_v41  ;;  %771 = vst [vmem:[#allocation3 + $0x2c] sm:$0xff] %v770_v42   ;;  %v776_v44 = vld [vmem:[%s5405_s8 + $0x34] sm:$0xf]  ;;  %v786_v48 = vld [vmem:[%s5405_s8 + $0x4c] sm:$0xff]  }
  0xfa   :  { %775 = vst [vmem:[#allocation3 + $0x34] sm:$0xf] %v774_v43  ;;  %v782_v46 = vld [vmem:[%s5405_s8 + $0x48] sm:$0xf]  ;;  %777 = vst [vmem:[#allocation3 + $0x38] sm:$0xf] %v776_v44 }
  0xfb   :  { %779 = vst [vmem:[#allocation3 + $0x3c] sm:$0xff] %v778_v45   ;;  %783 = vst [vmem:[#allocation3 + $0x44] sm:$0xf] %v782_v46  ;;  %v784_v47 = vld [vmem:[%s5405_s8 + $0x44] sm:$0xf]  ;;  %v794_v51 = vld [vmem:[%s5405_s8 + $0x5c] sm:$0xff]  }
  0xfc   :  { %v790_v49 = vld [vmem:[%s5405_s8 + $0x58] sm:$0xf]  ;;  %785 = vst [vmem:[#allocation3 + $0x48] sm:$0xf] %v784_v47  ;;  %787 = vst [vmem:[#allocation3 + $0x4c] sm:$0xff] %v786_v48   ;;  %v802_v54 = vld [vmem:[%s5405_s8 + $0x6c] sm:$0xff]  }
  0xfd   :  { %791 = vst [vmem:[#allocation3 + $0x54] sm:$0xf] %v790_v49  ;;  %v792_v50 = vld [vmem:[%s5405_s8 + $0x54] sm:$0xf]  ;;  %v798_v52 = vld [vmem:[%s5405_s8 + $0x68] sm:$0xf] }
  0xfe   :  { %793 = vst [vmem:[#allocation3 + $0x58] sm:$0xf] %v792_v50  ;;  %795 = vst [vmem:[#allocation3 + $0x5c] sm:$0xff] %v794_v51   ;;  %v800_v53 = vld [vmem:[%s5405_s8 + $0x64] sm:$0xf]  ;;  %v810_v57 = vld [vmem:[%s5405_s8 + $0x7c] sm:$0xff]  }
  0xff   :  { %799 = vst [vmem:[#allocation3 + $0x64] sm:$0xf] %v798_v52  ;;  %v806_v55 = vld [vmem:[%s5405_s8 + $0x78] sm:$0xf]  ;;  %801 = vst [vmem:[#allocation3 + $0x68] sm:$0xf] %v800_v53 }
 0x100   :  { %803 = vst [vmem:[#allocation3 + $0x6c] sm:$0xff] %v802_v54   ;;  %807 = vst [vmem:[#allocation3 + $0x74] sm:$0xf] %v806_v55  ;;  %v808_v56 = vld [vmem:[%s5405_s8 + $0x74] sm:$0xf]  ;;  %v818_v60 = vld [vmem:[%s5405_s8 + $0x8c] sm:$0xff]  }
 0x101   :  { %v814_v58 = vld [vmem:[%s5405_s8 + $0x88] sm:$0xf]  ;;  %809 = vst [vmem:[#allocation3 + $0x78] sm:$0xf] %v808_v56  ;;  %811 = vst [vmem:[#allocation3 + $0x7c] sm:$0xff] %v810_v57   ;;  %v826_v63 = vld [vmem:[%s5405_s8 + $0x9c] sm:$0xff]  }
 0x102   :  { %815 = vst [vmem:[#allocation3 + $0x84] sm:$0xf] %v814_v58  ;;  %v816_v59 = vld [vmem:[%s5405_s8 + $0x84] sm:$0xf]  ;;  %v822_v61 = vld [vmem:[%s5405_s8 + $0x98] sm:$0xf] }
 0x103   :  { %817 = vst [vmem:[#allocation3 + $0x88] sm:$0xf] %v816_v59  ;;  %819 = vst [vmem:[#allocation3 + $0x8c] sm:$0xff] %v818_v60   ;;  %v824_v62 = vld [vmem:[%s5405_s8 + $0x94] sm:$0xf]  ;;  %v834_v2 = vld [vmem:[%s5405_s8 + $0xac] sm:$0xff]  }
 0x104   :  { %823 = vst [vmem:[#allocation3 + $0x94] sm:$0xf] %v822_v61  ;;  %v830_v0 = vld [vmem:[%s5405_s8 + $0xa8] sm:$0xf]  ;;  %825 = vst [vmem:[#allocation3 + $0x98] sm:$0xf] %v824_v62 }
 0x105   :  { %827 = vst [vmem:[#allocation3 + $0x9c] sm:$0xff] %v826_v63   ;;  %831 = vst [vmem:[#allocation3 + $0xa4] sm:$0xf] %v830_v0  ;;  %v832_v1 = vld [vmem:[%s5405_s8 + $0xa4] sm:$0xf]  ;;  %v842_v5 = vld [vmem:[%s5405_s8 + $0xbc] sm:$0xff]  }
 0x106   :  { %v838_v3 = vld [vmem:[%s5405_s8 + $0xb8] sm:$0xf]  ;;  %833 = vst [vmem:[#allocation3 + $0xa8] sm:$0xf] %v832_v1  ;;  %835 = vst [vmem:[#allocation3 + $0xac] sm:$0xff] %v834_v2   ;;  %v850_v8 = vld [vmem:[%s5405_s8 + $0xcc] sm:$0xff]  }
 0x107   :  { %839 = vst [vmem:[#allocation3 + $0xb4] sm:$0xf] %v838_v3  ;;  %v840_v4 = vld [vmem:[%s5405_s8 + $0xb4] sm:$0xf]  ;;  %v846_v6 = vld [vmem:[%s5405_s8 + $0xc8] sm:$0xf] }
 0x108   :  { %841 = vst [vmem:[#allocation3 + $0xb8] sm:$0xf] %v840_v4  ;;  %843 = vst [vmem:[#allocation3 + $0xbc] sm:$0xff] %v842_v5   ;;  %v848_v7 = vld [vmem:[%s5405_s8 + $0xc4] sm:$0xf]  ;;  %v858_v11 = vld [vmem:[%s5405_s8 + $0xdc] sm:$0xff]  }
 0x109   :  { %847 = vst [vmem:[#allocation3 + $0xc4] sm:$0xf] %v846_v6  ;;  %v854_v9 = vld [vmem:[%s5405_s8 + $0xd8] sm:$0xf]  ;;  %849 = vst [vmem:[#allocation3 + $0xc8] sm:$0xf] %v848_v7 }
 0x10a   :  { %851 = vst [vmem:[#allocation3 + $0xcc] sm:$0xff] %v850_v8   ;;  %855 = vst [vmem:[#allocation3 + $0xd4] sm:$0xf] %v854_v9  ;;  %v856_v10 = vld [vmem:[%s5405_s8 + $0xd4] sm:$0xf]  ;;  %v866_v14 = vld [vmem:[%s5405_s8 + $0xec] sm:$0xff]  }
 0x10b   :  { %v862_v12 = vld [vmem:[%s5405_s8 + $0xe8] sm:$0xf]  ;;  %857 = vst [vmem:[#allocation3 + $0xd8] sm:$0xf] %v856_v10  ;;  %859 = vst [vmem:[#allocation3 + $0xdc] sm:$0xff] %v858_v11  }
 0x10c   :  { %863 = vst [vmem:[#allocation3 + $0xe4] sm:$0xf] %v862_v12  ;;  %v864_v13 = vld [vmem:[%s5405_s8 + $0xe4] sm:$0xf]  ;;  %v870_v15 = vld [vmem:[%s5405_s8 + $0xf8] sm:$0xf] }
 0x10d   :  { %865 = vst [vmem:[#allocation3 + $0xe8] sm:$0xf] %v864_v13  ;;  %867 = vst [vmem:[#allocation3 + $0xec] sm:$0xff] %v866_v14   ;;  %v872_v16 = vld [vmem:[%s5405_s8 + $0xf4] sm:$0xf] }
 0x10e   :  { %871 = vst [vmem:[#allocation3 + $0xf4] sm:$0xf] %v870_v15  ;;  %v874_v17 = vld [vmem:[%s5405_s8 + $0xfc] sm:$0xf]  ;;  %873 = vst [vmem:[#allocation3 + $0xf8] sm:$0xf] %v872_v16 }
 0x10f   :  { %875 = vst [vmem:[#allocation3 + $0xfc] sm:$0xf] %v874_v17 }
 0x110   :  { %1034 = vsyncadd [#allocation4 + $0x1], 4096  ;;  %s5421_s20 = sld [smem:[#allocation40_spill]]  ;;  %vm1142_vm0 = vcmask 1042432   ;;  %v4135_v20 = vmov 0.0   ;;  %s5422_s28 = sld [smem:[#allocation38_spill]] }
 0x111   :  { %1215 = vmatprep.mubr.f32.mxu0 %v4135_v20  ;;  %1341 = vmatprep.mubr.f32.mxu1 %v4135_v20  ;;  %vm1066_vm1 = vcmask 23552   ;;  %s5423_s7 = sld [smem:[#allocation39_spill]]  ;;  %vm2408_vm2 = vcmask 1041408   ;;  %vm2410_vm3 = vcmask 517120   ;;  %vm1604_vm4 = vcmask 1043456  }
 0x112   :  { %vm2361_vm8 = vcmask 1040384  }
 0x116   :  { %v1060_v18 = vld [vmem:[%s5421_s20] sm:$0x77]  ;;  %v1061_v21 = vld [vmem:[%s5421_s20 + $0x8] sm:$0x77]  ;;  %v4826_v26 = vld [vmem:[%s5422_s28 + $0xb0] sm:$0xff] }
 0x117   :  { %v1064_v19 = vcombine.high %v1060_v18, %v1060_v18  ;;  %v1035_v22 = vld [vmem:[%s5422_s28] sm:$0xff]  ;;  %v4809_v23 = vld [vmem:[%s5422_s28 + $0xa8] sm:$0xff]  ;;  %v1065_v24 = vcombine.high %v1061_v21, %v1061_v21  ;;  %v1037_v27 = vld [vmem:[%s5422_s28 + $0x10] sm:$0xff] }
 0x118   :  { %v1036_v25 = vld [vmem:[%s5422_s28 + $0x8] sm:$0xff]  ;;  %v4843_v28 = vld [vmem:[%s5422_s28 + $0xb8] sm:$0xff]  ;;  %v4857_v30 = vld [vmem:[%s5422_s28 + $0xc0] sm:$0xf] }
 0x119   :  { %3342 = vmatprep.subr.msk.mxu0 %vm1142_vm0, %v1064_v19  ;;  %3790 = vmatprep.subr.msk.mxu1 %vm1142_vm0, %v1064_v19  ;;  %v1038_v29 = vld [vmem:[%s5422_s28 + $0x18] sm:$0xff]  ;;  %v1039_v31 = vld [vmem:[%s5422_s28 + $0x20] sm:$0xff]  ;;  %v1040_v32 = vld [vmem:[%s5422_s28 + $0x28] sm:$0xff] }
 0x11a   :  { %3343 = vmatpush1.msk.msra.mxu0 %vm1142_vm0, %v1060_v18  ;;  %3791 = vmatpush1.msk.msra.mxu1 %vm1142_vm0, %v1060_v18  ;;  %v1041_v33 = vld [vmem:[%s5422_s28 + $0x30] sm:$0xff]  ;;  %v1042_v34 = vld [vmem:[%s5422_s28 + $0x38] sm:$0xff]  ;;  %v1043_v35 = vld [vmem:[%s5422_s28 + $0x40] sm:$0xff] }
 0x11b   :  { %3344 = vmatmul.mubr.msk.f32.vlgmr.msra.gmra.mrb[0].mxu0 %vm1066_vm1, %v1035_v22  ;;  %3365 = vmatmul.mubr.msk.f32.vlgmr.msra.gmra.mrb[0].mxu1 %vm1066_vm1, %v4809_v23  ;;  %v1044_v36 = vld [vmem:[%s5422_s28 + $0x48] sm:$0xff]  ;;  %v1045_v37 = vld [vmem:[%s5422_s28 + $0x50] sm:$0xff]  ;;  %v1046_v38 = vld [vmem:[%s5422_s28 + $0x58] sm:$0xff] }
 0x11c   :  { %3369 = vmatprep.subr.msk.mxu1 %vm1142_vm0, %v1065_v24  ;;  %1221 = vmatprep.mubr.f32.mxu0 %v4135_v20  ;;  %v1047_v39 = vld [vmem:[%s5422_s28 + $0x60] sm:$0xff]  ;;  %v1048_v40 = vld [vmem:[%s5422_s28 + $0x68] sm:$0xff]  ;;  %v1049_v41 = vld [vmem:[%s5422_s28 + $0x70] sm:$0xff] }
 0x11d   :  { %3370 = vmatpush1.msk.msra.mxu1 %vm1142_vm0, %v1061_v21  ;;  %1347 = vmatprep.mubr.f32.mxu1 %v4135_v20  ;;  %v1050_v42 = vld [vmem:[%s5422_s28 + $0x78] sm:$0xff]  ;;  %v1051_v43 = vld [vmem:[%s5422_s28 + $0x80] sm:$0xff]  ;;  %v1052_v44 = vld [vmem:[%s5422_s28 + $0x88] sm:$0xff] }
 0x11e   :  { %3448 = vmatprep.subr.msk.mxu1 %vm1142_vm0, %v1065_v24  ;;  %3421 = vmatprep.subr.msk.mxu0 %vm1142_vm0, %v1064_v19  ;;  %v1053_v45 = vld [vmem:[%s5422_s28 + $0x90] sm:$0xff]  ;;  %v1054_v46 = vld [vmem:[%s5422_s28 + $0x98] sm:$0xff]  ;;  %v1055_v47 = vld [vmem:[%s5422_s28 + $0xa0] sm:$0xff] }
 0x11f   :  { %3345 = vmatmul.mubr.msk.f32.gmra.mrb[2].mxu0 %vm1066_vm1, %v1036_v25  ;;  %3366 = vmatmul.mubr.msk.f32.gmra.mrb[2].mxu1 %vm1066_vm1, %v4826_v26  ;;  %v3396_v48 = vld [vmem:[%s5422_s28 + $0xc8] sm:$0xff]  ;;  %v3397_v49 = vld [vmem:[%s5422_s28 + $0xd0] sm:$0xff]  ;;  %v3398_v50 = vld [vmem:[%s5422_s28 + $0xd8] sm:$0xff] }
 0x120   :  { %1227 = vmatprep.mubr.f32.mxu0 %v4135_v20  ;;  %1353 = vmatprep.mubr.f32.mxu1 %v4135_v20  ;;  %v3399_v51 = vld [vmem:[%s5422_s28 + $0xe0] sm:$0xff]  ;;  %v3400_v52 = vld [vmem:[%s5422_s28 + $0xe8] sm:$0xff]  ;;  %v3401_v53 = vld [vmem:[%s5422_s28 + $0xf0] sm:$0xff] }
 0x121   :  { %3422 = vmatpush1.msk.msra.mxu0 %vm1142_vm0, %v1060_v18  ;;  %v3402_v54 = vld [vmem:[%s5422_s28 + $0xf8] sm:$0xff]  ;;  %v3403_v55 = vld [vmem:[%s5422_s28 + $0x100] sm:$0xff]  ;;  %v3404_v56 = vld [vmem:[%s5422_s28 + $0x108] sm:$0xff] }
 0x122   :  { %v3405_v57 = vld [vmem:[%s5422_s28 + $0x110] sm:$0xff]  ;;  %v3406_v58 = vld [vmem:[%s5422_s28 + $0x118] sm:$0xff]  ;;  %v3475_v59 = vld.sshfl [vmem:[%s5423_s7] sm:$0x33 pattern:$0x76325410] }
 0x123   :  { %3346 = vmatmul.mubr.msk.f32.gmra.mrb[4].mxu0 %vm1066_vm1, %v1037_v27  ;;  %3367 = vmatmul.mubr.msk.f32.gmra.mrb[4].mxu1 %vm1066_vm1, %v4843_v28  ;;  %v2405_v60 = vcombine.high %v3475_v59, %v3475_v59  ;;  %v3407_v61 = vld [vmem:[%s5422_s28 + $0x120] sm:$0xff]  ;;  %v2409_v62 = vsel %vm2408_vm2, %v3475_v59, -inf  ;;  %v3408_v1 = vld [vmem:[%s5422_s28 + $0x128] sm:$0xff]  ;;  %v2415_v2 = vsel %vm2408_vm2, %v3475_v59, inf  ;;  %v3409_v5 = vld [vmem:[%s5422_s28 + $0x130] sm:$0xff] }
 0x124   :  { %1233 = vmatprep.mubr.f32.mxu0 %v4135_v20  ;;  %1359 = vmatprep.mubr.f32.mxu1 %v4135_v20  ;;  %v3410_v6 = vld [vmem:[%s5422_s28 + $0x138] sm:$0xff]  ;;  %v3411_v7 = vld [vmem:[%s5422_s28 + $0x140] sm:$0xff]  ;;  %v3412_v8 = vld [vmem:[%s5422_s28 + $0x148] sm:$0xff] }
 0x125   :  { %v2411_v63 = vsel %vm2410_vm3, %v2405_v60, -inf  ;;  %v2416_v3 = vsel %vm2410_vm3, %v2405_v60, inf  ;;  %v3413_v9 = vld [vmem:[%s5422_s28 + $0x150] sm:$0xff]  ;;  %v3414_v10 = vld [vmem:[%s5422_s28 + $0x158] sm:$0xff]  ;;  %v3415_v11 = vld [vmem:[%s5422_s28 + $0x160] sm:$0xff] }
 0x126   :  { %v2412_v0 = vmax.f32 %v2409_v62, %v2411_v63  ;;  %v2417_v4 = vmin.f32 %v2415_v2, %v2416_v3  ;;  %v3416_v12 = vld [vmem:[%s5422_s28 + $0x168] sm:$0xff]  ;;  %v3417_v13 = vld [vmem:[%s5422_s28 + $0x170] sm:$0xff]  ;;  %v3418_v14 = vld [vmem:[%s5422_s28 + $0x178] sm:$0xff] }
 0x127   :  { %3347 = vmatmul.mubr.msk.f32.gmra.mrb[6].mxu0 %vm1066_vm1, %v1038_v29  ;;  %3368 = vmatmul.mubr.msk.f32.gmra.mrb[6].mxu1 %vm1066_vm1, %v4857_v30  ;;  %v3419_v15 = vld [vmem:[%s5422_s28 + $0x180] sm:$0xff]  ;;  %v3420_v16 = vld [vmem:[%s5422_s28 + $0x188] sm:$0xf] }
 0x128   :  { %1239 = vmatprep.mubr.f32.mxu0 %v4135_v20  ;;  %1430 = vmatprep.mubr.f32.mxu1 %v4135_v20 }
 0x129   :  { %2413 = vmax.xlane.f32.xlu0 %v2412_v0 }
 0x12b   :  { %3348 = vmatmul.mubr.msk.f32.gmra.mrb[8].mxu0 %vm1066_vm1, %v1039_v31  ;;  %3371 = vmatmul.mubr.msk.f32.vlgmr.msra.gmra.mrb[8].mxu1 %vm1066_vm1, %v1035_v22 }
 0x12c   :  { %3449 = vmatpush1.msk.msra.mxu1 %vm1142_vm0, %v1061_v21  ;;  %1245 = vmatprep.mubr.f32.mxu0 %v4135_v20 }
 0x12d   :  { %1436 = vmatprep.mubr.f32.mxu1 %v4135_v20  ;;  %2418 = vmin.xlane.f32.xlu0 %v2417_v4 }
 0x12f   :  { %3349 = vmatmul.mubr.msk.f32.gmra.mrb[10].mxu0 %vm1066_vm1, %v1040_v32  ;;  %3372 = vmatmul.mubr.msk.f32.gmra.mrb[10].mxu1 %vm1066_vm1, %v1036_v25 }
 0x130   :  { %1251 = vmatprep.mubr.f32.mxu0 %v4135_v20  ;;  %1442 = vmatprep.mubr.f32.mxu1 %v4135_v20 }
 0x133   :  { %3350 = vmatmul.mubr.msk.f32.gmra.mrb[12].mxu0 %vm1066_vm1, %v1041_v33  ;;  %3373 = vmatmul.mubr.msk.f32.gmra.mrb[12].mxu1 %vm1066_vm1, %v1037_v27 }
 0x134   :  { %1257 = vmatprep.mubr.f32.mxu0 %v4135_v20  ;;  %1448 = vmatprep.mubr.f32.mxu1 %v4135_v20 }
 0x137   :  { %3351 = vmatmul.mubr.msk.f32.gmra.mrb[14].mxu0 %vm1066_vm1, %v1042_v34  ;;  %3374 = vmatmul.mubr.msk.f32.gmra.mrb[14].mxu1 %vm1066_vm1, %v1038_v29 }
 0x138   :  { %1263 = vmatprep.mubr.f32.mxu0 %v4135_v20  ;;  %1454 = vmatprep.mubr.f32.mxu1 %v4135_v20 }
 0x13b   :  { %3352 = vmatmul.mubr.msk.f32.gmra.mrb[16].mxu0 %vm1066_vm1, %v1043_v35  ;;  %3375 = vmatmul.mubr.msk.f32.gmra.mrb[16].mxu1 %vm1066_vm1, %v1039_v31 }
 0x13c   :  { %1269 = vmatprep.mubr.f32.mxu0 %v4135_v20  ;;  %1460 = vmatprep.mubr.f32.mxu1 %v4135_v20 }
 0x13f   :  { %3353 = vmatmul.mubr.msk.f32.gmra.mrb[18].mxu0 %vm1066_vm1, %v1044_v36  ;;  %3376 = vmatmul.mubr.msk.f32.gmra.mrb[18].mxu1 %vm1066_vm1, %v1040_v32 }
 0x140   :  { %1275 = vmatprep.mubr.f32.mxu0 %v4135_v20  ;;  %1466 = vmatprep.mubr.f32.mxu1 %v4135_v20 }
 0x143   :  { %3354 = vmatmul.mubr.msk.f32.gmra.mrb[20].mxu0 %vm1066_vm1, %v1045_v37  ;;  %3377 = vmatmul.mubr.msk.f32.gmra.mrb[20].mxu1 %vm1066_vm1, %v1041_v33 }
 0x144   :  { %1281 = vmatprep.mubr.f32.mxu0 %v4135_v20  ;;  %1472 = vmatprep.mubr.f32.mxu1 %v4135_v20 }
 0x147   :  { %3355 = vmatmul.mubr.msk.f32.gmra.mrb[22].mxu0 %vm1066_vm1, %v1046_v38  ;;  %3378 = vmatmul.mubr.msk.f32.gmra.mrb[22].mxu1 %vm1066_vm1, %v1042_v34 }
 0x148   :  { %1287 = vmatprep.mubr.f32.mxu0 %v4135_v20  ;;  %1478 = vmatprep.mubr.f32.mxu1 %v4135_v20 }
 0x14b   :  { %3356 = vmatmul.mubr.msk.f32.gmra.mrb[24].mxu0 %vm1066_vm1, %v1047_v39  ;;  %3379 = vmatmul.mubr.msk.f32.gmra.mrb[24].mxu1 %vm1066_vm1, %v1043_v35 }
 0x14c   :  { %1293 = vmatprep.mubr.f32.mxu0 %v4135_v20  ;;  %1484 = vmatprep.mubr.f32.mxu1 %v4135_v20 }
 0x14f   :  { %3357 = vmatmul.mubr.msk.f32.gmra.mrb[26].mxu0 %vm1066_vm1, %v1048_v40  ;;  %3380 = vmatmul.mubr.msk.f32.gmra.mrb[26].mxu1 %vm1066_vm1, %v1044_v36 }
 0x150   :  { %1299 = vmatprep.mubr.f32.mxu0 %v4135_v20  ;;  %1490 = vmatprep.mubr.f32.mxu1 %v4135_v20 }
 0x153   :  { %3358 = vmatmul.mubr.msk.f32.gmra.mrb[28].mxu0 %vm1066_vm1, %v1049_v41  ;;  %3381 = vmatmul.mubr.msk.f32.gmra.mrb[28].mxu1 %vm1066_vm1, %v1045_v37 }
 0x154   :  { %1305 = vmatprep.mubr.f32.mxu0 %v4135_v20  ;;  %1496 = vmatprep.mubr.f32.mxu1 %v4135_v20 }
 0x157   :  { %3359 = vmatmul.mubr.msk.f32.gmra.mrb[30].mxu0 %vm1066_vm1, %v1050_v42  ;;  %3382 = vmatmul.mubr.msk.f32.gmra.mrb[30].mxu1 %vm1066_vm1, %v1046_v38 }
 0x158   :  { %1311 = vmatprep.mubr.f32.mxu0 %v4135_v20  ;;  %1502 = vmatprep.mubr.f32.mxu1 %v4135_v20 }
 0x15b   :  { %3360 = vmatmul.mubr.msk.f32.gmra.mrb[32].mxu0 %vm1066_vm1, %v1051_v43  ;;  %3383 = vmatmul.mubr.msk.f32.gmra.mrb[32].mxu1 %vm1066_vm1, %v1047_v39 }
 0x15c   :  { %1317 = vmatprep.mubr.f32.mxu0 %v4135_v20  ;;  %1508 = vmatprep.mubr.f32.mxu1 %v4135_v20 }
 0x15f   :  { %3361 = vmatmul.mubr.msk.f32.gmra.mrb[34].mxu0 %vm1066_vm1, %v1052_v44  ;;  %3384 = vmatmul.mubr.msk.f32.gmra.mrb[34].mxu1 %vm1066_vm1, %v1048_v40 }
 0x160   :  { %1323 = vmatprep.mubr.f32.mxu0 %v4135_v20  ;;  %1514 = vmatprep.mubr.f32.mxu1 %v4135_v20 }
 0x163   :  { %3362 = vmatmul.mubr.msk.f32.gmra.mrb[36].mxu0 %vm1066_vm1, %v1053_v45  ;;  %3385 = vmatmul.mubr.msk.f32.gmra.mrb[36].mxu1 %vm1066_vm1, %v1049_v41 }
 0x164   :  { %1329 = vmatprep.mubr.f32.mxu0 %v4135_v20  ;;  %1520 = vmatprep.mubr.f32.mxu1 %v4135_v20 }
 0x167   :  { %3363 = vmatmul.mubr.msk.f32.gmra.mrb[38].mxu0 %vm1066_vm1, %v1054_v46  ;;  %3386 = vmatmul.mubr.msk.f32.gmra.mrb[38].mxu1 %vm1066_vm1, %v1050_v42 }
 0x168   :  { %1335 = vmatprep.mubr.f32.mxu0 %v4135_v20  ;;  %1526 = vmatprep.mubr.f32.mxu1 %v4135_v20 }
 0x16b   :  { %3364 = vmatmul.mubr.msk.f32.gmra.mrb[40].mxu0 %vm1066_vm1, %v1055_v47  ;;  %3387 = vmatmul.mubr.msk.f32.gmra.mrb[40].mxu1 %vm1066_vm1, %v1051_v43 }
 0x16c   :  { %1532 = vmatprep.mubr.f32.mxu1 %v4135_v20  ;;  %1871 = vmatprep.mubr.f32.mxu0 %v4135_v20 }
 0x16f   :  { %3388 = vmatmul.mubr.msk.f32.gmra.mrb[42].mxu1 %vm1066_vm1, %v1052_v44  ;;  %3423 = vmatmul.mubr.msk.f32.vlgmr.msra.gmra.mrb[42].mxu0 %vm1066_vm1, %v3396_v48 }
 0x170   :  { %1538 = vmatprep.mubr.f32.mxu1 %v4135_v20  ;;  %1877 = vmatprep.mubr.f32.mxu0 %v4135_v20 }
 0x173   :  { %3389 = vmatmul.mubr.msk.f32.gmra.mrb[44].mxu1 %vm1066_vm1, %v1053_v45  ;;  %3424 = vmatmul.mubr.msk.f32.gmra.mrb[44].mxu0 %vm1066_vm1, %v3397_v49 }
 0x174   :  { %1544 = vmatprep.mubr.f32.mxu1 %v4135_v20  ;;  %1883 = vmatprep.mubr.f32.mxu0 %v4135_v20 }
 0x177   :  { %3390 = vmatmul.mubr.msk.f32.gmra.mrb[46].mxu1 %vm1066_vm1, %v1054_v46  ;;  %3425 = vmatmul.mubr.msk.f32.gmra.mrb[46].mxu0 %vm1066_vm1, %v3398_v50 }
 0x178   :  { %1550 = vmatprep.mubr.f32.mxu1 %v4135_v20  ;;  %1889 = vmatprep.mubr.f32.mxu0 %v4135_v20 }
 0x17b   :  { %3391 = vmatmul.mubr.msk.f32.gmra.mrb[48].mxu1 %vm1066_vm1, %v1055_v47  ;;  %3426 = vmatmul.mubr.msk.f32.gmra.mrb[48].mxu0 %vm1066_vm1, %v3399_v51 }
 0x17c   :  { %1556 = vmatprep.mubr.f32.mxu1 %v4135_v20  ;;  %1895 = vmatprep.mubr.f32.mxu0 %v4135_v20 }
 0x17f   :  { %3392 = vmatmul.mubr.msk.f32.gmra.mrb[50].mxu1 %vm1066_vm1, %v4809_v23  ;;  %3427 = vmatmul.mubr.msk.f32.gmra.mrb[50].mxu0 %vm1066_vm1, %v3400_v52 }
 0x180   :  { %1562 = vmatprep.mubr.f32.mxu1 %v4135_v20  ;;  %1901 = vmatprep.mubr.f32.mxu0 %v4135_v20 }
 0x183   :  { %3393 = vmatmul.mubr.msk.f32.gmra.mrb[52].mxu1 %vm1066_vm1, %v4826_v26  ;;  %3428 = vmatmul.mubr.msk.f32.gmra.mrb[52].mxu0 %vm1066_vm1, %v3401_v53 }
 0x184   :  { %1568 = vmatprep.mubr.f32.mxu1 %v4135_v20  ;;  %1907 = vmatprep.mubr.f32.mxu0 %v4135_v20 }
 0x187   :  { %3394 = vmatmul.mubr.msk.f32.gmra.mrb[54].mxu1 %vm1066_vm1, %v4843_v28  ;;  %3429 = vmatmul.mubr.msk.f32.gmra.mrb[54].mxu0 %vm1066_vm1, %v3402_v54 }
 0x188   :  { %1574 = vmatprep.mubr.f32.mxu1 %v4135_v20  ;;  %1913 = vmatprep.mubr.f32.mxu0 %v4135_v20 }
 0x18b   :  { %3395 = vmatmul.mubr.msk.f32.gmra.mrb[56].mxu1 %vm1066_vm1, %v4857_v30  ;;  %3430 = vmatmul.mubr.msk.f32.gmra.mrb[56].mxu0 %vm1066_vm1, %v3403_v55 }
 0x18c   :  { %1919 = vmatprep.mubr.f32.mxu0 %v4135_v20  ;;  %2086 = vmatprep.mubr.f32.mxu1 %v4135_v20 }
 0x18f   :  { %3431 = vmatmul.mubr.msk.f32.gmra.mrb[58].mxu0 %vm1066_vm1, %v3404_v56  ;;  %3450 = vmatmul.mubr.msk.f32.vlgmr.msra.gmra.mrb[58].mxu1 %vm1066_vm1, %v3396_v48 }
 0x190   :  { %1925 = vmatprep.mubr.f32.mxu0 %v4135_v20  ;;  %2092 = vmatprep.mubr.f32.mxu1 %v4135_v20 }
 0x193   :  { %3432 = vmatmul.mubr.msk.f32.gmra.mrb[60].mxu0 %vm1066_vm1, %v3405_v57  ;;  %3451 = vmatmul.mubr.msk.f32.gmra.mrb[60].mxu1 %vm1066_vm1, %v3397_v49 }
 0x194   :  { %1931 = vmatprep.mubr.f32.mxu0 %v4135_v20  ;;  %2098 = vmatprep.mubr.f32.mxu1 %v4135_v20 }
 0x197   :  { %3433 = vmatmul.mubr.msk.f32.gmra.mrb[62].mxu0 %vm1066_vm1, %v3406_v58  ;;  %3452 = vmatmul.mubr.msk.f32.gmra.mrb[62].mxu1 %vm1066_vm1, %v3398_v50 }
 0x198   :  { %1937 = vmatprep.mubr.f32.mxu0 %v4135_v20  ;;  %2104 = vmatprep.mubr.f32.mxu1 %v4135_v20 }
 0x19b   :  { %3434 = vmatmul.mubr.msk.f32.gmra.mrb[64].mxu0 %vm1066_vm1, %v3407_v61  ;;  %3453 = vmatmul.mubr.msk.f32.gmra.mrb[64].mxu1 %vm1066_vm1, %v3399_v51 }
 0x19c   :  { %1943 = vmatprep.mubr.f32.mxu0 %v4135_v20  ;;  %2110 = vmatprep.mubr.f32.mxu1 %v4135_v20 }
 0x19f   :  { %3435 = vmatmul.mubr.msk.f32.gmra.mrb[66].mxu0 %vm1066_vm1, %v3408_v1  ;;  %3454 = vmatmul.mubr.msk.f32.gmra.mrb[66].mxu1 %vm1066_vm1, %v3400_v52 }
 0x1a0   :  { %1949 = vmatprep.mubr.f32.mxu0 %v4135_v20  ;;  %2116 = vmatprep.mubr.f32.mxu1 %v4135_v20 }
 0x1a3   :  { %3436 = vmatmul.mubr.msk.f32.gmra.mrb[68].mxu0 %vm1066_vm1, %v3409_v5  ;;  %3455 = vmatmul.mubr.msk.f32.gmra.mrb[68].mxu1 %vm1066_vm1, %v3401_v53 }
 0x1a4   :  { %1955 = vmatprep.mubr.f32.mxu0 %v4135_v20  ;;  %2122 = vmatprep.mubr.f32.mxu1 %v4135_v20 }
 0x1a7   :  { %3437 = vmatmul.mubr.msk.f32.gmra.mrb[70].mxu0 %vm1066_vm1, %v3410_v6  ;;  %3456 = vmatmul.mubr.msk.f32.gmra.mrb[70].mxu1 %vm1066_vm1, %v3402_v54 }
 0x1a8   :  { %1961 = vmatprep.mubr.f32.mxu0 %v4135_v20  ;;  %2128 = vmatprep.mubr.f32.mxu1 %v4135_v20 }
 0x1ab   :  { %3438 = vmatmul.mubr.msk.f32.gmra.mrb[72].mxu0 %vm1066_vm1, %v3411_v7  ;;  %3457 = vmatmul.mubr.msk.f32.gmra.mrb[72].mxu1 %vm1066_vm1, %v3403_v55 }
 0x1ac   :  { %1967 = vmatprep.mubr.f32.mxu0 %v4135_v20  ;;  %2134 = vmatprep.mubr.f32.mxu1 %v4135_v20 }
 0x1af   :  { %3439 = vmatmul.mubr.msk.f32.gmra.mrb[74].mxu0 %vm1066_vm1, %v3412_v8  ;;  %3458 = vmatmul.mubr.msk.f32.gmra.mrb[74].mxu1 %vm1066_vm1, %v3404_v56 }
 0x1b0   :  { %1973 = vmatprep.mubr.f32.mxu0 %v4135_v20  ;;  %2140 = vmatprep.mubr.f32.mxu1 %v4135_v20 }
 0x1b3   :  { %3440 = vmatmul.mubr.msk.f32.gmra.mrb[76].mxu0 %vm1066_vm1, %v3413_v9  ;;  %3459 = vmatmul.mubr.msk.f32.gmra.mrb[76].mxu1 %vm1066_vm1, %v3405_v57 }
 0x1b4   :  { %1979 = vmatprep.mubr.f32.mxu0 %v4135_v20  ;;  %2146 = vmatprep.mubr.f32.mxu1 %v4135_v20 }
 0x1b7   :  { %3441 = vmatmul.mubr.msk.f32.gmra.mrb[78].mxu0 %vm1066_vm1, %v3414_v10  ;;  %3460 = vmatmul.mubr.msk.f32.gmra.mrb[78].mxu1 %vm1066_vm1, %v3406_v58 }
 0x1b8   :  { %1985 = vmatprep.mubr.f32.mxu0 %v4135_v20  ;;  %2152 = vmatprep.mubr.f32.mxu1 %v4135_v20 }
 0x1bb   :  { %3442 = vmatmul.mubr.msk.f32.gmra.mrb[80].mxu0 %vm1066_vm1, %v3415_v11  ;;  %3461 = vmatmul.mubr.msk.f32.gmra.mrb[80].mxu1 %vm1066_vm1, %v3407_v61 }
 0x1bc   :  { %1991 = vmatprep.mubr.f32.mxu0 %v4135_v20  ;;  %2158 = vmatprep.mubr.f32.mxu1 %v4135_v20 }
 0x1bf   :  { %3443 = vmatmul.mubr.msk.f32.gmra.mrb[82].mxu0 %vm1066_vm1, %v3416_v12  ;;  %3462 = vmatmul.mubr.msk.f32.gmra.mrb[82].mxu1 %vm1066_vm1, %v3408_v1 }
 0x1c0   :  { %1997 = vmatprep.mubr.f32.mxu0 %v4135_v20  ;;  %2164 = vmatprep.mubr.f32.mxu1 %v4135_v20 }
 0x1c3   :  { %3444 = vmatmul.mubr.msk.f32.gmra.mrb[84].mxu0 %vm1066_vm1, %v3417_v13  ;;  %3463 = vmatmul.mubr.msk.f32.gmra.mrb[84].mxu1 %vm1066_vm1, %v3409_v5 }
 0x1c4   :  { %2003 = vmatprep.mubr.f32.mxu0 %v4135_v20  ;;  %2170 = vmatprep.mubr.f32.mxu1 %v4135_v20 }
 0x1c7   :  { %3445 = vmatmul.mubr.msk.f32.gmra.mrb[86].mxu0 %vm1066_vm1, %v3418_v14  ;;  %3464 = vmatmul.mubr.msk.f32.gmra.mrb[86].mxu1 %vm1066_vm1, %v3410_v6 }
 0x1c8   :  { %2009 = vmatprep.mubr.f32.mxu0 %v4135_v20  ;;  %2176 = vmatprep.mubr.f32.mxu1 %v4135_v20 }
 0x1cb   :  { %3446 = vmatmul.mubr.msk.f32.gmra.mrb[88].mxu0 %vm1066_vm1, %v3419_v15  ;;  %3465 = vmatmul.mubr.msk.f32.gmra.mrb[88].mxu1 %vm1066_vm1, %v3411_v7 }
 0x1cc   :  { %2015 = vmatprep.mubr.f32.mxu0 %v4135_v20  ;;  %2182 = vmatprep.mubr.f32.mxu1 %v4135_v20 }
 0x1cf   :  { %3447 = vmatmul.mubr.msk.f32.gmra.mrb[90].mxu0 %vm1066_vm1, %v3420_v16  ;;  %3466 = vmatmul.mubr.msk.f32.gmra.mrb[90].mxu1 %vm1066_vm1, %v3412_v8 }
 0x1d0   :  { %2188 = vmatprep.mubr.f32.mxu1 %v4135_v20 }
 0x1d3   :  { %3467 = vmatmul.mubr.msk.f32.gmra.mrb[92].mxu1 %vm1066_vm1, %v3413_v9 }
 0x1d4   :  { %2194 = vmatprep.mubr.f32.mxu1 %v4135_v20 }
 0x1d7   :  { %3468 = vmatmul.mubr.msk.f32.gmra.mrb[94].mxu1 %vm1066_vm1, %v3414_v10 }
 0x1d8   :  { %2200 = vmatprep.mubr.f32.mxu1 %v4135_v20 }
 0x1db   :  { %3469 = vmatmul.mubr.msk.f32.gmra.mrb[96].mxu1 %vm1066_vm1, %v3415_v11 }
 0x1dc   :  { %2206 = vmatprep.mubr.f32.mxu1 %v4135_v20 }
 0x1df   :  { %3470 = vmatmul.mubr.msk.f32.gmra.mrb[98].mxu1 %vm1066_vm1, %v3416_v12 }
 0x1e0   :  { %2212 = vmatprep.mubr.f32.mxu1 %v4135_v20 }
 0x1e3   :  { %3471 = vmatmul.mubr.msk.f32.gmra.mrb[100].mxu1 %vm1066_vm1, %v3417_v13 }
 0x1e4   :  { %2218 = vmatprep.mubr.f32.mxu1 %v4135_v20 }
 0x1e7   :  { %3472 = vmatmul.mubr.msk.f32.gmra.mrb[102].mxu1 %vm1066_vm1, %v3418_v14 }
 0x1e8   :  { %2224 = vmatprep.mubr.f32.mxu1 %v4135_v20 }
 0x1eb   :  { %3473 = vmatmul.mubr.msk.f32.gmra.mrb[104].mxu1 %vm1066_vm1, %v3419_v15 }
 0x1ec   :  { %2230 = vmatprep.mubr.f32.mxu1 %v4135_v20 }
 0x1ee   :  { %v5181_v17 = vpop.f32.mrb[0].mxu1  ;;  %v1217_v18 = vpop.f32.mrb[0].mxu0 }
 0x1ef   :  { %v5183_v19 = vpop.f32.mrb[1].mxu1  ;;  %3474 = vmatmul.mubr.msk.f32.gmra.mrb[106].mxu1 %vm1066_vm1, %v3420_v16  ;;  %v1219_v21 = vpop.f32.mrb[1].mxu0 }
 0x1f2   :  { %v5186_v22 = vpop.f32.mrb[2].mxu1  ;;  %v1223_v23 = vpop.f32.mrb[2].mxu0 }
 0x1f3   :  { %v5188_v24 = vpop.f32.mrb[3].mxu1  ;;  %v1581_v25 = vmax.f32 %v1217_v18, %v1223_v23  ;;  %v1225_v26 = vpop.f32.mrb[3].mxu0 }
 0x1f4   :  { %v1613_v27 = vmax.f32 %v1219_v21, %v1225_v26 }
 0x1f6   :  { %v5190_v28 = vpop.f32.mrb[4].mxu1  ;;  %v1229_v29 = vpop.f32.mrb[4].mxu0 }
 0x1f7   :  { %v5192_v30 = vpop.f32.mrb[5].mxu1  ;;  %v1582_v31 = vmax.f32 %v1581_v25, %v1229_v29  ;;  %v1231_v32 = vpop.f32.mrb[5].mxu0 }
 0x1f8   :  { %v1614_v33 = vmax.f32 %v1613_v27, %v1231_v32 }
 0x1fa   :  { %v5194_v34 = vpop.f32.mrb[6].mxu1  ;;  %v1235_v35 = vpop.f32.mrb[6].mxu0 }
 0x1fb   :  { %v5196_v36 = vpop.f32.mrb[7].mxu1  ;;  %v1583_v37 = vmax.f32 %v1582_v31, %v1235_v35  ;;  %v1237_v38 = vpop.f32.mrb[7].mxu0 }
 0x1fc   :  { %v1615_v39 = vmax.f32 %v1614_v33, %v1237_v38 }
 0x1fe   :  { %v1432_v40 = vpop.f32.mrb[8].mxu1  ;;  %v1241_v41 = vpop.f32.mrb[8].mxu0 }
 0x1ff   :  { %v1434_v42 = vpop.f32.mrb[9].mxu1  ;;  %v1584_v43 = vmax.f32 %v1583_v37, %v1241_v41  ;;  %v1243_v44 = vpop.f32.mrb[9].mxu0 }
 0x200   :  { %v1616_v45 = vmax.f32 %v1615_v39, %v1243_v44 }
 0x202   :  { %v1438_v46 = vpop.f32.mrb[10].mxu1  ;;  %v1247_v47 = vpop.f32.mrb[10].mxu0 }
 0x203   :  { %v1644_v48 = vmax.f32 %v1432_v40, %v1438_v46  ;;  %v1440_v49 = vpop.f32.mrb[11].mxu1  ;;  %v1585_v50 = vmax.f32 %v1584_v43, %v1247_v47  ;;  %v1249_v51 = vpop.f32.mrb[11].mxu0 }
 0x204   :  { %v1675_v52 = vmax.f32 %v1434_v42, %v1440_v49  ;;  %v1617_v53 = vmax.f32 %v1616_v45, %v1249_v51 }
 0x206   :  { %v1444_v54 = vpop.f32.mrb[12].mxu1  ;;  %v1253_v55 = vpop.f32.mrb[12].mxu0 }
 0x207   :  { %v1645_v56 = vmax.f32 %v1644_v48, %v1444_v54  ;;  %v1446_v57 = vpop.f32.mrb[13].mxu1  ;;  %v1586_v58 = vmax.f32 %v1585_v50, %v1253_v55  ;;  %v1255_v59 = vpop.f32.mrb[13].mxu0 }
 0x208   :  { %v1676_v60 = vmax.f32 %v1675_v52, %v1446_v57  ;;  %v1618_v61 = vmax.f32 %v1617_v53, %v1255_v59 }
 0x20a   :  { %v1450_v62 = vpop.f32.mrb[14].mxu1  ;;  %v1259_v63 = vpop.f32.mrb[14].mxu0 }
 0x20b   :  { %v1646_v0 = vmax.f32 %v1645_v56, %v1450_v62  ;;  %v1452_v1 = vpop.f32.mrb[15].mxu1  ;;  %v1587_v2 = vmax.f32 %v1586_v58, %v1259_v63  ;;  %v1261_v3 = vpop.f32.mrb[15].mxu0 }
 0x20c   :  { %v1677_v4 = vmax.f32 %v1676_v60, %v1452_v1  ;;  %v1619_v5 = vmax.f32 %v1618_v61, %v1261_v3 }
 0x20e   :  { %v1456_v6 = vpop.f32.mrb[16].mxu1  ;;  %v1265_v7 = vpop.f32.mrb[16].mxu0 }
 0x20f   :  { %v1647_v8 = vmax.f32 %v1646_v0, %v1456_v6  ;;  %v1458_v9 = vpop.f32.mrb[17].mxu1  ;;  %v1588_v10 = vmax.f32 %v1587_v2, %v1265_v7  ;;  %v1267_v11 = vpop.f32.mrb[17].mxu0 }
 0x210   :  { %v1678_v12 = vmax.f32 %v1677_v4, %v1458_v9  ;;  %v1620_v13 = vmax.f32 %v1619_v5, %v1267_v11 }
 0x212   :  { %v1462_v14 = vpop.f32.mrb[18].mxu1  ;;  %v1271_v15 = vpop.f32.mrb[18].mxu0 }
 0x213   :  { %v1648_v16 = vmax.f32 %v1647_v8, %v1462_v14  ;;  %v1464_v18 = vpop.f32.mrb[19].mxu1  ;;  %v1589_v21 = vmax.f32 %v1588_v10, %v1271_v15  ;;  %v1273_v23 = vpop.f32.mrb[19].mxu0 }
 0x214   :  { %v1679_v25 = vmax.f32 %v1678_v12, %v1464_v18  ;;  %v1621_v26 = vmax.f32 %v1620_v13, %v1273_v23 }
 0x216   :  { %v1468_v27 = vpop.f32.mrb[20].mxu1  ;;  %v1277_v29 = vpop.f32.mrb[20].mxu0 }
 0x217   :  { %v1649_v31 = vmax.f32 %v1648_v16, %v1468_v27  ;;  %v1470_v32 = vpop.f32.mrb[21].mxu1  ;;  %v1590_v33 = vmax.f32 %v1589_v21, %v1277_v29  ;;  %v1279_v35 = vpop.f32.mrb[21].mxu0 }
 0x218   :  { %v1680_v37 = vmax.f32 %v1679_v25, %v1470_v32  ;;  %v1622_v38 = vmax.f32 %v1621_v26, %v1279_v35 }
 0x21a   :  { %v1474_v39 = vpop.f32.mrb[22].mxu1  ;;  %v1283_v40 = vpop.f32.mrb[22].mxu0 }
 0x21b   :  { %v1650_v41 = vmax.f32 %v1649_v31, %v1474_v39  ;;  %v1476_v42 = vpop.f32.mrb[23].mxu1  ;;  %v1591_v43 = vmax.f32 %v1590_v33, %v1283_v40  ;;  %v1285_v44 = vpop.f32.mrb[23].mxu0 }
 0x21c   :  { %v1681_v45 = vmax.f32 %v1680_v37, %v1476_v42  ;;  %v1623_v46 = vmax.f32 %v1622_v38, %v1285_v44 }
 0x21e   :  { %v1480_v47 = vpop.f32.mrb[24].mxu1  ;;  %v1289_v48 = vpop.f32.mrb[24].mxu0 }
 0x21f   :  { %v1651_v49 = vmax.f32 %v1650_v41, %v1480_v47  ;;  %v1482_v50 = vpop.f32.mrb[25].mxu1  ;;  %v1592_v51 = vmax.f32 %v1591_v43, %v1289_v48  ;;  %v1291_v52 = vpop.f32.mrb[25].mxu0 }
 0x220   :  { %v1682_v53 = vmax.f32 %v1681_v45, %v1482_v50  ;;  %v1624_v54 = vmax.f32 %v1623_v46, %v1291_v52 }
 0x222   :  { %v1486_v55 = vpop.f32.mrb[26].mxu1  ;;  %v1295_v56 = vpop.f32.mrb[26].mxu0 }
 0x223   :  { %v1652_v57 = vmax.f32 %v1651_v49, %v1486_v55  ;;  %v1488_v58 = vpop.f32.mrb[27].mxu1  ;;  %v1593_v59 = vmax.f32 %v1592_v51, %v1295_v56  ;;  %v1297_v60 = vpop.f32.mrb[27].mxu0 }
 0x224   :  { %v1683_v61 = vmax.f32 %v1682_v53, %v1488_v58  ;;  %v1625_v62 = vmax.f32 %v1624_v54, %v1297_v60 }
 0x226   :  { %v1492_v63 = vpop.f32.mrb[28].mxu1  ;;  %v1301_v0 = vpop.f32.mrb[28].mxu0 }
 0x227   :  { %v1653_v1 = vmax.f32 %v1652_v57, %v1492_v63  ;;  %v1494_v2 = vpop.f32.mrb[29].mxu1  ;;  %v1594_v3 = vmax.f32 %v1593_v59, %v1301_v0  ;;  %v1303_v4 = vpop.f32.mrb[29].mxu0 }
 0x228   :  { %v1684_v5 = vmax.f32 %v1683_v61, %v1494_v2  ;;  %v1626_v6 = vmax.f32 %v1625_v62, %v1303_v4 }
 0x22a   :  { %v1307_v7 = vpop.f32.mrb[30].mxu0  ;;  %v1498_v8 = vpop.f32.mrb[30].mxu1 }
 0x22b   :  { %v1595_v9 = vmax.f32 %v1594_v3, %v1307_v7  ;;  %v1654_v10 = vmax.f32 %v1653_v1, %v1498_v8  ;;  %v1309_v11 = vpop.f32.mrb[31].mxu0  ;;  %v1500_v12 = vpop.f32.mrb[31].mxu1 }
 0x22c   :  { %v1627_v13 = vmax.f32 %v1626_v6, %v1309_v11  ;;  %v1685_v14 = vmax.f32 %v1684_v5, %v1500_v12  ;;  %v1605_v11 = vsel %vm1604_vm4, %v5194_v34, -inf }
 0x22e   :  { %v1313_v15 = vpop.f32.mrb[32].mxu0  ;;  %v1504_v16 = vpop.f32.mrb[32].mxu1 }
 0x22f   :  { %v1596_v18 = vmax.f32 %v1595_v9, %v1313_v15  ;;  %v1655_v21 = vmax.f32 %v1654_v10, %v1504_v16  ;;  %v1315_v23 = vpop.f32.mrb[33].mxu0  ;;  %v1506_v25 = vpop.f32.mrb[33].mxu1 }
 0x230   :  { %v1628_v26 = vmax.f32 %v1627_v13, %v1315_v23  ;;  %v1686_v27 = vmax.f32 %v1685_v14, %v1506_v25  ;;  %v1636_v13 = vsel %vm1604_vm4, %v5196_v36, -inf }
 0x232   :  { %v1319_v29 = vpop.f32.mrb[34].mxu0  ;;  %v1510_v31 = vpop.f32.mrb[34].mxu1 }
 0x233   :  { %v1597_v32 = vmax.f32 %v1596_v18, %v1319_v29  ;;  %v1656_v33 = vmax.f32 %v1655_v21, %v1510_v31  ;;  %v1321_v35 = vpop.f32.mrb[35].mxu0  ;;  %v1512_v37 = vpop.f32.mrb[35].mxu1 }
 0x234   :  { %v1629_v38 = vmax.f32 %v1628_v26, %v1321_v35  ;;  %v1687_v39 = vmax.f32 %v1686_v27, %v1512_v37 }
 0x236   :  { %v1325_v40 = vpop.f32.mrb[36].mxu0  ;;  %v1516_v41 = vpop.f32.mrb[36].mxu1 }
 0x237   :  { %v1598_v42 = vmax.f32 %v1597_v32, %v1325_v40  ;;  %v1657_v43 = vmax.f32 %v1656_v33, %v1516_v41  ;;  %v1327_v44 = vpop.f32.mrb[37].mxu0  ;;  %v1518_v45 = vpop.f32.mrb[37].mxu1 }
 0x238   :  { %v1630_v46 = vmax.f32 %v1629_v38, %v1327_v44  ;;  %v1688_v47 = vmax.f32 %v1687_v39, %v1518_v45 }
 0x23a   :  { %v1331_v48 = vpop.f32.mrb[38].mxu0  ;;  %v1522_v49 = vpop.f32.mrb[38].mxu1 }
 0x23b   :  { %v1599_v50 = vmax.f32 %v1598_v42, %v1331_v48  ;;  %v1658_v51 = vmax.f32 %v1657_v43, %v1522_v49  ;;  %v1333_v52 = vpop.f32.mrb[39].mxu0  ;;  %v1524_v53 = vpop.f32.mrb[39].mxu1 }
 0x23c   :  { %v1631_v54 = vmax.f32 %v1630_v46, %v1333_v52  ;;  %v1689_v55 = vmax.f32 %v1688_v47, %v1524_v53 }
 0x23e   :  { %v1337_v56 = vpop.f32.mrb[40].mxu0  ;;  %v1528_v57 = vpop.f32.mrb[40].mxu1 }
 0x23f   :  { %v1600_v58 = vmax.f32 %v1599_v50, %v1337_v56  ;;  %v1659_v59 = vmax.f32 %v1658_v51, %v1528_v57  ;;  %v1339_v60 = vpop.f32.mrb[41].mxu0  ;;  %v1530_v61 = vpop.f32.mrb[41].mxu1 }
 0x240   :  { %v1632_v62 = vmax.f32 %v1631_v54, %v1339_v60  ;;  %v1690_v63 = vmax.f32 %v1689_v55, %v1530_v61 }
 0x241   :  { %v1601_v0 = vmax.f32 %v1600_v58, %v5181_v17 }
 0x242   :  { %v1633_v1 = vmax.f32 %v1632_v62, %v5183_v19  ;;  %v1534_v2 = vpop.f32.mrb[42].mxu1  ;;  %v1873_v3 = vpop.f32.mrb[42].mxu0 }
 0x243   :  { %v1602_v4 = vmax.f32 %v1601_v0, %v5186_v22  ;;  %v1660_v5 = vmax.f32 %v1659_v59, %v1534_v2  ;;  %v1536_v6 = vpop.f32.mrb[43].mxu1  ;;  %v1875_v7 = vpop.f32.mrb[43].mxu0 }
 0x244   :  { %v1634_v8 = vmax.f32 %v1633_v1, %v5188_v24  ;;  %v1691_v9 = vmax.f32 %v1690_v63, %v1536_v6 }
 0x245   :  { %v1603_v10 = vmax.f32 %v1602_v4, %v5190_v28 }
 0x246   :  { %v1635_v17 = vmax.f32 %v1634_v8, %v5192_v30  ;;  %v1540_v12 = vpop.f32.mrb[44].mxu1  ;;  %v1879_v19 = vpop.f32.mrb[44].mxu0 }
 0x247   :  { %v5208_v14 = vmax.f32 %v1603_v10, %v1605_v11  ;;  %v1661_v22 = vmax.f32 %v1660_v5, %v1540_v12  ;;  %v1542_v15 = vpop.f32.mrb[45].mxu1  ;;  %v2237_v16 = vmax.f32 %v1873_v3, %v1879_v19  ;;  %v1881_v18 = vpop.f32.mrb[45].mxu0 }
 0x248   :  { %v5210_v24 = vmax.f32 %v1635_v17, %v1636_v13  ;;  %v1692_v21 = vmax.f32 %v1691_v9, %v1542_v15  ;;  %v2268_v28 = vmax.f32 %v1875_v7, %v1881_v18 }
 0x24a   :  { %v1546_v23 = vpop.f32.mrb[46].mxu1  ;;  %v1885_v25 = vpop.f32.mrb[46].mxu0 }
 0x24b   :  { %v1662_v34 = vmax.f32 %v1661_v22, %v1546_v23  ;;  %v1548_v26 = vpop.f32.mrb[47].mxu1  ;;  %v2238_v30 = vmax.f32 %v2237_v16, %v1885_v25  ;;  %v1887_v27 = vpop.f32.mrb[47].mxu0 }
 0x24c   :  { %v1693_v29 = vmax.f32 %v1692_v21, %v1548_v26  ;;  %v2269_v31 = vmax.f32 %v2268_v28, %v1887_v27 }
 0x24e   :  { %v1552_v32 = vpop.f32.mrb[48].mxu1  ;;  %v1891_v36 = vpop.f32.mrb[48].mxu0 }
 0x24f   :  { %v1663_v33 = vmax.f32 %v1662_v34, %v1552_v32  ;;  %v1554_v35 = vpop.f32.mrb[49].mxu1  ;;  %v2239_v37 = vmax.f32 %v2238_v30, %v1891_v36  ;;  %v1893_v38 = vpop.f32.mrb[49].mxu0 }
 0x250   :  { %v1694_v39 = vmax.f32 %v1693_v29, %v1554_v35  ;;  %v2270_v40 = vmax.f32 %v2269_v31, %v1893_v38 }
 0x252   :  { %v1558_v41 = vpop.f32.mrb[50].mxu1  ;;  %v1897_v42 = vpop.f32.mrb[50].mxu0 }
 0x253   :  { %v1664_v43 = vmax.f32 %v1663_v33, %v1558_v41  ;;  %v1560_v44 = vpop.f32.mrb[51].mxu1  ;;  %v2240_v45 = vmax.f32 %v2239_v37, %v1897_v42  ;;  %v1899_v46 = vpop.f32.mrb[51].mxu0 }
 0x254   :  { %v1695_v47 = vmax.f32 %v1694_v39, %v1560_v44  ;;  %v2271_v48 = vmax.f32 %v2270_v40, %v1899_v46 }
 0x256   :  { %v1564_v49 = vpop.f32.mrb[52].mxu1  ;;  %v1903_v50 = vpop.f32.mrb[52].mxu0 }
 0x257   :  { %v1665_v51 = vmax.f32 %v1664_v43, %v1564_v49  ;;  %v1566_v52 = vpop.f32.mrb[53].mxu1  ;;  %v2241_v53 = vmax.f32 %v2240_v45, %v1903_v50  ;;  %v1905_v54 = vpop.f32.mrb[53].mxu0 }
 0x258   :  { %v1696_v55 = vmax.f32 %v1695_v47, %v1566_v52  ;;  %v2272_v56 = vmax.f32 %v2271_v48, %v1905_v54 }
 0x25a   :  { %v1570_v57 = vpop.f32.mrb[54].mxu1  ;;  %v1909_v58 = vpop.f32.mrb[54].mxu0 }
 0x25b   :  { %v1666_v59 = vmax.f32 %v1665_v51, %v1570_v57  ;;  %v1572_v60 = vpop.f32.mrb[55].mxu1  ;;  %v2242_v61 = vmax.f32 %v2241_v53, %v1909_v58  ;;  %v1911_v62 = vpop.f32.mrb[55].mxu0 }
 0x25c   :  { %v1697_v63 = vmax.f32 %v1696_v55, %v1572_v60  ;;  %v2273_v0 = vmax.f32 %v2272_v56, %v1911_v62 }
 0x25e   :  { %v1576_v1 = vpop.f32.mrb[56].mxu1  ;;  %v1915_v2 = vpop.f32.mrb[56].mxu0 }
 0x25f   :  { %v1667_v3 = vsel %vm1604_vm4, %v1576_v1, -inf  ;;  %v1578_v4 = vpop.f32.mrb[57].mxu1  ;;  %v2243_v5 = vmax.f32 %v2242_v61, %v1915_v2  ;;  %v1917_v6 = vpop.f32.mrb[57].mxu0 }
 0x260   :  { %v5213_v7 = vmax.f32 %v1666_v59, %v1667_v3  ;;  %v1698_v8 = vsel %vm1604_vm4, %v1578_v4, -inf  ;;  %v2274_v9 = vmax.f32 %v2273_v0, %v1917_v6 }
 0x261   :  { %v5216_v10 = vmax.f32 %v1697_v63, %v1698_v8 }
 0x262   :  { %v2088_v11 = vpop.f32.mrb[58].mxu1  ;;  %v1921_v17 = vpop.f32.mrb[58].mxu0 }
 0x263   :  { %v2090_v12 = vpop.f32.mrb[59].mxu1  ;;  %v2244_v19 = vmax.f32 %v2243_v5, %v1921_v17  ;;  %v1923_v13 = vpop.f32.mrb[59].mxu0 }
 0x264   :  { %v2275_v22 = vmax.f32 %v2274_v9, %v1923_v13 }
 0x266   :  { %v2094_v15 = vpop.f32.mrb[60].mxu1  ;;  %v1927_v16 = vpop.f32.mrb[60].mxu0 }
 0x267   :  { %v2299_v18 = vmax.f32 %v2088_v11, %v2094_v15  ;;  %v2096_v21 = vpop.f32.mrb[61].mxu1  ;;  %v2245_v28 = vmax.f32 %v2244_v19, %v1927_v16  ;;  %v1929_v23 = vpop.f32.mrb[61].mxu0 }
 0x268   :  { %v2330_v25 = vmax.f32 %v2090_v12, %v2096_v21  ;;  %v2276_v34 = vmax.f32 %v2275_v22, %v1929_v23 }
 0x26a   :  { %v2100_v26 = vpop.f32.mrb[62].mxu1  ;;  %v1933_v30 = vpop.f32.mrb[62].mxu0 }
 0x26b   :  { %v2300_v27 = vmax.f32 %v2299_v18, %v2100_v26  ;;  %v2102_v29 = vpop.f32.mrb[63].mxu1  ;;  %v2246_v31 = vmax.f32 %v2245_v28, %v1933_v30  ;;  %v1935_v32 = vpop.f32.mrb[63].mxu0 }
 0x26c   :  { %v2331_v36 = vmax.f32 %v2330_v25, %v2102_v29  ;;  %v2277_v33 = vmax.f32 %v2276_v34, %v1935_v32 }
 0x26e   :  { %v2106_v35 = vpop.f32.mrb[64].mxu1  ;;  %v1939_v37 = vpop.f32.mrb[64].mxu0 }
 0x26f   :  { %v2301_v38 = vmax.f32 %v2300_v27, %v2106_v35  ;;  %v2108_v39 = vpop.f32.mrb[65].mxu1  ;;  %v2247_v40 = vmax.f32 %v2246_v31, %v1939_v37  ;;  %v1941_v41 = vpop.f32.mrb[65].mxu0 }
 0x270   :  { %v2332_v42 = vmax.f32 %v2331_v36, %v2108_v39  ;;  %v2278_v43 = vmax.f32 %v2277_v33, %v1941_v41 }
 0x272   :  { %v2112_v44 = vpop.f32.mrb[66].mxu1  ;;  %v1945_v45 = vpop.f32.mrb[66].mxu0 }
 0x273   :  { %v2302_v46 = vmax.f32 %v2301_v38, %v2112_v44  ;;  %v2114_v47 = vpop.f32.mrb[67].mxu1  ;;  %v2248_v48 = vmax.f32 %v2247_v40, %v1945_v45  ;;  %v1947_v49 = vpop.f32.mrb[67].mxu0 }
 0x274   :  { %v2333_v50 = vmax.f32 %v2332_v42, %v2114_v47  ;;  %v2279_v51 = vmax.f32 %v2278_v43, %v1947_v49 }
 0x276   :  { %v2118_v52 = vpop.f32.mrb[68].mxu1  ;;  %v1951_v53 = vpop.f32.mrb[68].mxu0 }
 0x277   :  { %v2303_v54 = vmax.f32 %v2302_v46, %v2118_v52  ;;  %v2120_v55 = vpop.f32.mrb[69].mxu1  ;;  %v2249_v56 = vmax.f32 %v2248_v48, %v1951_v53  ;;  %v1953_v57 = vpop.f32.mrb[69].mxu0 }
 0x278   :  { %v2334_v58 = vmax.f32 %v2333_v50, %v2120_v55  ;;  %v2280_v59 = vmax.f32 %v2279_v51, %v1953_v57  ;;  %v2368_v51 = vlaneseq }
 0x27a   :  { %v2124_v60 = vpop.f32.mrb[70].mxu1  ;;  %v1957_v61 = vpop.f32.mrb[70].mxu0 }
 0x27b   :  { %v2304_v62 = vmax.f32 %v2303_v54, %v2124_v60  ;;  %v2126_v63 = vpop.f32.mrb[71].mxu1  ;;  %v2250_v0 = vmax.f32 %v2249_v56, %v1957_v61  ;;  %v1959_v1 = vpop.f32.mrb[71].mxu0  ;;  %v5218_v60 = vshrl.u32 %v2368_v51, 7 }
 0x27c   :  { %v2335_v2 = vmax.f32 %v2334_v58, %v2126_v63  ;;  %v2281_v3 = vmax.f32 %v2280_v59, %v1959_v1 }
 0x27e   :  { %v1963_v4 = vpop.f32.mrb[72].mxu0  ;;  %v2130_v5 = vpop.f32.mrb[72].mxu1 }
 0x27f   :  { %v2251_v6 = vmax.f32 %v2250_v0, %v1963_v4  ;;  %v2305_v8 = vmax.f32 %v2304_v62, %v2130_v5  ;;  %v1965_v9 = vpop.f32.mrb[73].mxu0  ;;  %v2132_v11 = vpop.f32.mrb[73].mxu1 }
 0x280   :  { %v2282_v17 = vmax.f32 %v2281_v3, %v1965_v9  ;;  %v2336_v12 = vmax.f32 %v2335_v2, %v2132_v11  ;;  %v5220_v3 = vld [vmem:[#allocation8] sm:$0xf]  ;;  %v5222_v4 = vpop.xlane.xlu0 %2413  ;;  %v5228_v9 = vsub.s32 1, %v5218_v60 }
 0x281   :  { %vm2421_vm5 = vcmp.ge.f32.partialorder %v5220_v3, 0.0 }
 0x282   :  { %v1969_v19 = vpop.f32.mrb[74].mxu0  ;;  %v2136_v13 = vpop.f32.mrb[74].mxu1 }
 0x283   :  { %v2252_v22 = vmax.f32 %v2251_v6, %v1969_v19  ;;  %v2306_v15 = vmax.f32 %v2305_v8, %v2136_v13  ;;  %v1971_v16 = vpop.f32.mrb[75].mxu0  ;;  %v2138_v18 = vpop.f32.mrb[75].mxu1  ;;  %v5225_v8 = vsub.s32 0, %v5218_v60  ;;  %v1607_v13 = vrot.slane %v5208_v14, 4 }
 0x284   :  { %v2283_v21 = vmax.f32 %v2282_v17, %v1971_v16  ;;  %v2337_v28 = vmax.f32 %v2336_v12, %v2138_v18  ;;  %v1638_v16 = vrot.slane %v5210_v24, 4 }
 0x286   :  { %v1975_v23 = vpop.f32.mrb[76].mxu0  ;;  %v2142_v25 = vpop.f32.mrb[76].mxu1 }
 0x287   :  { %v2253_v34 = vmax.f32 %v2252_v22, %v1975_v23  ;;  %v2307_v26 = vmax.f32 %v2306_v15, %v2142_v25  ;;  %v1977_v30 = vpop.f32.mrb[77].mxu0  ;;  %v2144_v27 = vpop.f32.mrb[77].mxu1  ;;  %v2426_v25 = vrot.slane %v5220_v3, %v5225_v8 }
 0x288   :  { %v2284_v29 = vmax.f32 %v2283_v21, %v1977_v30  ;;  %v2338_v31 = vmax.f32 %v2337_v28, %v2144_v27  ;;  %v4136_v28 = vmov 0  }
 0x289   :  { %v5233_v23 = vsel %vm2421_vm5, 1, %v4136_v28 }
 0x28a   :  { %v1981_v32 = vpop.f32.mrb[78].mxu0  ;;  %v2148_v36 = vpop.f32.mrb[78].mxu1 }
 0x28b   :  { %v2254_v33 = vmax.f32 %v2253_v34, %v1981_v32  ;;  %v2308_v35 = vmax.f32 %v2307_v26, %v2148_v36  ;;  %v1983_v37 = vpop.f32.mrb[79].mxu0  ;;  %v2150_v38 = vpop.f32.mrb[79].mxu1 }
 0x28c   :  { %v2285_v39 = vmax.f32 %v2284_v29, %v1983_v37  ;;  %v2339_v40 = vmax.f32 %v2338_v31, %v2150_v38  ;;  %v2430_v29 = vrot.slane %v5220_v3, %v5228_v9  ;;  %v1608_v31 = vmax.f32 %v5208_v14, %v1607_v13  ;;  %v5271_v13 = vld [vmem:[#allocation5] sm:$0xf] }
 0x28d   :  { %v2455_v37 = vrot.slane %v5233_v23, %v5225_v8 }
 0x28e   :  { %v1987_v41 = vpop.f32.mrb[80].mxu0  ;;  %v2154_v42 = vpop.f32.mrb[80].mxu1 }
 0x28f   :  { %v2255_v43 = vmax.f32 %v2254_v33, %v1987_v41  ;;  %v2309_v44 = vmax.f32 %v2308_v35, %v2154_v42  ;;  %v1989_v45 = vpop.f32.mrb[81].mxu0  ;;  %v2156_v46 = vpop.f32.mrb[81].mxu1  ;;  %v1639_v35 = vmax.f32 %v5210_v24, %v1638_v16  ;;  %v2459_v41 = vrot.slane %v5233_v23, %v5228_v9 }
 0x290   :  { %v2286_v47 = vmax.f32 %v2285_v39, %v1989_v45  ;;  %v2340_v48 = vmax.f32 %v2339_v40, %v2156_v46  ;;  %v5240_v33 = vpop.xlane.xlu0 %2418  ;;  %v2443_v40 = vmul.f32 %v2426_v25, %v5222_v4  ;;  %v2444_v45 = vmul.f32 %v2430_v29, %v5222_v4 }
 0x291   :  { %v2447_v46 = vmul.f32 %v2426_v25, %v5240_v33  ;;  %v1609_v24 = vrot.slane %v1608_v31, 2  ;;  %v1640_v51 = vrot.slane %v1639_v35, 2  ;;  %vm5255_vm6 = vcmp.eq.s32.totalorder %v2455_v37, 1 }
 0x292   :  { %v1993_v49 = vpop.f32.mrb[82].mxu0  ;;  %v2160_v50 = vpop.f32.mrb[82].mxu1  ;;  %vm5259_vm7 = vcmp.eq.s32.totalorder %v2459_v41, 1 }
 0x293   :  { %v2256_v52 = vmax.f32 %v2255_v43, %v1993_v49  ;;  %v2310_v53 = vmax.f32 %v2309_v44, %v2160_v50  ;;  %v1995_v54 = vpop.f32.mrb[83].mxu0  ;;  %v2162_v55 = vpop.f32.mrb[83].mxu1  ;;  %v5252_v50 = vld [vmem:[#allocation10] sm:$0xf] }
 0x294   :  { %v2287_v56 = vmax.f32 %v2286_v47, %v1995_v54  ;;  %v2341_v57 = vmax.f32 %v2340_v48, %v2162_v55 }
 0x296   :  { %v1999_v58 = vpop.f32.mrb[84].mxu0  ;;  %v2166_v59 = vpop.f32.mrb[84].mxu1 }
 0x297   :  { %v2257_v61 = vmax.f32 %v2256_v52, %v1999_v58  ;;  %v2311_v62 = vmax.f32 %v2310_v53, %v2166_v59  ;;  %v2001_v63 = vpop.f32.mrb[85].mxu0  ;;  %v2168_v0 = vpop.f32.mrb[85].mxu1  ;;  %v2448_v53 = vmul.f32 %v2430_v29, %v5240_v33  ;;  %v2371_v29 = vrot.slane %v5271_v13, %v5225_v8 }
 0x298   :  { %v2288_v1 = vmax.f32 %v2287_v56, %v2001_v63  ;;  %v2342_v2 = vmax.f32 %v2341_v57, %v2168_v0  ;;  %v2485_v63 = vrot.slane %v5252_v50, %v5228_v9  ;;  %v1610_v0 = vmax.f32 %v1608_v31, %v1609_v24 }
 0x29a   :  { %v2005_v5 = vpop.f32.mrb[86].mxu0  ;;  %v2172_v6 = vpop.f32.mrb[86].mxu1 }
 0x29b   :  { %v2258_v11 = vmax.f32 %v2257_v61, %v2005_v5  ;;  %v2312_v17 = vmax.f32 %v2311_v62, %v2172_v6  ;;  %v2007_v12 = vpop.f32.mrb[87].mxu0  ;;  %v2174_v19 = vpop.f32.mrb[87].mxu1  ;;  %v2481_v62 = vrot.slane %v5252_v50, %v5225_v8  ;;  %v2472_v5 = vsel %vm5255_vm6, %v2443_v40, %v2447_v46 }
 0x29c   :  { %v2289_v22 = vmax.f32 %v2288_v1, %v2007_v12  ;;  %v2343_v15 = vmax.f32 %v2342_v2, %v2174_v19  ;;  %v1641_v6 = vmax.f32 %v1639_v35, %v1640_v51 }
 0x29e   :  { %v2011_v18 = vpop.f32.mrb[88].mxu0  ;;  %v2178_v21 = vpop.f32.mrb[88].mxu1 }
 0x29f   :  { %v2259_v34 = vmax.f32 %v2258_v11, %v2011_v18  ;;  %v2313_v26 = vmax.f32 %v2312_v17, %v2178_v21  ;;  %v2013_v30 = vpop.f32.mrb[89].mxu0  ;;  %v2180_v27 = vpop.f32.mrb[89].mxu1  ;;  %v2473_v17 = vsel %vm5259_vm7, %v2444_v45, %v2448_v53  ;;  %v2498_v18 = vadd.f32 %v2481_v62, %v2472_v5 }
 0x2a0   :  { %v2290_v32 = vmax.f32 %v2289_v22, %v2013_v30  ;;  %v2344_v36 = vmax.f32 %v2343_v15, %v2180_v27  ;;  %v1611_v21 = vrot.slane %v1610_v0, 1 }
 0x2a1   :  { %v2502_v35 = vmax.f32 %v2498_v18, 0.0 }
 0x2a2   :  { %v2017_v38 = vpop.f32.mrb[90].mxu0  ;;  %v2184_v39 = vpop.f32.mrb[90].mxu1 }
 0x2a3   :  { %v2260_v42 = vsel %vm1604_vm4, %v2017_v38, -inf  ;;  %v2314_v43 = vmax.f32 %v2313_v26, %v2184_v39  ;;  %v2019_v14 = vpop.f32.mrb[91].mxu0  ;;  %v2186_v44 = vpop.f32.mrb[91].mxu1  ;;  %v1642_v26 = vrot.slane %v1641_v6, 1  ;;  %v1612_v39 = vmax.f32 %v1610_v0, %v1611_v21 }
 0x2a4   :  { %v2261_v47 = vmax.f32 %v2259_v34, %v2260_v42  ;;  %v2291_v48 = vsel %vm1604_vm4, %v2019_v14, -inf  ;;  %v2345_v49 = vmax.f32 %v2344_v36, %v2186_v44  ;;  %v2499_v34 = vadd.f32 %v2485_v63, %v2473_v17 }
 0x2a5   :  { %v2292_v52 = vmax.f32 %v2290_v32, %v2291_v48  ;;  %v2375_v36 = vrot.slane %v5271_v13, %v5228_v9 }
 0x2a6   :  { %v2262_v55 = vrot.slane %v2261_v47, 4  ;;  %v2190_v56 = vpop.f32.mrb[92].mxu1  ;;  %v2503_v41 = vmax.f32 %v2499_v34, 0.0 }
 0x2a7   :  { %v2293_v58 = vrot.slane %v2292_v52, 4  ;;  %v2315_v59 = vmax.f32 %v2314_v43, %v2190_v56  ;;  %v2192_v61 = vpop.f32.mrb[93].mxu1  ;;  %v1643_v43 = vmax.f32 %v1641_v6, %v1642_v26  ;;  %v1700_v6 = vrot.slane %v5216_v10, 4 }
 0x2a8   :  { %v2263_v1 = vmax.f32 %v2261_v47, %v2262_v55  ;;  %v2346_v2 = vmax.f32 %v2345_v49, %v2192_v61  ;;  %v2510_v47 = vrot.slane %v2502_v35, 6 }
 0x2a9   :  { %v2294_v11 = vmax.f32 %v2292_v52, %v2293_v58  ;;  %v2511_v52 = vrot.slane %v2503_v41, 6  ;;  %v1701_v18 = vmax.f32 %v5216_v10, %v1700_v6 }
 0x2aa   :  { %v2264_v12 = vrot.slane %v2263_v1, 2  ;;  %v2196_v19 = vpop.f32.mrb[94].mxu1 }
 0x2ab   :  { %v2295_v22 = vrot.slane %v2294_v11, 2  ;;  %v2316_v15 = vmax.f32 %v2315_v59, %v2196_v19  ;;  %v2198_v16 = vpop.f32.mrb[95].mxu1 }
 0x2ac   :  { %v2265_v28 = vmax.f32 %v2263_v1, %v2264_v12  ;;  %v2347_v25 = vmax.f32 %v2346_v2, %v2198_v16  ;;  %v1669_v2 = vrot.slane %v5213_v7, 4  ;;  %v2382_v12 = vsub.s32 3, %v5218_v60 }
 0x2ad   :  { %v2296_v30 = vmax.f32 %v2294_v11, %v2295_v22  ;;  %v2378_v11 = vsub.s32 2, %v5218_v60 }
 0x2ae   :  { %v2266_v27 = vrot.slane %v2265_v28, 1  ;;  %v2202_v31 = vpop.f32.mrb[96].mxu1  ;;  %v2467_v60 = vrot.slane %v5233_v23, %v2382_v12 }
 0x2af   :  { %v2297_v32 = vrot.slane %v2296_v30, 1  ;;  %v2317_v37 = vmax.f32 %v2316_v15, %v2202_v31  ;;  %v2204_v38 = vpop.f32.mrb[97].mxu1  ;;  %v1670_v15 = vmax.f32 %v5213_v7, %v1669_v2  ;;  %v2434_v21 = vrot.slane %v5220_v3, %v2378_v11 }
 0x2b0   :  { %v2267_v40 = vmax.f32 %v2265_v28, %v2266_v27  ;;  %v2348_v42 = vmax.f32 %v2347_v25, %v2204_v38  ;;  %v2438_v25 = vrot.slane %v5220_v3, %v2382_v12  ;;  %v2463_v34 = vrot.slane %v5233_v23, %v2378_v11 }
 0x2b1   :  { %v2298_v14 = vmax.f32 %v2296_v30, %v2297_v32  ;;  %v1671_v27 = vrot.slane %v1670_v15, 2  ;;  %v1702_v7 = vrot.slane %v1701_v18, 2  ;;  %v2445_v10 = vmul.f32 %v2434_v21, %v5222_v4 }
 0x2b2   :  { %v2362_v44 = vsel %vm2361_vm8, %v1612_v39, %v2267_v40  ;;  %v2208_v45 = vpop.f32.mrb[98].mxu1  ;;  %v2446_v3 = vmul.f32 %v2438_v25, %v5222_v4  ;;  %vm5301_vm9 = vcmp.eq.s32.totalorder %v2463_v34, 1  ;;  %vm2471_vm10 = vcmp.eq.s32.totalorder %v2467_v60, 1 }
 0x2b3   :  { %v2388_v46 = vadd.f32 %v2371_v29, %v2362_v44  ;;  %v2363_v24 = vsel %vm2361_vm8, %v1643_v43, %v2298_v14  ;;  %v2318_v48 = vmax.f32 %v2317_v37, %v2208_v45  ;;  %v2210_v49 = vpop.f32.mrb[99].mxu1  ;;  %v2450_v37 = vmul.f32 %v2438_v25, %v5240_v33 }
 0x2b4   :  { %v2389_v51 = vadd.f32 %v2375_v36, %v2363_v24  ;;  %v2349_v53 = vmax.f32 %v2348_v42, %v2210_v49  ;;  %v2449_v36 = vmul.f32 %v2434_v21, %v5240_v33  ;;  %v1672_v23 = vmax.f32 %v1670_v15, %v1671_v27 }
 0x2b5   :  { %v2392_v54 = vmax.f32 %v2388_v46, 0.0  ;;  %v1703_v41 = vmax.f32 %v1701_v18, %v1702_v7  ;;  %v2489_v42 = vrot.slane %v5252_v50, %v2378_v11  ;;  %v2493_v44 = vrot.slane %v5252_v50, %v2382_v12 }
 0x2b6   :  { %v2393_v55 = vmax.f32 %v2389_v51, 0.0  ;;  %v2214_v56 = vpop.f32.mrb[100].mxu1  ;;  %v2474_v14 = vsel %vm5301_vm9, %v2445_v10, %v2449_v36  ;;  %v2475_v45 = vsel %vm2471_vm10, %v2446_v3, %v2450_v37  ;;  %v1673_v46 = vrot.slane %v1672_v23, 1 }
 0x2b7   :  { %v5280_v57 = vsel %vm2408_vm2, %v2392_v54, %v2510_v47  ;;  %v2319_v58 = vmax.f32 %v2318_v48, %v2214_v56  ;;  %v2216_v59 = vpop.f32.mrb[101].mxu1  ;;  %v1704_v47 = vrot.slane %v1703_v41, 1  ;;  %v2500_v48 = vadd.f32 %v2489_v42, %v2474_v14 }
 0x2b8   :  { %v5283_v61 = vsel %vm2408_vm2, %v2393_v55, %v2511_v52  ;;  %v2350_v62 = vmax.f32 %v2349_v53, %v2216_v59  ;;  %v2501_v51 = vadd.f32 %v2493_v44, %v2475_v45  ;;  %v2379_v53 = vrot.slane %v5271_v13, %v2378_v11 }
 0x2b9   :  { %v1674_v55 = vmax.f32 %v1672_v23, %v1673_v46  ;;  %v1705_v59 = vmax.f32 %v1703_v41, %v1704_v47 }
 0x2ba   :  { %v2220_v63 = vpop.f32.mrb[102].mxu1 }
 0x2bb   :  { %v2320_v0 = vmax.f32 %v2319_v58, %v2220_v63  ;;  %v2222_v1 = vpop.f32.mrb[103].mxu1  ;;  %v2383_v58 = vrot.slane %v5271_v13, %v2382_v12  ;;  %v2505_v63 = vmax.f32 %v2501_v51, 0.0 }
 0x2bc   :  { %v2351_v5 = vmax.f32 %v2350_v62, %v2222_v1  ;;  %v2504_v62 = vmax.f32 %v2500_v48, 0.0 }
 0x2be   :  { %v2226_v17 = vpop.f32.mrb[104].mxu1  ;;  %v2512_v6 = vrot.slane %v2504_v62, 6 }
 0x2bf   :  { %v2321_v19 = vmax.f32 %v2320_v0, %v2226_v17  ;;  %v2228_v22 = vpop.f32.mrb[105].mxu1 }
 0x2c0   :  { %v2352_v16 = vmax.f32 %v2351_v5, %v2228_v22 }
 0x2c2   :  { %v2232_v28 = vpop.f32.mrb[106].mxu1 }
 0x2c3   :  { %v2322_v26 = vsel %vm1604_vm4, %v2232_v28, -inf  ;;  %v2234_v30 = vpop.f32.mrb[107].mxu1 }
 0x2c4   :  { %v2323_v29 = vmax.f32 %v2321_v19, %v2322_v26  ;;  %v2353_v31 = vsel %vm1604_vm4, %v2234_v30, -inf  ;;  %v2513_v19 = vrot.slane %v2505_v63, 6 }
 0x2c5   :  { %v2354_v32 = vmax.f32 %v2352_v16, %v2353_v31 }
 0x2c6   :  { %v2324_v35 = vrot.slane %v2323_v29, 4 }
 0x2c7   :  { %v2355_v39 = vrot.slane %v2354_v32, 4 }
 0x2c8   :  { %v2325_v40 = vmax.f32 %v2323_v29, %v2324_v35 }
 0x2c9   :  { %v2356_v43 = vmax.f32 %v2354_v32, %v2355_v39 }
 0x2ca   :  { %v2326_v4 = vrot.slane %v2325_v40, 2 }
 0x2cb   :  { %v2357_v33 = vrot.slane %v2356_v43, 2 }
 0x2cc   :  { %v2327_v24 = vmax.f32 %v2325_v40, %v2326_v4 }
 0x2cd   :  { %v2358_v49 = vmax.f32 %v2356_v43, %v2357_v33 }
 0x2ce   :  { %v2328_v52 = vrot.slane %v2327_v24, 1 }
 0x2cf   :  { %v2359_v54 = vrot.slane %v2358_v49, 1 }
 0x2d0   :  { %v2329_v56 = vmax.f32 %v2327_v24, %v2328_v52 }
 0x2d1   :  { %v2360_v50 = vmax.f32 %v2358_v49, %v2359_v54 }
 0x2d2   :  { %v2364_v0 = vsel %vm2361_vm8, %v1674_v55, %v2329_v56 }
 0x2d3   :  { %v2390_v1 = vadd.f32 %v2379_v53, %v2364_v0  ;;  %v2365_v2 = vsel %vm2361_vm8, %v1705_v59, %v2360_v50 }
 0x2d4   :  { %v2391_v5 = vadd.f32 %v2383_v58, %v2365_v2 }
 0x2d5   :  { %v2394_v17 = vmax.f32 %v2390_v1, 0.0 }
 0x2d6   :  { %v2395_v22 = vmax.f32 %v2391_v5, 0.0 }
 0x2d7   :  { %v5314_v11 = vsel %vm2408_vm2, %v2394_v17, %v2512_v6 }
 0x2d8   :  { %v5317_v15 = vsel %vm2408_vm2, %v2395_v22, %v2513_v19 }
 0x2d9   :  { %4117 = dma.done.wait [#allocation4], 8192 }
 0x2da   :  { %4118 = vsyncadd [#allocation4], 4294959104  ;;  %2794 = vmatprep.mubr.f32.mxu0 %v5283_v61  ;;  %v2527_v13 = vld [vmem:[#allocation2 + $0x8] sm:$0xff]  ;;  %v2526_v12 = vld [vmem:[#allocation2] sm:$0xff] }
 0x2db   :  { %v2529_v16 = vld [vmem:[#allocation2 + $0x18] sm:$0xff]  ;;  %3575 = vmatprep.subr.bf16.mxu0 %v2527_v13  ;;  %v2528_v18 = vld [vmem:[#allocation2 + $0x10] sm:$0xff]  ;;  %v2531_v21 = vld [vmem:[#allocation2 + $0x28] sm:$0xff] }
 0x2dc   :  { %3577 = vmatpush1.bf16.msra.mxu0 %v2526_v12  ;;  %v2530_v28 = vld [vmem:[#allocation2 + $0x20] sm:$0xff]  ;;  %v2533_v25 = vld [vmem:[#allocation2 + $0x38] sm:$0xff]  ;;  %v2532_v34 = vld [vmem:[#allocation2 + $0x30] sm:$0xff] }
 0x2dd   :  { %3579 = vmatprep.subr.bf16.mxu0 %v2529_v16  ;;  %v2535_v26 = vld [vmem:[#allocation2 + $0x48] sm:$0xff]  ;;  %v2534_v30 = vld [vmem:[#allocation2 + $0x40] sm:$0xff]  ;;  %v2537_v61 = vld [vmem:[#allocation2 + $0x58] sm:$0xff] }
 0x2de   :  { %v2536_v27 = vld [vmem:[#allocation2 + $0x50] sm:$0xff]  ;;  %v2539_v60 = vld [vmem:[#allocation2 + $0x68] sm:$0xff]  ;;  %v2538_v29 = vld [vmem:[#allocation2 + $0x60] sm:$0xff] }
 0x2df   :  { %v2541_v31 = vld [vmem:[#allocation2 + $0x78] sm:$0xff]  ;;  %v2540_v7 = vld [vmem:[#allocation2 + $0x70] sm:$0xff]  ;;  %v2543_v32 = vld [vmem:[#allocation2 + $0x88] sm:$0xff] }
 0x2e0   :  { %3581 = vmatpush1.bf16.msra.mxu0 %v2528_v18  ;;  %v2542_v10 = vld [vmem:[#allocation2 + $0x80] sm:$0xff]  ;;  %v2545_v36 = vld [vmem:[#allocation2 + $0x98] sm:$0xff]  ;;  %v2544_v35 = vld [vmem:[#allocation2 + $0x90] sm:$0xff] }
 0x2e1   :  { %3583 = vmatprep.subr.bf16.mxu0 %v2531_v21  ;;  %v2547_v3 = vld [vmem:[#allocation2 + $0xa8] sm:$0xff]  ;;  %v2546_v37 = vld [vmem:[#allocation2 + $0xa0] sm:$0xff]  ;;  %v2549_v38 = vld [vmem:[#allocation2 + $0xb8] sm:$0xff] }
 0x2e2   :  { %v2548_v39 = vld [vmem:[#allocation2 + $0xb0] sm:$0xff]  ;;  %v2551_v23 = vld [vmem:[#allocation2 + $0xc8] sm:$0xff]  ;;  %v2550_v40 = vld [vmem:[#allocation2 + $0xc0] sm:$0xff] }
 0x2e3   :  { %v2553_v41 = vld [vmem:[#allocation2 + $0xd8] sm:$0xff]  ;;  %v2552_v42 = vld [vmem:[#allocation2 + $0xd0] sm:$0xff]  ;;  %v2555_v43 = vld [vmem:[#allocation2 + $0xe8] sm:$0xff] }
 0x2e4   :  { %3585 = vmatpush1.bf16.msra.mxu0 %v2530_v28  ;;  %v2554_v14 = vld [vmem:[#allocation2 + $0xe0] sm:$0xff]  ;;  %v2557_v44 = vld [vmem:[#allocation2 + $0xf8] sm:$0xff]  ;;  %v2556_v4 = vld [vmem:[#allocation2 + $0xf0] sm:$0xff] }
 0x2e5   :  { %3587 = vmatprep.subr.bf16.mxu0 %v2533_v25  ;;  %v2559_v45 = vld [vmem:[#allocation2 + $0x108] sm:$0xff]  ;;  %v2558_v33 = vld [vmem:[#allocation2 + $0x100] sm:$0xff]  ;;  %v2561_v46 = vld [vmem:[#allocation2 + $0x118] sm:$0xff] }
 0x2e6   :  { %v2560_v24 = vld [vmem:[#allocation2 + $0x110] sm:$0xff]  ;;  %v2563_v47 = vld [vmem:[#allocation2 + $0x128] sm:$0xff]  ;;  %v2562_v48 = vld [vmem:[#allocation2 + $0x120] sm:$0xff] }
 0x2e7   :  { %v2565_v49 = vld [vmem:[#allocation2 + $0x138] sm:$0xff]  ;;  %v2564_v51 = vld [vmem:[#allocation2 + $0x130] sm:$0xff]  ;;  %v2567_v52 = vld [vmem:[#allocation2 + $0x148] sm:$0xff] }
 0x2e8   :  { %3589 = vmatpush1.bf16.msra.mxu0 %v2532_v34  ;;  %v2566_v53 = vld [vmem:[#allocation2 + $0x140] sm:$0xff]  ;;  %v2569_v54 = vld [vmem:[#allocation2 + $0x158] sm:$0xff]  ;;  %v2571_v55 = vld [vmem:[#allocation2 + $0x168] sm:$0xff] }
 0x2e9   :  { %3591 = vmatprep.subr.bf16.mxu0 %v2535_v26  ;;  %v2570_v56 = vld [vmem:[#allocation2 + $0x160] sm:$0xff]  ;;  %v2573_v58 = vld [vmem:[#allocation2 + $0x178] sm:$0xff]  ;;  %v2572_v59 = vld [vmem:[#allocation2 + $0x170] sm:$0xff] }
 0x2ea   :  { %v2575_v62 = vld [vmem:[#allocation2 + $0x188] sm:$0xff]  ;;  %v2574_v50 = vld [vmem:[#allocation2 + $0x180] sm:$0xff]  ;;  %v2577_v63 = vld [vmem:[#allocation2 + $0x198] sm:$0xff] }
 0x2eb   :  { %v2576_v0 = vld [vmem:[#allocation2 + $0x190] sm:$0xff]  ;;  %v2579_v1 = vld [vmem:[#allocation2 + $0x1a8] sm:$0xff]  ;;  %v2578_v2 = vld [vmem:[#allocation2 + $0x1a0] sm:$0xff] }
 0x2ec   :  { %3593 = vmatpush1.bf16.msra.mxu0 %v2534_v30  ;;  %v2581_v5 = vld [vmem:[#allocation2 + $0x1b8] sm:$0xff]  ;;  %v2580_v6 = vld [vmem:[#allocation2 + $0x1b0] sm:$0xff]  ;;  %v2583_v17 = vld [vmem:[#allocation2 + $0x1c8] sm:$0xff] }
 0x2ed   :  { %3595 = vmatprep.subr.bf16.mxu0 %v2537_v61  ;;  %v2582_v19 = vld [vmem:[#allocation2 + $0x1c0] sm:$0xff]  ;;  %v2585_v22 = vld [vmem:[#allocation2 + $0x1d8] sm:$0xff]  ;;  %v2587_v13 = vld [vmem:[#allocation2 + $0x1e8] sm:$0xff] }
 0x2ee   :  { %v2586_v12 = vld [vmem:[#allocation2 + $0x1e0] sm:$0xff]  ;;  %v2589_v16 = vld [vmem:[#allocation2 + $0x1f8] sm:$0xff]  ;;  %v2588_v18 = vld [vmem:[#allocation2 + $0x1f0] sm:$0xff] }
 0x2ef   :  { %v2718_v21 = vld [vmem:[#allocation11] sm:$0x3] }
 0x2f0   :  { %3597 = vmatpush1.bf16.msra.mxu0 %v2536_v27  ;;  %v2723_v28 = vrot.slane %v2718_v21, %v5225_v8  ;;  %v2727_v25 = vrot.slane %v2718_v21, %v5228_v9 }
 0x2f1   :  { %3599 = vmatprep.subr.bf16.mxu0 %v2539_v60 }
 0x2f4   :  { %3601 = vmatpush1.bf16.msra.mxu0 %v2538_v29 }
 0x2f5   :  { %3603 = vmatprep.subr.bf16.mxu0 %v2541_v31 }
 0x2f8   :  { %3605 = vmatpush1.bf16.msra.mxu0 %v2540_v7 }
 0x2f9   :  { %3607 = vmatprep.subr.bf16.mxu0 %v2543_v32 }
 0x2fc   :  { %3609 = vmatpush1.bf16.msra.mxu0 %v2542_v10 }
 0x2fd   :  { %3611 = vmatprep.subr.bf16.mxu0 %v2545_v36 }
 0x300   :  { %3613 = vmatpush1.bf16.msra.mxu0 %v2544_v35 }
 0x301   :  { %3615 = vmatprep.subr.bf16.mxu0 %v2547_v3 }
 0x304   :  { %3617 = vmatpush1.bf16.msra.mxu0 %v2546_v37 }
 0x305   :  { %3619 = vmatprep.subr.bf16.mxu0 %v2549_v38 }
 0x308   :  { %3621 = vmatpush1.bf16.msra.mxu0 %v2548_v39 }
 0x309   :  { %3623 = vmatprep.subr.bf16.mxu0 %v2551_v23 }
 0x30c   :  { %3625 = vmatpush1.bf16.msra.mxu0 %v2550_v40 }
 0x30d   :  { %3627 = vmatprep.subr.bf16.mxu0 %v2553_v41 }
 0x310   :  { %3629 = vmatpush1.bf16.msra.mxu0 %v2552_v42 }
 0x311   :  { %3631 = vmatprep.subr.bf16.mxu0 %v2555_v43 }
 0x314   :  { %3633 = vmatpush1.bf16.msra.mxu0 %v2554_v14 }
 0x315   :  { %3635 = vmatprep.subr.bf16.mxu0 %v2557_v44 }
 0x318   :  { %3637 = vmatpush1.bf16.msra.mxu0 %v2556_v4 }
 0x319   :  { %3639 = vmatprep.subr.bf16.mxu0 %v2559_v45 }
 0x31b   :  { %2795 = vmatmul.mubr.f32.vlgmr.msra.gmra.mrb[92].mxu0 %v5280_v57  ;;  %v2568_v57 = vld [vmem:[#allocation2 + $0x150] sm:$0xff] }
 0x31c   :  { %3641 = vmatpush1.bf16.msra.mxu0 %v2558_v33  ;;  %2865 = vmatprep.mubr.f32.mxu0 %v5317_v15  ;;  %v2584_v15 = vld [vmem:[#allocation2 + $0x1d0] sm:$0xff] }
 0x31d   :  { %3643 = vmatprep.subr.bf16.mxu0 %v2561_v46 }
 0x320   :  { %3645 = vmatpush1.bf16.msra.mxu0 %v2560_v24 }
 0x321   :  { %3647 = vmatprep.subr.bf16.mxu0 %v2563_v47 }
 0x324   :  { %3649 = vmatpush1.bf16.msra.mxu0 %v2562_v48 }
 0x325   :  { %3651 = vmatprep.subr.bf16.mxu0 %v2565_v49 }
 0x328   :  { %3653 = vmatpush1.bf16.msra.mxu0 %v2564_v51 }
 0x329   :  { %3655 = vmatprep.subr.bf16.mxu0 %v2567_v52 }
 0x32c   :  { %3657 = vmatpush1.bf16.msra.mxu0 %v2566_v53 }
 0x32d   :  { %3659 = vmatprep.subr.bf16.mxu0 %v2569_v54 }
 0x330   :  { %3661 = vmatpush1.bf16.msra.mxu0 %v2568_v57 }
 0x331   :  { %3663 = vmatprep.subr.bf16.mxu0 %v2571_v55 }
 0x334   :  { %3665 = vmatpush1.bf16.msra.mxu0 %v2570_v56 }
 0x335   :  { %3667 = vmatprep.subr.bf16.mxu0 %v2573_v58 }
 0x338   :  { %3669 = vmatpush1.bf16.msra.mxu0 %v2572_v59 }
 0x339   :  { %3671 = vmatprep.subr.bf16.mxu0 %v2575_v62 }
 0x33c   :  { %3673 = vmatpush1.bf16.msra.mxu0 %v2574_v50 }
 0x33d   :  { %3675 = vmatprep.subr.bf16.mxu0 %v2577_v63 }
 0x340   :  { %3677 = vmatpush1.bf16.msra.mxu0 %v2576_v0 }
 0x341   :  { %3679 = vmatprep.subr.bf16.mxu0 %v2579_v1 }
 0x344   :  { %3681 = vmatpush1.bf16.msra.mxu0 %v2578_v2 }
 0x345   :  { %3683 = vmatprep.subr.bf16.mxu0 %v2581_v5 }
 0x348   :  { %3685 = vmatpush1.bf16.msra.mxu0 %v2580_v6 }
 0x349   :  { %3687 = vmatprep.subr.bf16.mxu0 %v2583_v17 }
 0x34c   :  { %3689 = vmatpush1.bf16.msra.mxu0 %v2582_v19 }
 0x34d   :  { %3691 = vmatprep.subr.bf16.mxu0 %v2585_v22 }
 0x350   :  { %3693 = vmatpush1.bf16.msra.mxu0 %v2584_v15 }
 0x351   :  { %3695 = vmatprep.subr.bf16.mxu0 %v2587_v13 }
 0x354   :  { %3697 = vmatpush1.bf16.msra.mxu0 %v2586_v12 }
 0x355   :  { %3699 = vmatprep.subr.bf16.mxu0 %v2589_v16 }
 0x358   :  { %3701 = vmatpush1.bf16.msra.mxu0 %v2588_v18 }
 0x35b   :  { %2866 = vmatmul.mubr.f32.vlgmr.msra.gmra.mrb[92].mxu0 %v5314_v11 }
 0x42e   :  { %v2867_v34 = vpop.f32.mrb[92].mxu0 }
 0x42f   :  { %v5325_v26 = vadd.f32 %v2867_v34, %v2723_v28  ;;  %v2869_v30 = vpop.f32.mrb[93].mxu0 }
 0x430   :  { %v3793_v61 = vadd.f32 %v2869_v30, %v2727_v25 }
 0x431   :  { %v2872_v27 = vmax.f32 %v5325_v26, 0.0 }
 0x432   :  { %v2873_v60 = vmax.f32 %v3793_v61, 0.0 }
 0x433   :  { %4119 = dma.done.wait [#allocation4 + $0x1], 4096 }
 0x434   :  { %4120 = vsyncadd [#allocation4 + $0x1], 4294963200  ;;  %3050 = vmatprep.mubr.f32.mxu1 %v2873_v60  ;;  %v2879_v29 = vld [vmem:[#allocation3 + $0x8] sm:$0xff]  ;;  %v2878_v31 = vld [vmem:[#allocation3] sm:$0xff]  ;;  %v4137_v55 = vmov 0.0|0.0   ;;  %vm4138_vm11 = vmmov 0  }
 0x435   :  { %v2881_v7 = vld [vmem:[#allocation3 + $0x18] sm:$0xff]  ;;  %3703 = vmatprep.subr.bf16.mxu1 %v2879_v29  ;;  %v2880_v11 = vld [vmem:[#allocation3 + $0x10] sm:$0xff]  ;;  %v2883_v32 = vld [vmem:[#allocation3 + $0x28] sm:$0xff] }
 0x436   :  { %3705 = vmatpush1.bf16.msra.mxu1 %v2878_v31  ;;  %v2882_v10 = vld [vmem:[#allocation3 + $0x20] sm:$0xff]  ;;  %v2885_v36 = vld [vmem:[#allocation3 + $0x38] sm:$0xff]  ;;  %v2884_v35 = vld [vmem:[#allocation3 + $0x30] sm:$0xff] }
 0x437   :  { %3707 = vmatprep.subr.bf16.mxu1 %v2881_v7  ;;  %v2887_v3 = vld [vmem:[#allocation3 + $0x48] sm:$0xff]  ;;  %v2886_v37 = vld [vmem:[#allocation3 + $0x40] sm:$0xff]  ;;  %v2889_v38 = vld [vmem:[#allocation3 + $0x58] sm:$0xff] }
 0x438   :  { %v2888_v39 = vld [vmem:[#allocation3 + $0x50] sm:$0xff]  ;;  %v2891_v23 = vld [vmem:[#allocation3 + $0x68] sm:$0xff]  ;;  %v2890_v40 = vld [vmem:[#allocation3 + $0x60] sm:$0xff] }
 0x439   :  { %v2893_v41 = vld [vmem:[#allocation3 + $0x78] sm:$0xff]  ;;  %v2892_v42 = vld [vmem:[#allocation3 + $0x70] sm:$0xff]  ;;  %v2895_v43 = vld [vmem:[#allocation3 + $0x88] sm:$0xff] }
 0x43a   :  { %3709 = vmatpush1.bf16.msra.mxu1 %v2880_v11  ;;  %v2894_v14 = vld [vmem:[#allocation3 + $0x80] sm:$0xff]  ;;  %v2897_v44 = vld [vmem:[#allocation3 + $0x98] sm:$0xff]  ;;  %v2896_v4 = vld [vmem:[#allocation3 + $0x90] sm:$0xff] }
 0x43b   :  { %3711 = vmatprep.subr.bf16.mxu1 %v2883_v32  ;;  %v2899_v45 = vld [vmem:[#allocation3 + $0xa8] sm:$0xff]  ;;  %v2898_v33 = vld [vmem:[#allocation3 + $0xa0] sm:$0xff]  ;;  %v2901_v46 = vld [vmem:[#allocation3 + $0xb8] sm:$0xff] }
 0x43c   :  { %v2900_v24 = vld [vmem:[#allocation3 + $0xb0] sm:$0xff]  ;;  %v2903_v47 = vld [vmem:[#allocation3 + $0xc8] sm:$0xff]  ;;  %v2902_v48 = vld [vmem:[#allocation3 + $0xc0] sm:$0xff] }
 0x43d   :  { %v2905_v49 = vld [vmem:[#allocation3 + $0xd8] sm:$0xff]  ;;  %v2904_v51 = vld [vmem:[#allocation3 + $0xd0] sm:$0xff]  ;;  %v2907_v52 = vld [vmem:[#allocation3 + $0xe8] sm:$0xff] }
 0x43e   :  { %3713 = vmatpush1.bf16.msra.mxu1 %v2882_v10  ;;  %v2906_v53 = vld [vmem:[#allocation3 + $0xe0] sm:$0xff]  ;;  %v2909_v54 = vld [vmem:[#allocation3 + $0xf8] sm:$0xff]  ;;  %v2908_v57 = vld [vmem:[#allocation3 + $0xf0] sm:$0xff] }
 0x43f   :  { %3715 = vmatprep.subr.bf16.mxu1 %v2885_v36  ;;  %v3484_v56 = vld [vmem:[%s5411_s14] sm:$0xff]   ;;  %v3515_v58 = vld [vmem:[%s5411_s14 + $0x8] sm:$0xff]   ;;  %v3516_v59 = vld [vmem:[%s5411_s14 + $0x10] sm:$0xff]  }
 0x440   :  { %v3517_v62 = vld [vmem:[%s5411_s14 + $0x18] sm:$0xff]   ;;  %v3518_v50 = vld [vmem:[%s5411_s14 + $0x20] sm:$0xff]   ;;  %v3519_v63 = vld [vmem:[%s5411_s14 + $0x28] sm:$0xff]  }
 0x441   :  { %v3520_v0 = vld [vmem:[%s5411_s14 + $0x30] sm:$0xff]   ;;  %v3521_v1 = vld [vmem:[%s5411_s14 + $0x38] sm:$0xff]   ;;  %v2974_v2 = vld [vmem:[#allocation13] sm:$0x3]  ;;  %s4139_s14 = smov [#allocation23]  }
 0x442   :  { %3717 = vmatpush1.bf16.msra.mxu1 %v2884_v35  ;;  %v2979_v5 = vrot.slane %v2974_v2, %v5225_v8  ;;  %v2983_v6 = vrot.slane %v2974_v2, %v5228_v9  ;;  %s3270_s5 = sshll.u32 %s4139_s14, 4  ;;  %s3271_s5 = int_to_ptr.vmem [resolvable:$true] %s3270_s5 }
 0x443   :  { %3719 = vmatprep.subr.bf16.mxu1 %v2887_v3  ;;  %s4039_s30 = scalar_lea.vmem %s3271_s5, 32  ;;  %p4044_p11 = scmp.lt.s32.totalorder %s3271_s5, %s3271_s5 }
 0x444   :  { %p4040_p10 = scmp.ne.s32.totalorder %s3271_s5, %s4039_s30  ;;  %p4045_p12 = scmp.lt.s32.totalorder %s4039_s30, %s4039_s30 }
 0x446   :  { %3721 = vmatpush1.bf16.msra.mxu1 %v2886_v37  ;;  %p4046_p13 = por %p4045_p12, %p4044_p11 }
 0x447   :  { %3723 = vmatprep.subr.bf16.mxu1 %v2889_v38 }
 0x448   :  { %p4047_p0 = pnand %p4046_p13, %p4040_p10 }
 0x44a   :  { %3725 = vmatpush1.bf16.msra.mxu1 %v2888_v39 }
 0x44b   :  { %3727 = vmatprep.subr.bf16.mxu1 %v2891_v23 }
 0x44e   :  { %3729 = vmatpush1.bf16.msra.mxu1 %v2890_v40 }
 0x44f   :  { %3731 = vmatprep.subr.bf16.mxu1 %v2893_v41 }
 0x452   :  { %3733 = vmatpush1.bf16.msra.mxu1 %v2892_v42 }
 0x453   :  { %3735 = vmatprep.subr.bf16.mxu1 %v2895_v43 }
 0x456   :  { %3737 = vmatpush1.bf16.msra.mxu1 %v2894_v14 }
 0x457   :  { %3739 = vmatprep.subr.bf16.mxu1 %v2897_v44 }
 0x45a   :  { %3741 = vmatpush1.bf16.msra.mxu1 %v2896_v4 }
 0x45b   :  { %3743 = vmatprep.subr.bf16.mxu1 %v2899_v45 }
 0x45e   :  { %3745 = vmatpush1.bf16.msra.mxu1 %v2898_v33 }
 0x45f   :  { %3747 = vmatprep.subr.bf16.mxu1 %v2901_v46 }
 0x462   :  { %3749 = vmatpush1.bf16.msra.mxu1 %v2900_v24 }
 0x463   :  { %3751 = vmatprep.subr.bf16.mxu1 %v2903_v47 }
 0x466   :  { %3753 = vmatpush1.bf16.msra.mxu1 %v2902_v48  ;;  %v3476_v48 = vld [vmem:[#allocation14] ss:$0 sm:$0xff] }
 0x467   :  { %3755 = vmatprep.subr.bf16.mxu1 %v2905_v49 }
 0x46a   :  { %3757 = vmatpush1.bf16.msra.mxu1 %v2904_v51  ;;  %v3477_v51 = vld [vmem:[#allocation16] ss:$0 sm:$0xff] }
 0x46b   :  { %3759 = vmatprep.subr.bf16.mxu1 %v2907_v52 }
 0x46e   :  { %3761 = vmatpush1.bf16.msra.mxu1 %v2906_v53 }
 0x46f   :  { %3763 = vmatprep.subr.bf16.mxu1 %v2909_v54 }
 0x472   :  { %3765 = vmatpush1.bf16.msra.mxu1 %v2908_v57  ;;  %v3478_v57 = vld [vmem:[#allocation17] ss:$0 sm:$0xff] }
 0x473   :  { %3766 = vmatprep.subr.bf16.mxu1 %v4137_v55 }
 0x475   :  { %3051 = vmatmul.mubr.f32.vlgmr.msra.gmra.mrb[108].mxu1 %v2872_v27 }
 0x476   :  { %3768 = vmatpush3.bf16.msra.mxu1 %v3484_v56  ;;  %3571 = vmatprep.mubr.msk.f32.mxu1 %vm4138_vm11, %v4135_v20  ;;  %v3479_v56 = vld [vmem:[#allocation19] ss:$0 sm:$0xff] }
 0x477   :  { %3769 = vmatprep.subr.bf16.mxu1 %v4137_v55 }
 0x47a   :  { %3771 = vmatpush3.bf16.msra.mxu1 %v3515_v58 }
 0x47b   :  { %3772 = vmatprep.subr.bf16.mxu1 %v4137_v55 }
 0x47e   :  { %3774 = vmatpush3.bf16.msra.mxu1 %v3516_v59 }
 0x47f   :  { %3775 = vmatprep.subr.bf16.mxu1 %v4137_v55 }
 0x482   :  { %3777 = vmatpush3.bf16.msra.mxu1 %v3517_v62 }
 0x483   :  { %3778 = vmatprep.subr.bf16.mxu1 %v4137_v55 }
 0x486   :  { %3780 = vmatpush3.bf16.msra.mxu1 %v3518_v50 }
 0x487   :  { %3781 = vmatprep.subr.bf16.mxu1 %v4137_v55 }
 0x48a   :  { %3783 = vmatpush3.bf16.msra.mxu1 %v3519_v63 }
 0x48b   :  { %3784 = vmatprep.subr.bf16.mxu1 %v4137_v55 }
 0x48e   :  { %3786 = vmatpush3.bf16.msra.mxu1 %v3520_v0 }
 0x48f   :  { %3787 = vmatprep.subr.bf16.mxu1 %v4137_v55 }
 0x492   :  { %3789 = vmatpush3.bf16.msra.mxu1 %v3521_v1 }
 0x548   :  { %v3052_v17 = vpop.f32.mrb[108].mxu1 }
 0x549   :  { %v3053_v19 = vadd.f32 %v3052_v17, %v2979_v5  ;;  %v3054_v22 = vpop.f32.mrb[109].mxu1 }
 0x54a   :  { %v3055_v15 = vadd.f32 %v3054_v22, %v2983_v6 }
 0x54b   :  { %v3059_v13 = vsel %vm2408_vm2, %v3053_v19, 0.0 }
 0x54c   :  { %v3060_v12 = vrot.slane %v3059_v13, 4  ;;  %v3098_v16 = vrot.slane %v3055_v15, 2 }
 0x54e   :  { %v3061_v18 = vadd.f32 %v3060_v12, %v3059_v13  ;;  %v3100_v21 = vsel %vm2408_vm2, %v3098_v16, 0.0 }
 0x54f   :  { %v3101_v28 = vrot.slane %v3100_v21, 4 }
 0x550   :  { %v3062_v25 = vrot.slane %v3061_v18, 2 }
 0x551   :  { %v3102_v34 = vadd.f32 %v3101_v28, %v3100_v21 }
 0x552   :  { %v3063_v20 = vadd.f32 %v3062_v25, %v3061_v18 }
 0x553   :  { %v3103_v26 = vrot.slane %v3102_v34, 2 }
 0x554   :  { %v3064_v30 = vrot.slane %v3063_v20, 1 }
 0x555   :  { %v3104_v8 = vadd.f32 %v3103_v26, %v3102_v34 }
 0x556   :  { %v3065_v61 = vadd.f32 %v3064_v30, %v3063_v20 }
 0x557   :  { %v3105_v9 = vrot.slane %v3104_v8, 1 }
 0x558   :  { %v3067_v27 = vmul.f32 0.5, %v3065_v61 }
 0x559   :  { %v3106_v60 = vadd.f32 %v3105_v9, %v3104_v8 }
 0x55a   :  { %v3068_v29 = vsub.f32 %v3053_v19, %v3067_v27 }
 0x55b   :  { %v3107_v31 = vmul.f32 0.5, %v3106_v60 }
 0x55c   :  { %v3069_v7 = vmul.f32 %v3068_v29, %v3068_v29 }
 0x55d   :  { %v3108_v11 = vsub.f32 %v3055_v15, %v3107_v31 }
 0x55e   :  { %v3070_v32 = vsel %vm2408_vm2, %v3069_v7, 0.0 }
 0x55f   :  { %v3071_v10 = vrot.slane %v3070_v32, 4  ;;  %v3109_v36 = vmul.f32 %v3108_v11, %v3108_v11 }
 0x561   :  { %v3072_v35 = vadd.f32 %v3071_v10, %v3070_v32  ;;  %v3111_v3 = vrot.slane %v3109_v36, 2 }
 0x563   :  { %v3073_v37 = vrot.slane %v3072_v35, 2  ;;  %v3113_v38 = vsel %vm2408_vm2, %v3111_v3, 0.0 }
 0x564   :  { %v3114_v39 = vrot.slane %v3113_v38, 4 }
 0x565   :  { %v3074_v23 = vadd.f32 %v3073_v37, %v3072_v35 }
 0x566   :  { %v3115_v40 = vadd.f32 %v3114_v39, %v3113_v38 }
 0x567   :  { %v3075_v41 = vrot.slane %v3074_v23, 1 }
 0x568   :  { %v3116_v42 = vrot.slane %v3115_v40, 2 }
 0x569   :  { %v3076_v43 = vadd.f32 %v3075_v41, %v3074_v23 }
 0x56a   :  { %v3117_v14 = vadd.f32 %v3116_v42, %v3115_v40 }
 0x56b   :  { %v3077_v44 = vmul.f32 0.5, %v3076_v43 }
 0x56c   :  { %v3118_v4 = vrot.slane %v3117_v14, 1 }
 0x56d   :  { %v3078_v45 = vadd.f32 1e-05, %v3077_v44 }
 0x56e   :  { %v3119_v33 = vadd.f32 %v3118_v4, %v3117_v14 }
 0x56f   :  { %3815 = vrsqrt.f32 %v3078_v45 }
 0x570   :  { %v3120_v46 = vmul.f32 0.5, %v3119_v33 }
 0x572   :  { %v3121_v24 = vadd.f32 1e-05, %v3120_v46 }
 0x574   :  { %3817 = vrsqrt.f32 %v3121_v24 }
 0x579   :  { %v3816_v47 = vpop.eup %3815 }
 0x57a   :  { %v3080_v49 = vmul.f32 %v3816_v47, %v3068_v29 }
 0x57c   :  { %v3087_v52 = vmul.f32 %v3476_v48, %v3080_v49 }
 0x57e   :  { %v3818_v53 = vpop.eup %3817  ;;  %v3094_v54 = vadd.f32 %v3477_v51, %v3087_v52 }
 0x57f   :  { %v3123_v55 = vmul.f32 %v3818_v53, %v3108_v11 }
 0x580   :  { %3252 = vst [vmem:[#allocation23] sm:$0x3] %v3094_v54 }
 0x581   :  { %v3130_v58 = vmul.f32 %v3478_v57, %v3123_v55 }
 0x583   :  { %v3137_v59 = vadd.f32 %v3479_v56, %v3130_v58 }
 0x585   :  { %3253 = vst [vmem:[#allocation25 - $0x2] sm:$0xc] %v3137_v59  ;;  %v3139_v62 = vrot.slane %v3137_v59, 2 }
 0x587   :  { %v3141_v50 = vmul.f32 %v3139_v62, %v3094_v54 }
 0x589   :  { %3572 = vmatmul.mubr.f32.vlgmr.msra.gmra.mrb[110].mxu1 %v3141_v50 }
 0x58a   :  { %4050 = shalt.err (!%p4047_p0)
}
 0x58b   :  { %s4051_s11 = scalar_lea.hbm %s5414_s17, 32 }
 0x58c   :  { %p4052_p1 = scmp.ne.s32.totalorder %s5414_s17, %s4051_s11  ;;  %p4055_p2 = scmp.lt.u32.totalorder %s4051_s11, %s5414_s17 }
 0x58e   :  { %p4057_p3 = pnand %p4055_p2, %p4052_p1 }
 0x590   :  { %4060 = shalt.err (!%p4057_p3)
}
 0x591   :  { %3273 = dma.vmem_to_hbm [thread:$0]  %s3271_s5, 32, %s5414_s17, [#allocation24]  }
 0x592   :  { %s4140_s28 = smov [#allocation25]  }
 0x593   :  { %s3280_s1 = sshll.u32 %s4140_s28, 4  ;;  %s3281_s1 = int_to_ptr.vmem [resolvable:$true] %s3280_s1 }
 0x594   :  { %s4061_s21 = scalar_lea.vmem %s3281_s1, 32  ;;  %p4066_p5 = scmp.lt.s32.totalorder %s3281_s1, %s3281_s1 }
 0x595   :  { %p4062_p4 = scmp.ne.s32.totalorder %s3281_s1, %s4061_s21  ;;  %p4067_p6 = scmp.lt.s32.totalorder %s4061_s21, %s4061_s21 }
 0x597   :  { %p4068_p7 = por %p4067_p6, %p4066_p5 }
 0x599   :  { %p4069_p8 = pnand %p4068_p7, %p4062_p4 }
 0x59b   :  { %4072 = shalt.err (!%p4069_p8)
}
 0x59c   :  { %s4073_s4 = scalar_lea.hbm %s5415_s18, 32 }
 0x59d   :  { %p4074_p9 = scmp.ne.s32.totalorder %s5415_s18, %s4073_s4  ;;  %p4077_p10 = scmp.lt.u32.totalorder %s4073_s4, %s5415_s18 }
 0x59f   :  { %p4079_p11 = pnand %p4077_p10, %p4074_p9 }
 0x5a1   :  { %4082 = shalt.err (!%p4079_p11)
}
 0x5a2   :  { %3283 = dma.vmem_to_hbm [thread:$0]  %s3281_s1, 32, %s5415_s18, [#allocation24]   ;;  %v3480_v63 = vld [vmem:[#allocation20] ss:$0 sm:$0xff] }
 0x5a3   :  { %s4141_s6 = smov [#allocation22]  }
 0x5a4   :  { %s3260_s27 = sshll.u32 %s4141_s6, 4  ;;  %s3261_s27 = int_to_ptr.vmem [resolvable:$true] %s3260_s27 }
 0x5a5   :  { %s4083_s29 = scalar_lea.vmem %s3261_s27, 32  ;;  %p4088_p13 = scmp.lt.s32.totalorder %s3261_s27, %s3261_s27 }
 0x5a6   :  { %p4084_p12 = scmp.ne.s32.totalorder %s3261_s27, %s4083_s29  ;;  %p4089_p0 = scmp.lt.s32.totalorder %s4083_s29, %s4083_s29 }
 0x5a8   :  { %p4090_p1 = por %p4089_p0, %p4088_p13 }
 0x5aa   :  { %p4091_p2 = pnand %p4090_p1, %p4084_p12 }
 0x65c   :  { %v3247_v0 = vpop.f32.mrb[110].mxu1 }
 0x65d   :  { %v3248_v1 = vadd.f32 %v3480_v63, %v3247_v0  ;;  %v3573_v2 = vpop.f32.mrb[111].mxu1 }
 0x65f   :  { %3251 = vst [vmem:[#allocation22] sm:$0x3] %v3248_v1 }
 0x660   :  { %4094 = shalt.err (!%p4091_p2)
}
 0x661   :  { %s4095_s14 = scalar_lea.hbm %s5413_s16, 32 }
 0x662   :  { %p4096_p3 = scmp.ne.s32.totalorder %s5413_s16, %s4095_s14  ;;  %p4099_p4 = scmp.lt.u32.totalorder %s4095_s14, %s5413_s16 }
 0x664   :  { %p4101_p5 = pnand %p4099_p4, %p4096_p3 }
 0x666   :  { %4104 = shalt.err (!%p4101_p5)
}
 0x667   :  { %3263 = dma.vmem_to_hbm [thread:$0]  %s3261_s27, 32, %s5413_s16, [#allocation7]  }
 0x668   :  { %4121 = dma.done.wait [#allocation7], 32  }
 0x669   :  { %4122 = vsyncadd [#allocation7], 4294967264 }
 0x66a   :  { %4123 = dma.done.wait [#allocation24], 64  }
 0x66b   :  { %4124 = vsyncadd [#allocation24], 4294967232 }
 0x66c   :  { %3293 = vsyncpa [#allocation6], 1 }
 0x66d   :  { %3294 = vsyncpa [#allocation9], 1 }
 0x66e   :  { %3295 = vsyncpa [#allocation12], 1 }
 0x66f   :  { %3296 = vsyncpa [#allocation15], 1 }
 0x670   :  { %3297 = vsyncpa [#allocation18], 1 }
 0x671   :  { %3298 = vsyncpa [#allocation21], 1 }
 0x672   :  { %3299 = vsyncpa [#allocation7], 1 }
 0x673   :  { %3300 = vsyncpa [#allocation24], 1 }
 0x674   :  { %3301 = vsyncmov [#allocation4] }
 0x677   :  { %s3302_s22 = vpop.sfrf %3301 }
 0x678   :  { %p3481_p6 = scmp.ne.s32.totalorder %s3302_s22, 0 }
 0x67a   :  { %3306 = shalt.err (%p3481_p6)  }
 0x67b   :  { %3308 = vsyncmov [#allocation4 + $0x1] }
 0x67e   :  { %s3309_s2 = vpop.sfrf %3308 }
 0x67f   :  { %p3482_p7 = scmp.ne.s32.totalorder %s3309_s2, 0 }
 0x681   :  { %3313 = shalt.err (%p3482_p7)  }

</bundles_post_ra>
